<compile_context>
chip_gen: v6e
topology: v6e:2x2x1
jax: 0.10.0
libtpu: 0.0.40
codegen_flags: <defaults>
</compile_context>

<pallas_src>
import jax
import jax.numpy as jnp
from jax.experimental import pallas as pl
from jax.experimental.pallas import tpu as pltpu


# -----------------------------------------------------------------------------
# Kernel
# -----------------------------------------------------------------------------
def autoencoder_kernel(x_ref, we_ref, be_ref, wd_ref, bd_ref, out_ref):
    # Encoder: (tb, Q) @ (Q, L) on the MXU in bf16, accumulate f32.
    x_bf16 = x_ref[...].astype(jnp.bfloat16)
    h = jnp.dot(x_bf16, we_ref[...], preferred_element_type=jnp.float32)
    h = jax.nn.sigmoid(h + be_ref[...])                      # f32 bias + sigmoid
    # Decoder: (tb, L) @ (L, Q) in bf16, accumulate f32.
    r = jnp.dot(h.astype(jnp.bfloat16), wd_ref[...],
                preferred_element_type=jnp.float32)
    out_ref[...] = jax.nn.sigmoid(r + bd_ref[...]).astype(out_ref.dtype)


# -----------------------------------------------------------------------------
# Parameter preparation (one-time, not in the per-call hot path)
# -----------------------------------------------------------------------------
def prepare_params(enc_w, enc_b, dec_w, dec_b, *, compute_dtype=jnp.bfloat16):
    """One-time conversion from torch nn.Linear layout.

    enc_w: (latent, num_question), dec_w: (num_question, latent) -> returns
    weights transposed to (in, out) and cast to bf16, biases as (1, out) f32.
    """
    we = jnp.asarray(enc_w).T.astype(compute_dtype)          # (Q, L)
    wd = jnp.asarray(dec_w).T.astype(compute_dtype)          # (L, Q)
    be = jnp.asarray(enc_b).reshape(1, -1).astype(jnp.float32)
    bd = jnp.asarray(dec_b).reshape(1, -1).astype(jnp.float32)
    return we, be, wd, bd


# -----------------------------------------------------------------------------
# Tile selection (memory-bound -> biggest tiles; v7x-aware grid shaping)
# -----------------------------------------------------------------------------
def _round_up(n, m):
    return -(-n // m) * m


def _num_tensorcores():
    """Best-effort count of TensorCores one Pallas grid spans on this chip.

    v7x has 2 TCs per chip and shards a "parallel" grid axis across them;
    v5e/v6e have a single TC.  Falls back to 1 if detection fails.
    """
    try:
        kind = jax.devices()[0].device_kind.lower()
        if "v7" in kind:
            return 2
    except Exception:
        pass
    return 1


def _choose_tb(B, n_cores=1):
    """Batch tile for a memory-bound kernel.

    As large as practical (512-1024 rows hit ~85% of the HBM roofline vs ~63%
    at 256), capped at 1024 rows.  On multi-TC parts (v7x) the tile count is
    made a multiple of the core count so every core gets work; on single-TC
    parts (v5e/v6e) the single largest tile is used.
    """
    TB_CAP = 1024
    n_cores = max(n_cores, 1)
    b8 = _round_up(max(B, 1), 8)
    if b8 <= TB_CAP * n_cores:
        # Fewest possible grid steps: exactly n_cores equal tiles (1 on a single TC).
        return max(_round_up(pl.cdiv(b8, n_cores), 8), 8)
    n_tiles = _round_up(pl.cdiv(b8, TB_CAP), n_cores)
    return _round_up(pl.cdiv(b8, n_tiles), 8)


# -----------------------------------------------------------------------------
# Forward wrapper
# -----------------------------------------------------------------------------
def autoencoder_forward(x, we, be, wd, bd, *, tb=None, out_dtype=None,
                        single_buffer_weights=True):
    """x: (B, num_question); we: (Q, L) bf16; wd: (L, Q) bf16 (from prepare_params).

    x may be f32 or bf16 (bf16 halves the dominant HBM traffic).  Output dtype
    defaults to x.dtype.
    """
    B, Q = x.shape
    L = we.shape[1]
    assert we.shape == (Q, L) and wd.shape == (L, Q)
    assert be.shape == (1, L) and bd.shape == (1, Q)

    if out_dtype is None:
        out_dtype = x.dtype

    n_cores = _num_tensorcores()
    if tb is None:
        tb = _choose_tb(B, n_cores)

    num_tiles = pl.cdiv(B, tb)          # last tile may be ragged (no jnp.pad pass)
    Bp = num_tiles * tb                 # rows actually streamed through the pipeline

    # --- VMEM budget guard for scaled-up shapes -----------------------------
    itemsize_x = jnp.dtype(x.dtype).itemsize
    itemsize_o = jnp.dtype(out_dtype).itemsize
    itemsize_w = jnp.dtype(we.dtype).itemsize
    w_bufs = 1 if single_buffer_weights else 2
    vmem_est = (2 * tb * Q * (itemsize_x + itemsize_o)            # x/out double-buffered
                + w_bufs * (2 * Q * L * itemsize_w + (L + Q) * 4))  # resident weights/biases
    # TODO(synk): if Q/L grow (e.g. Q >= 4096, L >= 1024), tile the decoder N
    # dimension and the weight matrices instead of keeping them fully resident,
    # and set vmem_limit_bytes explicitly (v7x has only 64 MiB physical VMEM).
    assert vmem_est < 24 * 1024 * 1024, (
        f"estimated VMEM {vmem_est / 2**20:.1f} MiB too large; tile Q/L")

    cost = pl.CostEstimate(
        flops=4 * Bp * Q * L,                       # two (Bp,Q)x(Q,L)-sized matmuls
        transcendentals=2 * Bp * (L + Q),           # sigmoid = exp + reciprocal
        bytes_accessed=Bp * Q * (itemsize_x + itemsize_o)   # x in + out
                       + 2 * Q * L * itemsize_w             # bf16 weights
                       + (L + Q) * 4,                       # biases
    )

    # Grid-invariant operands: stay resident in VMEM; single-buffer them to
    # drop the redundant second pipeline buffer.
    if single_buffer_weights:
        def resident_spec(shape):
            return pl.BlockSpec(shape, lambda i: (0, 0),
                                pipeline_mode=pl.Buffered(1))
    else:
        def resident_spec(shape):
            return pl.BlockSpec(shape, lambda i: (0, 0))

    out = pl.pallas_call(
        autoencoder_kernel,
        out_shape=jax.ShapeDtypeStruct((B, Q), out_dtype),
        grid_spec=pltpu.PrefetchScalarGridSpec(
            num_scalar_prefetch=0,
            grid=(num_tiles,),
            in_specs=[
                pl.BlockSpec((tb, Q), lambda i: (i, 0)),   # x tile (ragged tail ok)
                resident_spec((Q, L)),                     # encoder weight
                resident_spec((1, L)),                     # encoder bias
                resident_spec((L, Q)),                     # decoder weight
                resident_spec((1, Q)),                     # decoder bias
            ],
            out_specs=pl.BlockSpec((tb, Q), lambda i: (i, 0)),
        ),
        compiler_params=pltpu.CompilerParams(
            dimension_semantics=("parallel",),             # shard batch tiles across TCs (v7x)
        ),
        cost_estimate=cost,
    )(x, we, be, wd, bd)

    return out


def reference_forward(x, enc_w, enc_b, dec_w, dec_b):
    h = jax.nn.sigmoid(x @ enc_w.T + enc_b)
    return jax.nn.sigmoid(h @ dec_w.T + dec_b)


# -----------------------------------------------------------------------------
# Demo / self-test
# -----------------------------------------------------------------------------
if __name__ == "__main__":
    # Small shapes consistent with the module: num_question=256, latent_dim=128.
    # B=300 exercises the ragged last batch tile (no jnp.pad pre-pass).
    B, Q, L = 300, 256, 128

    key = jax.random.PRNGKey(0)
    kx, k1, k2, k3, k4 = jax.random.split(key, 5)

    # Stream x (and the output) in bf16: this kernel's HBM traffic is dominated
    # by x/out, and sigmoid outputs in [0,1] lose almost nothing in bf16.
    x = jax.random.normal(kx, (B, Q), dtype=jnp.float32).astype(jnp.bfloat16)

    # Deterministic parameter init mimicking PyTorch Linear default
    # (uniform +/- 1/sqrt(fan_in)); stored in the torch (out, in) layout.
    enc_bound = 1.0 / (Q ** 0.5)
    dec_bound = 1.0 / (L ** 0.5)
    enc_w = jax.random.uniform(k1, (L, Q), jnp.float32, -enc_bound, enc_bound)
    enc_b = jax.random.uniform(k2, (L,), jnp.float32, -enc_bound, enc_bound)
    dec_w = jax.random.uniform(k3, (Q, L), jnp.float32, -dec_bound, dec_bound)
    dec_b = jax.random.uniform(k4, (Q,), jnp.float32, -dec_bound, dec_bound)

    # One-time layout/dtype preparation (not in the per-call hot path).
    we, be, wd, bd = prepare_params(enc_w, enc_b, dec_w, dec_b)

    try:
        out = jax.block_until_ready(autoencoder_forward(x, we, be, wd, bd))
    except Exception:
        # Fallback: if this jax version rejects single-buffered resident specs
        # (pl.Buffered(1)), retry with standard double buffering -- the extra
        # ~130 KB of VMEM is negligible at these shapes.
        out = jax.block_until_ready(
            autoencoder_forward(x, we, be, wd, bd, single_buffer_weights=False))

    # Reference in f32, using the same (already bf16-rounded) x values.
    ref = reference_forward(x.astype(jnp.float32), enc_w, enc_b, dec_w, dec_b)

    assert out.shape == (B, Q)
    assert out.dtype == x.dtype
    err = float(jnp.max(jnp.abs(out.astype(jnp.float32) - ref)))
    # bf16 MXU operands + bf16 streamed output vs pure-f32 reference.
    assert err < 2e-2, f"max abs error {err}"

    print("KERNEL_OK")
</pallas_src>

<mosaic_0001>
module attributes {stable_mosaic.version = 11 : i64} {
  func.func @autoencoder_kernel(%arg0: i32, %arg1: memref<304x256xbf16, #tpu.memory_space<vmem>>, %arg2: memref<256x128xbf16, #tpu.memory_space<vmem>>, %arg3: memref<1x128xf32, #tpu.memory_space<vmem>>, %arg4: memref<128x256xbf16, #tpu.memory_space<vmem>>, %arg5: memref<1x256xf32, #tpu.memory_space<vmem>>, %arg6: memref<304x256xbf16, #tpu.memory_space<vmem>>) attributes {dimension_semantics = [#tpu.dimension_semantics<parallel>], iteration_bounds = array<i64: 1>, scalar_prefetch = 0 : i64, scratch_operands = 0 : i64, tpu.core_type = #tpu.core_type<tc>, window_params = [{transform_indices = @transform_0, window_bounds = array<i64: 304, 256>}, {pipeline_mode = #tpu.pipeline_mode<synchronous>, transform_indices = @transform_1, window_bounds = array<i64: 256, 128>}, {pipeline_mode = #tpu.pipeline_mode<synchronous>, transform_indices = @transform_2, window_bounds = array<i64: 1, 128>}, {pipeline_mode = #tpu.pipeline_mode<synchronous>, transform_indices = @transform_3, window_bounds = array<i64: 128, 256>}, {pipeline_mode = #tpu.pipeline_mode<synchronous>, transform_indices = @transform_4, window_bounds = array<i64: 1, 256>}, {transform_indices = @transform_5, window_bounds = array<i64: 304, 256>}]} {
    %c0 = arith.constant 0 : index
    %c0_0 = arith.constant 0 : index
    %0 = vector.load %arg1[%c0, %c0_0] : memref<304x256xbf16, #tpu.memory_space<vmem>>, vector<304x256xbf16>
    %c0_1 = arith.constant 0 : index
    %c0_2 = arith.constant 0 : index
    %1 = vector.load %arg2[%c0_1, %c0_2] : memref<256x128xbf16, #tpu.memory_space<vmem>>, vector<256x128xbf16>
    %cst = arith.constant dense<0.000000e+00> : vector<304x128xf32>
    %2 = tpu.matmul %0, %1, %cst {dimension_numbers = #tpu.dot_dimension_numbers<[1], [0], [0], [1], [0, 0, 1, 1], [], []>} : vector<304x256xbf16>, vector<256x128xbf16>, vector<304x128xf32> -> vector<304x128xf32>
    %c0_3 = arith.constant 0 : index
    %c0_4 = arith.constant 0 : index
    %3 = vector.load %arg3[%c0_3, %c0_4] : memref<1x128xf32, #tpu.memory_space<vmem>>, vector<1x128xf32>
    %4 = vector.broadcast %3 : vector<1x128xf32> to vector<304x128xf32>
    %5 = arith.addf %2, %4 : vector<304x128xf32>
    %6 = arith.negf %5 : vector<304x128xf32>
    %7 = math.exp %6 : vector<304x128xf32>
    %cst_5 = arith.constant 1.000000e+00 : f32
    %8 = vector.broadcast %cst_5 : f32 to vector<304x128xf32>
    %9 = arith.addf %8, %7 : vector<304x128xf32>
    %10 = arith.divf %8, %9 : vector<304x128xf32>
    %11 = arith.truncf %10 : vector<304x128xf32> to vector<304x128xbf16>
    %c0_6 = arith.constant 0 : index
    %c0_7 = arith.constant 0 : index
    %12 = vector.load %arg4[%c0_6, %c0_7] : memref<128x256xbf16, #tpu.memory_space<vmem>>, vector<128x256xbf16>
    %cst_8 = arith.constant dense<0.000000e+00> : vector<304x256xf32>
    %13 = tpu.matmul %11, %12, %cst_8 {dimension_numbers = #tpu.dot_dimension_numbers<[1], [0], [0], [1], [0, 0, 1, 1], [], []>} : vector<304x128xbf16>, vector<128x256xbf16>, vector<304x256xf32> -> vector<304x256xf32>
    %c0_9 = arith.constant 0 : index
    %c0_10 = arith.constant 0 : index
    %14 = vector.load %arg5[%c0_9, %c0_10] : memref<1x256xf32, #tpu.memory_space<vmem>>, vector<1x256xf32>
    %15 = vector.broadcast %14 : vector<1x256xf32> to vector<304x256xf32>
    %16 = arith.addf %13, %15 : vector<304x256xf32>
    %17 = arith.negf %16 : vector<304x256xf32>
    %18 = math.exp %17 : vector<304x256xf32>
    %cst_11 = arith.constant 1.000000e+00 : f32
    %19 = vector.broadcast %cst_11 : f32 to vector<304x256xf32>
    %20 = arith.addf %19, %18 : vector<304x256xf32>
    %21 = arith.divf %19, %20 : vector<304x256xf32>
    %22 = arith.truncf %21 : vector<304x256xf32> to vector<304x256xbf16>
    %c0_12 = arith.constant 0 : index
    %c0_13 = arith.constant 0 : index
    %23 = vector.load %arg6[%c0_12, %c0_13] : memref<304x256xbf16, #tpu.memory_space<vmem>>, vector<304x256xbf16>
    tpu.vector_store %arg6[%c0_12, %c0_13], %22 {strides = array<i32>} : memref<304x256xbf16, #tpu.memory_space<vmem>>, vector<304x256xbf16>,
    return
  }
  func.func @transform_0(%arg0: i32) -> (i32, i32) {
    %c0_i32 = arith.constant 0 : i32
    %c0_i32_0 = arith.constant 0 : i32
    return %arg0, %c0_i32 : i32, i32
  }
  func.func @transform_1(%arg0: i32) -> (i32, i32) {
    %c0_i32 = arith.constant 0 : i32
    %c0_i32_0 = arith.constant 0 : i32
    %c0_i32_1 = arith.constant 0 : i32
    return %c0_i32, %c0_i32_0 : i32, i32
  }
  func.func @transform_2(%arg0: i32) -> (i32, i32) {
    %c0_i32 = arith.constant 0 : i32
    %c0_i32_0 = arith.constant 0 : i32
    %c0_i32_1 = arith.constant 0 : i32
    return %c0_i32, %c0_i32_0 : i32, i32
  }
  func.func @transform_3(%arg0: i32) -> (i32, i32) {
    %c0_i32 = arith.constant 0 : i32
    %c0_i32_0 = arith.constant 0 : i32
    %c0_i32_1 = arith.constant 0 : i32
    return %c0_i32, %c0_i32_0 : i32, i32
  }
  func.func @transform_4(%arg0: i32) -> (i32, i32) {
    %c0_i32 = arith.constant 0 : i32
    %c0_i32_0 = arith.constant 0 : i32
    %c0_i32_1 = arith.constant 0 : i32
    return %c0_i32, %c0_i32_0 : i32, i32
  }
  func.func @transform_5(%arg0: i32) -> (i32, i32) {
    %c0_i32 = arith.constant 0 : i32
    %c0_i32_0 = arith.constant 0 : i32
    return %arg0, %c0_i32 : i32, i32
  }
}

module attributes {stable_mosaic.version = 11 : i64} {
  func.func @autoencoder_kernel(%arg0: i32, %arg1: memref<304x256xbf16, #tpu.memory_space<vmem>>, %arg2: memref<256x128xbf16, #tpu.memory_space<vmem>>, %arg3: memref<1x128xf32, #tpu.memory_space<vmem>>, %arg4: memref<128x256xbf16, #tpu.memory_space<vmem>>, %arg5: memref<1x256xf32, #tpu.memory_space<vmem>>, %arg6: memref<304x256xbf16, #tpu.memory_space<vmem>>) attributes {dimension_semantics = [#tpu.dimension_semantics<parallel>], iteration_bounds = array<i64: 1>, scalar_prefetch = 0 : i64, scratch_operands = 0 : i64, tpu.core_type = #tpu.core_type<tc>, window_params = [{transform_indices = @transform_0, window_bounds = array<i64: 304, 256>}, {pipeline_mode = #tpu.pipeline_mode<synchronous>, transform_indices = @transform_1, window_bounds = array<i64: 256, 128>}, {pipeline_mode = #tpu.pipeline_mode<synchronous>, transform_indices = @transform_2, window_bounds = array<i64: 1, 128>}, {pipeline_mode = #tpu.pipeline_mode<synchronous>, transform_indices = @transform_3, window_bounds = array<i64: 128, 256>}, {pipeline_mode = #tpu.pipeline_mode<synchronous>, transform_indices = @transform_4, window_bounds = array<i64: 1, 256>}, {transform_indices = @transform_5, window_bounds = array<i64: 304, 256>}]} {
    %c0 = arith.constant 0 : index
    %c0_0 = arith.constant 0 : index
    %0 = vector.load %arg1[%c0, %c0_0] : memref<304x256xbf16, #tpu.memory_space<vmem>>, vector<304x256xbf16>
    %c0_1 = arith.constant 0 : index
    %c0_2 = arith.constant 0 : index
    %1 = vector.load %arg2[%c0_1, %c0_2] : memref<256x128xbf16, #tpu.memory_space<vmem>>, vector<256x128xbf16>
    %cst = arith.constant dense<0.000000e+00> : vector<304x128xf32>
    %2 = tpu.matmul %0, %1, %cst {dimension_numbers = #tpu.dot_dimension_numbers<[1], [0], [0], [1], [0, 0, 1, 1], [], []>} : vector<304x256xbf16>, vector<256x128xbf16>, vector<304x128xf32> -> vector<304x128xf32>
    %c0_3 = arith.constant 0 : index
    %c0_4 = arith.constant 0 : index
    %3 = vector.load %arg3[%c0_3, %c0_4] : memref<1x128xf32, #tpu.memory_space<vmem>>, vector<1x128xf32>
    %4 = vector.broadcast %3 : vector<1x128xf32> to vector<304x128xf32>
    %5 = arith.addf %2, %4 : vector<304x128xf32>
    %6 = arith.negf %5 : vector<304x128xf32>
    %7 = math.exp %6 : vector<304x128xf32>
    %cst_5 = arith.constant 1.000000e+00 : f32
    %8 = vector.broadcast %cst_5 : f32 to vector<304x128xf32>
    %9 = arith.addf %8, %7 : vector<304x128xf32>
    %10 = arith.divf %8, %9 : vector<304x128xf32>
    %11 = arith.truncf %10 : vector<304x128xf32> to vector<304x128xbf16>
    %c0_6 = arith.constant 0 : index
    %c0_7 = arith.constant 0 : index
    %12 = vector.load %arg4[%c0_6, %c0_7] : memref<128x256xbf16, #tpu.memory_space<vmem>>, vector<128x256xbf16>
    %cst_8 = arith.constant dense<0.000000e+00> : vector<304x256xf32>
    %13 = tpu.matmul %11, %12, %cst_8 {dimension_numbers = #tpu.dot_dimension_numbers<[1], [0], [0], [1], [0, 0, 1, 1], [], []>} : vector<304x128xbf16>, vector<128x256xbf16>, vector<304x256xf32> -> vector<304x256xf32>
    %c0_9 = arith.constant 0 : index
    %c0_10 = arith.constant 0 : index
    %14 = vector.load %arg5[%c0_9, %c0_10] : memref<1x256xf32, #tpu.memory_space<vmem>>, vector<1x256xf32>
    %15 = vector.broadcast %14 : vector<1x256xf32> to vector<304x256xf32>
    %16 = arith.addf %13, %15 : vector<304x256xf32>
    %17 = arith.negf %16 : vector<304x256xf32>
    %18 = math.exp %17 : vector<304x256xf32>
    %cst_11 = arith.constant 1.000000e+00 : f32
    %19 = vector.broadcast %cst_11 : f32 to vector<304x256xf32>
    %20 = arith.addf %19, %18 : vector<304x256xf32>
    %21 = arith.divf %19, %20 : vector<304x256xf32>
    %22 = arith.truncf %21 : vector<304x256xf32> to vector<304x256xbf16>
    %c0_12 = arith.constant 0 : index
    %c0_13 = arith.constant 0 : index
    %23 = vector.load %arg6[%c0_12, %c0_13] : memref<304x256xbf16, #tpu.memory_space<vmem>>, vector<304x256xbf16>
    tpu.vector_store %arg6[%c0_12, %c0_13], %22 {strides = array<i32>} : memref<304x256xbf16, #tpu.memory_space<vmem>>, vector<304x256xbf16>,
    return
  }
  func.func @transform_0(%arg0: i32) -> (i32, i32) {
    %c0_i32 = arith.constant 0 : i32
    %c0_i32_0 = arith.constant 0 : i32
    return %arg0, %c0_i32 : i32, i32
  }
  func.func @transform_1(%arg0: i32) -> (i32, i32) {
    %c0_i32 = arith.constant 0 : i32
    %c0_i32_0 = arith.constant 0 : i32
    %c0_i32_1 = arith.constant 0 : i32
    return %c0_i32, %c0_i32_0 : i32, i32
  }
  func.func @transform_2(%arg0: i32) -> (i32, i32) {
    %c0_i32 = arith.constant 0 : i32
    %c0_i32_0 = arith.constant 0 : i32
    %c0_i32_1 = arith.constant 0 : i32
    return %c0_i32, %c0_i32_0 : i32, i32
  }
  func.func @transform_3(%arg0: i32) -> (i32, i32) {
    %c0_i32 = arith.constant 0 : i32
    %c0_i32_0 = arith.constant 0 : i32
    %c0_i32_1 = arith.constant 0 : i32
    return %c0_i32, %c0_i32_0 : i32, i32
  }
  func.func @transform_4(%arg0: i32) -> (i32, i32) {
    %c0_i32 = arith.constant 0 : i32
    %c0_i32_0 = arith.constant 0 : i32
    %c0_i32_1 = arith.constant 0 : i32
    return %c0_i32, %c0_i32_0 : i32, i32
  }
  func.func @transform_5(%arg0: i32) -> (i32, i32) {
    %c0_i32 = arith.constant 0 : i32
    %c0_i32_0 = arith.constant 0 : i32
    return %arg0, %c0_i32 : i32, i32
  }
}

</mosaic_0001>

<bundles_post_ra>
// kernel: tpu_custom_call.1
= control target key start
LH: loop header
LB: loop body
LE: loop exit
PB: predicated region body
PF: predicated region fallthrough
CT: control target
= control target key end

     0   :  { %10 = vsyncpa [#allocation3], 0  ;;  %s3059_s0 = inlined_call_operand.hbm [shape: bf16[300,256], index: 0, kind: input, shape index: {}]   ;;  %s3060_s1 = inlined_call_operand.hbm [shape: bf16[256,128], index: 1, kind: input, shape index: {}]   ;;  %s3061_s2 = inlined_call_operand.vmem [shape: f32[1,128], index: 2, kind: input, shape index: {}]   ;;  %s3062_s3 = inlined_call_operand.hbm [shape: bf16[128,256], index: 3, kind: input, shape index: {}]   ;;  %s3063_s4 = inlined_call_operand.vmem [shape: f32[1,256], index: 4, kind: input, shape index: {}]   ;;  %s3064_s5 = inlined_call_operand.hbm [shape: bf16[300,256], index: 5, kind: output, shape index: {}]  }
   0x1   :  { %11 = vsyncpa [#allocation6], 0 }
   0x2   :  { %12 = vsyncpa [#allocation4], 0  ;;  %s2838_s18 = smov [#allocation5]  }
   0x3   :  { %s30_s19 = sshll.u32 %s2838_s18, 4  ;;  %s31_s19 = int_to_ptr.vmem [resolvable:$true] %s30_s19 }
   0x4   :  { %s2760_s20 = scalar_lea.vmem %s31_s19, 2048  ;;  %p2765_p1 = scmp.lt.s32.totalorder %s31_s19, %s31_s19 }
   0x5   :  { %p2761_p0 = scmp.ne.s32.totalorder %s31_s19, %s2760_s20  ;;  %p2766_p2 = scmp.lt.s32.totalorder %s2760_s20, %s2760_s20 }
   0x7   :  { %p2767_p3 = por %p2766_p2, %p2765_p1 }
   0x9   :  { %p2768_p4 = pnand %p2767_p3, %p2761_p0 }
   0xb   :  { %2771 = shalt.err (!%p2768_p4)
}
   0xc   :  { %s2839_s21 = smov 64   ;;  %s2840_s22 = smov 4  }
   0xd   :  { %36 = dma.hbm_to_vmem [thread:$0]  %s3060_s1, 2048, %s31_s19, [#allocation6], %s2839_s21, %s2839_s21, %s2840_s22  }
   0xe   :  { %s2841_s25 = smov [#allocation2]  }
   0xf   :  { %s18_s26 = sshll.u32 %s2841_s25, 4  ;;  %s19_s26 = int_to_ptr.vmem [resolvable:$true] %s18_s26 }
  0x10   :  { %s2780_s27 = scalar_lea.vmem %s19_s26, 4864  ;;  %p2785_p6 = scmp.lt.s32.totalorder %s19_s26, %s19_s26 }
  0x11   :  { %p2781_p5 = scmp.ne.s32.totalorder %s19_s26, %s2780_s27  ;;  %p2786_p7 = scmp.lt.s32.totalorder %s2780_s27, %s2780_s27 }
  0x13   :  { %p2787_p8 = por %p2786_p7, %p2785_p6 }
  0x15   :  { %p2788_p9 = pnand %p2787_p8, %p2781_p5 }
  0x17   :  { %2791 = shalt.err (!%p2788_p9)
}
  0x18   :  { %s2842_s28 = smov 128   ;;  %s2843_s29 = smov 8  }
  0x19   :  { %24 = dma.hbm_to_vmem [thread:$0]  %s3059_s0, 4864, %s19_s26, [#allocation3], %s2842_s28, %s2842_s28, %s2843_s29  }
  0x1a   :  { %s2844_s1 = smov [#allocation7]  }
  0x1b   :  { %s44_s7 = sshll.u32 %s2844_s1, 4  ;;  %s45_s7 = int_to_ptr.vmem [resolvable:$true] %s44_s7 }
  0x1c   :  { %s2800_s8 = scalar_lea.vmem %s45_s7, 2048  ;;  %p2805_p11 = scmp.lt.s32.totalorder %s45_s7, %s45_s7 }
  0x1d   :  { %p2801_p10 = scmp.ne.s32.totalorder %s45_s7, %s2800_s8  ;;  %p2806_p12 = scmp.lt.s32.totalorder %s2800_s8, %s2800_s8 }
  0x1f   :  { %p2807_p13 = por %p2806_p12, %p2805_p11 }
  0x21   :  { %p2808_p0 = pnand %p2807_p13, %p2801_p10 }
  0x23   :  { %2811 = shalt.err (!%p2808_p0)
}
  0x24   :  { %50 = dma.hbm_to_vmem [thread:$0]  %s3062_s3, 2048, %s45_s7, [#allocation6], %s2842_s28, %s2842_s28, %s2843_s29  }
  0x25   :  { %2832 = dma.done.wait [#allocation3], 4864  }
  0x26   :  { %2833 = vsyncadd [#allocation3], 4294962432 }
  0x27   :  { %2834 = dma.done.wait [#allocation6], 4096  }
  0x28   :  { %2835 = vsyncadd [#allocation6], 4294963200  ;;  %v2845_v0 = vmov 0   ;;  %v2199_v1 = vld [vmem:[#allocation5 + $0x38] sm:$0xff]   ;;  %v2200_v2 = vld [vmem:[#allocation5 + $0x30] sm:$0xff]  }
  0x29   :  { %426 = vmatprep.subr.bf16.mxu0 %v2845_v0  ;;  %998 = vmatprep.mubr.bf16.mxu1 %v2845_v0  ;;  %v2201_v3 = vld [vmem:[#allocation5 + $0x28] sm:$0xff]   ;;  %v2202_v4 = vld [vmem:[#allocation5 + $0x20] sm:$0xff]   ;;  %v2203_v5 = vld [vmem:[#allocation5 + $0x18] sm:$0xff]  }
  0x2a   :  { %427 = vmatpush1.bf16.msra.mxu0 %v2199_v1  ;;  %v2217_v6 = vld [vmem:[#allocation2 + $0x4] ss:$8 sps:$4 sm:$0xff]   ;;  %v2205_v8 = vld [vmem:[#allocation5 + $0x8] sm:$0xff]   ;;  %v2206_v9 = vld [vmem:[#allocation5] sm:$0xff]  }
  0x2b   :  { %428 = vmatprep.subr.bf16.mxu0 %v2845_v0  ;;  %v2204_v7 = vld [vmem:[#allocation5 + $0x10] sm:$0xff]   ;;  %458 = vmatprep.mubr.bf16.mxu0 %v2217_v6  ;;  %v2207_v10 = vld [vmem:[#allocation5 + $0x78] sm:$0xff]   ;;  %v2209_v12 = vld [vmem:[#allocation5 + $0x68] sm:$0xff]  }
  0x2c   :  { %v2208_v11 = vld [vmem:[#allocation5 + $0x70] sm:$0xff]   ;;  %v2210_v13 = vld [vmem:[#allocation5 + $0x60] sm:$0xff]   ;;  %v2211_v14 = vld [vmem:[#allocation5 + $0x58] sm:$0xff]  }
  0x2d   :  { %v2212_v15 = vld [vmem:[#allocation5 + $0x50] sm:$0xff]   ;;  %v2213_v16 = vld [vmem:[#allocation5 + $0x48] sm:$0xff]   ;;  %v2214_v17 = vld [vmem:[#allocation5 + $0x40] sm:$0xff]  }
  0x2e   :  { %429 = vmatpush1.bf16.msra.mxu0 %v2200_v2  ;;  %v2215_v18 = vld [vmem:[#allocation2] ss:$8 sps:$4 sm:$0xff]   ;;  %v2218_v19 = vld [vmem:[#allocation2 + $0x14] ss:$8 sps:$4 sm:$0xff]   ;;  %v2220_v20 = vld [vmem:[#allocation2 + $0x10] ss:$8 sps:$4 sm:$0xff]  }
  0x2f   :  { %430 = vmatprep.subr.bf16.mxu0 %v2845_v0  ;;  %v2221_v21 = vld [vmem:[#allocation2 + $0x24] ss:$8 sps:$4 sm:$0xff]   ;;  %v2223_v22 = vld [vmem:[#allocation2 + $0x20] ss:$8 sps:$4 sm:$0xff]   ;;  %v2224_v23 = vld [vmem:[#allocation2 + $0x34] ss:$8 sps:$4 sm:$0xff]  }
  0x30   :  { %v2226_v24 = vld [vmem:[#allocation2 + $0x30] ss:$8 sps:$4 sm:$0xff]   ;;  %v2227_v25 = vld [vmem:[#allocation2 + $0x44] ss:$8 sps:$4 sm:$0xff]   ;;  %v2229_v26 = vld [vmem:[#allocation2 + $0x40] ss:$8 sps:$4 sm:$0xff]  }
  0x31   :  { %v2230_v27 = vld [vmem:[#allocation2 + $0x54] ss:$8 sps:$4 sm:$0xff]   ;;  %v2232_v28 = vld [vmem:[#allocation2 + $0x50] ss:$8 sps:$4 sm:$0xff]   ;;  %v2233_v29 = vld [vmem:[#allocation2 + $0x64] ss:$8 sps:$4 sm:$0xff]  }
  0x32   :  { %431 = vmatpush1.bf16.msra.mxu0 %v2201_v3  ;;  %v2235_v30 = vld [vmem:[#allocation2 + $0x60] ss:$8 sps:$4 sm:$0xff]   ;;  %v2236_v31 = vld [vmem:[#allocation2 + $0x74] ss:$8 sps:$4 sm:$0xff]   ;;  %v2238_v32 = vld [vmem:[#allocation2 + $0x70] ss:$8 sps:$4 sm:$0xff]  }
  0x33   :  { %432 = vmatprep.subr.bf16.mxu0 %v2845_v0  ;;  %v2239_v33 = vld [vmem:[#allocation2 + $0x84] ss:$8 sps:$4 sm:$0xff]   ;;  %v2241_v34 = vld [vmem:[#allocation2 + $0x80] ss:$8 sps:$4 sm:$0xff]   ;;  %v2242_v35 = vld [vmem:[#allocation2 + $0x94] ss:$8 sps:$4 sm:$0xff]  }
  0x34   :  { %v2244_v36 = vld [vmem:[#allocation2 + $0x90] ss:$8 sps:$4 sm:$0xff]   ;;  %v2245_v37 = vld [vmem:[#allocation2 + $0xa4] ss:$8 sps:$4 sm:$0xff]   ;;  %v2274_v39 = vld [vmem:[#allocation7 + $0x70] ss:$8 sps:$4 sm:$0xff]  }
  0x35   :  { %v2272_v38 = vld [vmem:[#allocation7 + $0x74] ss:$8 sps:$4 sm:$0xff]   ;;  %v2275_v40 = vld [vmem:[#allocation7 + $0x64] ss:$8 sps:$4 sm:$0xff]   ;;  %v2247_v41 = vld [vmem:[#allocation2 + $0xa0] ss:$8 sps:$4 sm:$0xff]  }
  0x36   :  { %433 = vmatpush1.bf16.msra.mxu0 %v2202_v4  ;;  %966 = vmatprep.subr.bf16.mxu1 %v2272_v38  ;;  %v2277_v42 = vld [vmem:[#allocation7 + $0x60] ss:$8 sps:$4 sm:$0xff]   ;;  %v2248_v43 = vld [vmem:[#allocation2 + $0xb4] ss:$8 sps:$4 sm:$0xff]   ;;  %v2278_v44 = vld [vmem:[#allocation7 + $0x54] ss:$8 sps:$4 sm:$0xff]  }
  0x37   :  { %434 = vmatprep.subr.bf16.mxu0 %v2845_v0  ;;  %967 = vmatpush1.bf16.msra.mxu1 %v2274_v39  ;;  %v2280_v45 = vld [vmem:[#allocation7 + $0x50] ss:$8 sps:$4 sm:$0xff]   ;;  %v2250_v46 = vld [vmem:[#allocation2 + $0xb0] ss:$8 sps:$4 sm:$0xff]   ;;  %v2281_v47 = vld [vmem:[#allocation7 + $0x44] ss:$8 sps:$4 sm:$0xff]  }
  0x38   :  { %968 = vmatprep.subr.bf16.mxu1 %v2275_v40  ;;  %v2251_v48 = vld [vmem:[#allocation2 + $0xc4] ss:$8 sps:$4 sm:$0xff]   ;;  %v2283_v49 = vld [vmem:[#allocation7 + $0x40] ss:$8 sps:$4 sm:$0xff]   ;;  %v2286_v51 = vld [vmem:[#allocation7 + $0x30] ss:$8 sps:$4 sm:$0xff]  }
  0x39   :  { %v2284_v50 = vld [vmem:[#allocation7 + $0x34] ss:$8 sps:$4 sm:$0xff]   ;;  %v2253_v52 = vld [vmem:[#allocation2 + $0xc0] ss:$8 sps:$4 sm:$0xff]   ;;  %v2287_v53 = vld [vmem:[#allocation7 + $0x24] ss:$8 sps:$4 sm:$0xff]  }
  0x3a   :  { %435 = vmatpush1.bf16.msra.mxu0 %v2203_v5  ;;  %v2254_v54 = vld [vmem:[#allocation2 + $0xd4] ss:$8 sps:$4 sm:$0xff]   ;;  %v2289_v55 = vld [vmem:[#allocation7 + $0x20] ss:$8 sps:$4 sm:$0xff]   ;;  %v2290_v56 = vld [vmem:[#allocation7 + $0x14] ss:$8 sps:$4 sm:$0xff]  }
  0x3b   :  { %436 = vmatprep.subr.bf16.mxu0 %v2845_v0  ;;  %969 = vmatpush1.bf16.msra.mxu1 %v2277_v42  ;;  %v2292_v57 = vld [vmem:[#allocation7 + $0x10] ss:$8 sps:$4 sm:$0xff]   ;;  %v2256_v58 = vld [vmem:[#allocation2 + $0xd0] ss:$8 sps:$4 sm:$0xff]   ;;  %v2293_v59 = vld [vmem:[#allocation7 + $0x4] ss:$8 sps:$4 sm:$0xff]  }
  0x3c   :  { %970 = vmatprep.subr.bf16.mxu1 %v2278_v44  ;;  %v2257_v60 = vld [vmem:[#allocation2 + $0xe4] ss:$8 sps:$4 sm:$0xff]   ;;  %v2295_v61 = vld [vmem:[#allocation7] ss:$8 sps:$4 sm:$0xff]   ;;  %v2259_v62 = vld [vmem:[#allocation2 + $0xe0] ss:$8 sps:$4 sm:$0xff]  }
  0x3d   :  { %v2260_v63 = vld [vmem:[#allocation2 + $0xf4] ss:$8 sps:$4 sm:$0xff]   ;;  %v2262_v1 = vld [vmem:[#allocation2 + $0xf0] ss:$8 sps:$4 sm:$0xff]   ;;  %v2263_v2 = vld [vmem:[#allocation2 + $0x104] ss:$8 sps:$4 sm:$0xff]  }
  0x3e   :  { %437 = vmatpush1.bf16.msra.mxu0 %v2204_v7  ;;  %v2265_v3 = vld [vmem:[#allocation2 + $0x100] ss:$8 sps:$4 sm:$0xff]   ;;  %v2266_v4 = vld [vmem:[#allocation2 + $0x114] ss:$8 sps:$4 sm:$0xff]   ;;  %v2268_v5 = vld [vmem:[#allocation2 + $0x110] ss:$8 sps:$4 sm:$0xff]  }
  0x3f   :  { %438 = vmatprep.subr.bf16.mxu0 %v2845_v0  ;;  %971 = vmatpush1.bf16.msra.mxu1 %v2280_v45  ;;  %v2269_v6 = vld [vmem:[#allocation2 + $0x124] ss:$8 sps:$4 sm:$0xff]   ;;  %v2271_v7 = vld [vmem:[#allocation2 + $0x120] ss:$8 sps:$4 sm:$0xff]  }
  0x40   :  { %972 = vmatprep.subr.bf16.mxu1 %v2281_v47 }
  0x42   :  { %439 = vmatpush1.bf16.msra.mxu0 %v2205_v8  ;;  %v2912_v8 = vld [vmem:[%s3061_s2] ss:$0 sm:$0xff] }
  0x43   :  { %440 = vmatprep.subr.bf16.mxu0 %v2845_v0  ;;  %973 = vmatpush1.bf16.msra.mxu1 %v2283_v49 }
  0x44   :  { %974 = vmatprep.subr.bf16.mxu1 %v2284_v50 }
  0x46   :  { %441 = vmatpush1.bf16.msra.mxu0 %v2206_v9 }
  0x47   :  { %442 = vmatprep.subr.bf16.mxu0 %v2845_v0  ;;  %975 = vmatpush1.bf16.msra.mxu1 %v2286_v51 }
  0x48   :  { %976 = vmatprep.subr.bf16.mxu1 %v2287_v53 }
  0x4a   :  { %443 = vmatpush2.bf16.msra.mxu0 %v2207_v10 }
  0x4b   :  { %444 = vmatprep.subr.bf16.mxu0 %v2845_v0  ;;  %977 = vmatpush1.bf16.msra.mxu1 %v2289_v55 }
  0x4c   :  { %978 = vmatprep.subr.bf16.mxu1 %v2290_v56 }
  0x4e   :  { %445 = vmatpush2.bf16.msra.mxu0 %v2208_v11 }
  0x4f   :  { %446 = vmatprep.subr.bf16.mxu0 %v2845_v0  ;;  %979 = vmatpush1.bf16.msra.mxu1 %v2292_v57 }
  0x50   :  { %980 = vmatprep.subr.bf16.mxu1 %v2293_v59 }
  0x52   :  { %447 = vmatpush2.bf16.msra.mxu0 %v2209_v12 }
  0x53   :  { %448 = vmatprep.subr.bf16.mxu0 %v2845_v0  ;;  %981 = vmatpush1.bf16.msra.mxu1 %v2295_v61 }
  0x56   :  { %449 = vmatpush2.bf16.msra.mxu0 %v2210_v13 }
  0x57   :  { %450 = vmatprep.subr.bf16.mxu0 %v2845_v0 }
  0x5a   :  { %451 = vmatpush2.bf16.msra.mxu0 %v2211_v14 }
  0x5b   :  { %452 = vmatprep.subr.bf16.mxu0 %v2845_v0 }
  0x5e   :  { %453 = vmatpush2.bf16.msra.mxu0 %v2212_v15 }
  0x5f   :  { %454 = vmatprep.subr.bf16.mxu0 %v2845_v0 }
  0x62   :  { %455 = vmatpush2.bf16.msra.mxu0 %v2213_v16 }
  0x63   :  { %456 = vmatprep.subr.bf16.mxu0 %v2845_v0 }
  0x66   :  { %457 = vmatpush2.bf16.msra.mxu0 %v2214_v17 }
  0x69   :  { %459 = vmatmul.mubr.bf16.vlgmr.msra.gmra.mxu0 %v2215_v18 }
  0x6a   :  { %466 = vmatprep.mubr.bf16.mxu0 %v2218_v19 }
  0x71   :  { %467 = vmatmul.mubr.bf16.gmra.mxu0 %v2220_v20 }
  0x72   :  { %474 = vmatprep.mubr.bf16.mxu0 %v2221_v21 }
  0x79   :  { %475 = vmatmul.mubr.bf16.gmra.mxu0 %v2223_v22 }
  0x7a   :  { %482 = vmatprep.mubr.bf16.mxu0 %v2224_v23 }
  0x81   :  { %483 = vmatmul.mubr.bf16.gmra.mxu0 %v2226_v24 }
  0x82   :  { %490 = vmatprep.mubr.bf16.mxu0 %v2227_v25 }
  0x89   :  { %491 = vmatmul.mubr.bf16.gmra.mxu0 %v2229_v26 }
  0x8a   :  { %498 = vmatprep.mubr.bf16.mxu0 %v2230_v27 }
  0x91   :  { %499 = vmatmul.mubr.bf16.gmra.mxu0 %v2232_v28 }
  0x92   :  { %506 = vmatprep.mubr.bf16.mxu0 %v2233_v29 }
  0x99   :  { %507 = vmatmul.mubr.bf16.gmra.mxu0 %v2235_v30 }
  0x9a   :  { %514 = vmatprep.mubr.bf16.mxu0 %v2236_v31 }
  0xa1   :  { %515 = vmatmul.mubr.bf16.gmra.mxu0 %v2238_v32 }
  0xa2   :  { %522 = vmatprep.mubr.bf16.mxu0 %v2239_v33 }
  0xa9   :  { %523 = vmatmul.mubr.bf16.gmra.mxu0 %v2241_v34 }
  0xaa   :  { %530 = vmatprep.mubr.bf16.mxu0 %v2242_v35 }
  0xb1   :  { %531 = vmatmul.mubr.bf16.gmra.mxu0 %v2244_v36 }
  0xb2   :  { %538 = vmatprep.mubr.bf16.mxu0 %v2245_v37 }
  0xb9   :  { %539 = vmatmul.mubr.bf16.gmra.mxu0 %v2247_v41 }
  0xba   :  { %546 = vmatprep.mubr.bf16.mxu0 %v2248_v43 }
  0xc1   :  { %547 = vmatmul.mubr.bf16.gmra.mxu0 %v2250_v46 }
  0xc2   :  { %554 = vmatprep.mubr.bf16.mxu0 %v2251_v48 }
  0xc9   :  { %555 = vmatmul.mubr.bf16.gmra.mxu0 %v2253_v52 }
  0xca   :  { %562 = vmatprep.mubr.bf16.mxu0 %v2254_v54 }
  0xd1   :  { %563 = vmatmul.mubr.bf16.gmra.mxu0 %v2256_v58 }
  0xd2   :  { %570 = vmatprep.mubr.bf16.mxu0 %v2257_v60 }
  0xd9   :  { %571 = vmatmul.mubr.bf16.gmra.mxu0 %v2259_v62 }
  0xda   :  { %578 = vmatprep.mubr.bf16.mxu0 %v2260_v63 }
  0xe1   :  { %579 = vmatmul.mubr.bf16.gmra.mxu0 %v2262_v1 }
  0xe2   :  { %586 = vmatprep.mubr.bf16.mxu0 %v2263_v2 }
  0xe9   :  { %587 = vmatmul.mubr.bf16.gmra.mxu0 %v2265_v3 }
  0xea   :  { %594 = vmatprep.mubr.bf16.mxu0 %v2266_v4 }
  0xf1   :  { %595 = vmatmul.mubr.bf16.gmra.mxu0 %v2268_v5 }
  0xf2   :  { %602 = vmatprep.mubr.bf16.mxu0 %v2269_v6 }
  0xf9   :  { %603 = vmatmul.mubr.bf16.gmra.mxu0 %v2271_v7 }
 0x129   :  { %v460_v9 = vpop.f32.mrf.mxu0 }
 0x12a   :  { %v461_v10 = vadd.f32 %v2912_v8, %v460_v9 }
 0x12b   :  { %v462_v11 = vpop.f32.mrf.mxu0 }
 0x12c   :  { %v1984_v12 = vmul.f32 -1.442695, %v461_v10 }
 0x12d   :  { %v463_v13 = vpop.f32.mrf.mxu0 }
 0x12e   :  { %2296 = vpow2.f32 %v1984_v12  ;;  %v464_v14 = vadd.f32 %v2912_v8, %v463_v13 }
 0x12f   :  { %v465_v15 = vpop.f32.mrf.mxu0 }
 0x130   :  { %v1985_v16 = vmul.f32 -1.442695, %v464_v14 }
 0x131   :  { %v468_v17 = vpop.f32.mrf.mxu0 }
 0x132   :  { %2298 = vpow2.f32 %v1985_v16  ;;  %v469_v18 = vadd.f32 %v2912_v8, %v468_v17 }
 0x133   :  { %v470_v19 = vpop.f32.mrf.mxu0 }
 0x134   :  { %v1986_v20 = vmul.f32 -1.442695, %v469_v18 }
 0x135   :  { %v471_v21 = vpop.f32.mrf.mxu0 }
 0x136   :  { %2300 = vpow2.f32 %v1986_v20  ;;  %v472_v22 = vadd.f32 %v2912_v8, %v471_v21 }
 0x137   :  { %v473_v23 = vpop.f32.mrf.mxu0 }
 0x138   :  { %v1987_v24 = vmul.f32 -1.442695, %v472_v22 }
 0x139   :  { %v476_v25 = vpop.f32.mrf.mxu0 }
 0x13a   :  { %2302 = vpow2.f32 %v1987_v24  ;;  %v477_v26 = vadd.f32 %v2912_v8, %v476_v25 }
 0x13b   :  { %v2297_v27 = vpop.eup %2296  ;;  %v478_v28 = vpop.f32.mrf.mxu0 }
 0x13c   :  { %v1988_v29 = vmul.f32 -1.442695, %v477_v26  ;;  %v725_v30 = vadd.f32 1.0, %v2297_v27 }
 0x13d   :  { %v479_v31 = vpop.f32.mrf.mxu0 }
 0x13e   :  { %v480_v32 = vadd.f32 %v2912_v8, %v479_v31  ;;  %2304 = vpow2.f32 %v1988_v29 }
 0x13f   :  { %v2299_v33 = vpop.eup %2298  ;;  %v481_v34 = vpop.f32.mrf.mxu0  ;;  %2306 = vrcp.f32 %v725_v30 }
 0x140   :  { %v726_v35 = vadd.f32 1.0, %v2299_v33  ;;  %v1989_v36 = vmul.f32 -1.442695, %v480_v32 }
 0x141   :  { %v484_v37 = vpop.f32.mrf.mxu0 }
 0x142   :  { %2308 = vrcp.f32 %v726_v35  ;;  %v485_v38 = vadd.f32 %v2912_v8, %v484_v37 }
 0x143   :  { %v2301_v39 = vpop.eup %2300  ;;  %2310 = vpow2.f32 %v1989_v36  ;;  %v486_v40 = vpop.f32.mrf.mxu0 }
 0x144   :  { %v1990_v41 = vmul.f32 -1.442695, %v485_v38  ;;  %v727_v42 = vadd.f32 1.0, %v2301_v39 }
 0x145   :  { %v487_v43 = vpop.f32.mrf.mxu0 }
 0x146   :  { %v488_v44 = vadd.f32 %v2912_v8, %v487_v43  ;;  %2312 = vpow2.f32 %v1990_v41 }
 0x147   :  { %v2303_v45 = vpop.eup %2302  ;;  %v489_v46 = vpop.f32.mrf.mxu0  ;;  %2314 = vrcp.f32 %v727_v42 }
 0x148   :  { %v728_v47 = vadd.f32 1.0, %v2303_v45  ;;  %v1991_v48 = vmul.f32 -1.442695, %v488_v44 }
 0x149   :  { %v492_v49 = vpop.f32.mrf.mxu0 }
 0x14a   :  { %2316 = vrcp.f32 %v728_v47  ;;  %v493_v50 = vadd.f32 %v2912_v8, %v492_v49 }
 0x14b   :  { %2318 = vpow2.f32 %v1991_v48  ;;  %v494_v51 = vpop.f32.mrf.mxu0  ;;  %v2305_v52 = vpop.eup %2304 }
 0x14c   :  { %v1992_v53 = vmul.f32 -1.442695, %v493_v50  ;;  %v729_v54 = vadd.f32 1.0, %v2305_v52  ;;  %v2307_v56 = vpop.eup %2306 }
 0x14d   :  { %v495_v55 = vpop.f32.mrf.mxu0 }
 0x14e   :  { %2320 = vpow2.f32 %v1992_v53  ;;  %v496_v57 = vadd.f32 %v2912_v8, %v495_v55 }
 0x14f   :  { %v2309_v58 = vpop.eup %2308  ;;  %v497_v59 = vpop.f32.mrf.mxu0  ;;  %2322 = vrcp.f32 %v729_v54 }
 0x150   :  { %v2311_v60 = vpop.eup %2310  ;;  %v1993_v61 = vmul.f32 -1.442695, %v496_v57  ;;  %v839_v62 = vpack.c.bf16 %v2309_v58, %v2307_v56 }
 0x151   :  { %v730_v63 = vadd.f32 1.0, %v2311_v60  ;;  %v500_v1 = vpop.f32.mrf.mxu0 }
 0x152   :  { %2324 = vpow2.f32 %v1993_v61  ;;  %v501_v2 = vadd.f32 %v2912_v8, %v500_v1  ;;  %999 = vmatmul.mubr.bf16.vlgmr.msra.gmra.mxu1 %v839_v62 }
 0x153   :  { %2326 = vrcp.f32 %v730_v63  ;;  %v502_v3 = vpop.f32.mrf.mxu0  ;;  %1008 = vmatprep.mubr.bf16.mxu1 %v2845_v0  ;;  %v2313_v4 = vpop.eup %2312 }
 0x154   :  { %v1994_v5 = vmul.f32 -1.442695, %v501_v2  ;;  %v731_v6 = vadd.f32 1.0, %v2313_v4  ;;  %v2315_v9 = vpop.eup %2314 }
 0x155   :  { %v503_v7 = vpop.f32.mrf.mxu0 }
 0x156   :  { %2328 = vpow2.f32 %v1994_v5  ;;  %v504_v10 = vadd.f32 %v2912_v8, %v503_v7 }
 0x157   :  { %v2317_v11 = vpop.eup %2316  ;;  %v505_v12 = vpop.f32.mrf.mxu0  ;;  %2330 = vrcp.f32 %v731_v6 }
 0x158   :  { %v2319_v13 = vpop.eup %2318  ;;  %v1995_v14 = vmul.f32 -1.442695, %v504_v10  ;;  %v840_v15 = vpack.c.bf16 %v2317_v11, %v2315_v9 }
 0x159   :  { %v732_v16 = vadd.f32 1.0, %v2319_v13  ;;  %v508_v17 = vpop.f32.mrf.mxu0 }
 0x15a   :  { %2332 = vpow2.f32 %v1995_v14  ;;  %v509_v18 = vadd.f32 %v2912_v8, %v508_v17  ;;  %1009 = vmatmul.mubr.bf16.gmra.mxu1 %v840_v15 }
 0x15b   :  { %v2321_v19 = vpop.eup %2320  ;;  %2334 = vrcp.f32 %v732_v16  ;;  %v510_v20 = vpop.f32.mrf.mxu0  ;;  %1018 = vmatprep.mubr.bf16.mxu1 %v2845_v0 }
 0x15c   :  { %v1996_v21 = vmul.f32 -1.442695, %v509_v18  ;;  %v733_v22 = vadd.f32 1.0, %v2321_v19  ;;  %v2323_v24 = vpop.eup %2322 }
 0x15d   :  { %v511_v23 = vpop.f32.mrf.mxu0 }
 0x15e   :  { %v512_v25 = vadd.f32 %v2912_v8, %v511_v23  ;;  %2336 = vpow2.f32 %v1996_v21 }
 0x15f   :  { %v2325_v26 = vpop.eup %2324  ;;  %v513_v27 = vpop.f32.mrf.mxu0  ;;  %2338 = vrcp.f32 %v733_v22 }
 0x160   :  { %v2327_v28 = vpop.eup %2326  ;;  %v734_v29 = vadd.f32 1.0, %v2325_v26  ;;  %v1997_v30 = vmul.f32 -1.442695, %v512_v25 }
 0x161   :  { %v516_v31 = vpop.f32.mrf.mxu0  ;;  %v841_v32 = vpack.c.bf16 %v2327_v28, %v2323_v24 }
 0x162   :  { %2340 = vrcp.f32 %v734_v29  ;;  %v517_v33 = vadd.f32 %v2912_v8, %v516_v31 }
 0x163   :  { %v2329_v34 = vpop.eup %2328  ;;  %2342 = vpow2.f32 %v1997_v30  ;;  %1019 = vmatmul.mubr.bf16.gmra.mxu1 %v841_v32  ;;  %v518_v35 = vpop.f32.mrf.mxu0 }
 0x164   :  { %v1998_v36 = vmul.f32 -1.442695, %v517_v33  ;;  %1028 = vmatprep.mubr.bf16.mxu1 %v2845_v0  ;;  %v735_v37 = vadd.f32 1.0, %v2329_v34  ;;  %v2331_v39 = vpop.eup %2330 }
 0x165   :  { %v519_v38 = vpop.f32.mrf.mxu0 }
 0x166   :  { %v520_v40 = vadd.f32 %v2912_v8, %v519_v38  ;;  %2344 = vpow2.f32 %v1998_v36 }
 0x167   :  { %v2333_v41 = vpop.eup %2332  ;;  %v521_v42 = vpop.f32.mrf.mxu0  ;;  %2346 = vrcp.f32 %v735_v37 }
 0x168   :  { %v2335_v43 = vpop.eup %2334  ;;  %v736_v44 = vadd.f32 1.0, %v2333_v41  ;;  %v1999_v45 = vmul.f32 -1.442695, %v520_v40 }
 0x169   :  { %v524_v46 = vpop.f32.mrf.mxu0  ;;  %v842_v47 = vpack.c.bf16 %v2335_v43, %v2331_v39 }
 0x16a   :  { %2348 = vrcp.f32 %v736_v44  ;;  %v525_v48 = vadd.f32 %v2912_v8, %v524_v46 }
 0x16b   :  { %2350 = vpow2.f32 %v1999_v45  ;;  %1029 = vmatmul.mubr.bf16.gmra.mxu1 %v842_v47  ;;  %v526_v49 = vpop.f32.mrf.mxu0  ;;  %v2337_v50 = vpop.eup %2336 }
 0x16c   :  { %v2000_v51 = vmul.f32 -1.442695, %v525_v48  ;;  %1038 = vmatprep.mubr.bf16.mxu1 %v2845_v0  ;;  %v737_v52 = vadd.f32 1.0, %v2337_v50  ;;  %v2339_v54 = vpop.eup %2338 }
 0x16d   :  { %v527_v53 = vpop.f32.mrf.mxu0 }
 0x16e   :  { %2352 = vpow2.f32 %v2000_v51  ;;  %v528_v55 = vadd.f32 %v2912_v8, %v527_v53 }
 0x16f   :  { %v2341_v56 = vpop.eup %2340  ;;  %v529_v57 = vpop.f32.mrf.mxu0  ;;  %2354 = vrcp.f32 %v737_v52 }
 0x170   :  { %v2343_v58 = vpop.eup %2342  ;;  %v2001_v59 = vmul.f32 -1.442695, %v528_v55  ;;  %v843_v60 = vpack.c.bf16 %v2341_v56, %v2339_v54 }
 0x171   :  { %v738_v61 = vadd.f32 1.0, %v2343_v58  ;;  %v532_v62 = vpop.f32.mrf.mxu0 }
 0x172   :  { %2356 = vpow2.f32 %v2001_v59  ;;  %v533_v63 = vadd.f32 %v2912_v8, %v532_v62 }
 0x173   :  { %2358 = vrcp.f32 %v738_v61  ;;  %1039 = vmatmul.mubr.bf16.gmra.mxu1 %v843_v60  ;;  %v534_v1 = vpop.f32.mrf.mxu0  ;;  %v2345_v2 = vpop.eup %2344 }
 0x174   :  { %v2002_v3 = vmul.f32 -1.442695, %v533_v63  ;;  %1048 = vmatprep.mubr.bf16.mxu1 %v2845_v0  ;;  %v739_v4 = vadd.f32 1.0, %v2345_v2  ;;  %v2347_v6 = vpop.eup %2346 }
 0x175   :  { %v535_v5 = vpop.f32.mrf.mxu0 }
 0x176   :  { %2360 = vpow2.f32 %v2002_v3  ;;  %v536_v7 = vadd.f32 %v2912_v8, %v535_v5 }
 0x177   :  { %v2349_v9 = vpop.eup %2348  ;;  %v537_v10 = vpop.f32.mrf.mxu0  ;;  %2362 = vrcp.f32 %v739_v4 }
 0x178   :  { %v2351_v11 = vpop.eup %2350  ;;  %v2003_v12 = vmul.f32 -1.442695, %v536_v7  ;;  %v844_v13 = vpack.c.bf16 %v2349_v9, %v2347_v6 }
 0x179   :  { %v740_v14 = vadd.f32 1.0, %v2351_v11  ;;  %v540_v15 = vpop.f32.mrf.mxu0 }
 0x17a   :  { %2364 = vpow2.f32 %v2003_v12  ;;  %v541_v16 = vadd.f32 %v2912_v8, %v540_v15 }
 0x17b   :  { %v2353_v17 = vpop.eup %2352  ;;  %2366 = vrcp.f32 %v740_v14  ;;  %1049 = vmatmul.mubr.bf16.gmra.mxu1 %v844_v13  ;;  %v542_v18 = vpop.f32.mrf.mxu0 }
 0x17c   :  { %v2004_v19 = vmul.f32 -1.442695, %v541_v16  ;;  %1058 = vmatprep.mubr.bf16.mxu1 %v2845_v0  ;;  %v741_v20 = vadd.f32 1.0, %v2353_v17  ;;  %v2355_v22 = vpop.eup %2354 }
 0x17d   :  { %v543_v21 = vpop.f32.mrf.mxu0 }
 0x17e   :  { %v544_v23 = vadd.f32 %v2912_v8, %v543_v21  ;;  %2368 = vpow2.f32 %v2004_v19 }
 0x17f   :  { %v2357_v24 = vpop.eup %2356  ;;  %v545_v25 = vpop.f32.mrf.mxu0  ;;  %2370 = vrcp.f32 %v741_v20 }
 0x180   :  { %v2359_v26 = vpop.eup %2358  ;;  %v742_v27 = vadd.f32 1.0, %v2357_v24  ;;  %v2005_v28 = vmul.f32 -1.442695, %v544_v23 }
 0x181   :  { %v548_v29 = vpop.f32.mrf.mxu0  ;;  %v845_v30 = vpack.c.bf16 %v2359_v26, %v2355_v22 }
 0x182   :  { %2372 = vrcp.f32 %v742_v27  ;;  %v549_v31 = vadd.f32 %v2912_v8, %v548_v29 }
 0x183   :  { %v2361_v32 = vpop.eup %2360  ;;  %2374 = vpow2.f32 %v2005_v28  ;;  %1059 = vmatmul.mubr.bf16.gmra.mxu1 %v845_v30  ;;  %v550_v33 = vpop.f32.mrf.mxu0 }
 0x184   :  { %v2006_v34 = vmul.f32 -1.442695, %v549_v31  ;;  %1068 = vmatprep.mubr.bf16.mxu1 %v2845_v0  ;;  %v743_v35 = vadd.f32 1.0, %v2361_v32  ;;  %v2363_v37 = vpop.eup %2362 }
 0x185   :  { %v551_v36 = vpop.f32.mrf.mxu0 }
 0x186   :  { %v552_v38 = vadd.f32 %v2912_v8, %v551_v36  ;;  %2376 = vpow2.f32 %v2006_v34 }
 0x187   :  { %v2365_v39 = vpop.eup %2364  ;;  %v553_v40 = vpop.f32.mrf.mxu0  ;;  %2378 = vrcp.f32 %v743_v35 }
 0x188   :  { %v2367_v41 = vpop.eup %2366  ;;  %v744_v42 = vadd.f32 1.0, %v2365_v39  ;;  %v2007_v43 = vmul.f32 -1.442695, %v552_v38 }
 0x189   :  { %v556_v44 = vpop.f32.mrf.mxu0  ;;  %v846_v45 = vpack.c.bf16 %v2367_v41, %v2363_v37 }
 0x18a   :  { %2380 = vrcp.f32 %v744_v42  ;;  %v557_v46 = vadd.f32 %v2912_v8, %v556_v44 }
 0x18b   :  { %2382 = vpow2.f32 %v2007_v43  ;;  %1069 = vmatmul.mubr.bf16.gmra.mxu1 %v846_v45  ;;  %v558_v47 = vpop.f32.mrf.mxu0  ;;  %v2369_v48 = vpop.eup %2368 }
 0x18c   :  { %v2008_v49 = vmul.f32 -1.442695, %v557_v46  ;;  %1078 = vmatprep.mubr.bf16.mxu1 %v2845_v0  ;;  %v745_v50 = vadd.f32 1.0, %v2369_v48  ;;  %v2371_v52 = vpop.eup %2370 }
 0x18d   :  { %v559_v51 = vpop.f32.mrf.mxu0 }
 0x18e   :  { %2384 = vpow2.f32 %v2008_v49  ;;  %v560_v53 = vadd.f32 %v2912_v8, %v559_v51 }
 0x18f   :  { %v2373_v54 = vpop.eup %2372  ;;  %v561_v55 = vpop.f32.mrf.mxu0  ;;  %2386 = vrcp.f32 %v745_v50 }
 0x190   :  { %v2375_v56 = vpop.eup %2374  ;;  %v2009_v57 = vmul.f32 -1.442695, %v560_v53  ;;  %v847_v58 = vpack.c.bf16 %v2373_v54, %v2371_v52 }
 0x191   :  { %v746_v59 = vadd.f32 1.0, %v2375_v56  ;;  %v564_v60 = vpop.f32.mrf.mxu0 }
 0x192   :  { %2388 = vpow2.f32 %v2009_v57  ;;  %v565_v61 = vadd.f32 %v2912_v8, %v564_v60 }
 0x193   :  { %2390 = vrcp.f32 %v746_v59  ;;  %1079 = vmatmul.mubr.bf16.gmra.mxu1 %v847_v58  ;;  %v566_v62 = vpop.f32.mrf.mxu0  ;;  %v2377_v63 = vpop.eup %2376 }
 0x194   :  { %v2010_v1 = vmul.f32 -1.442695, %v565_v61  ;;  %1088 = vmatprep.mubr.bf16.mxu1 %v2845_v0  ;;  %v747_v2 = vadd.f32 1.0, %v2377_v63  ;;  %v2379_v4 = vpop.eup %2378 }
 0x195   :  { %v567_v3 = vpop.f32.mrf.mxu0 }
 0x196   :  { %2392 = vpow2.f32 %v2010_v1  ;;  %v568_v5 = vadd.f32 %v2912_v8, %v567_v3 }
 0x197   :  { %v2381_v6 = vpop.eup %2380  ;;  %v569_v7 = vpop.f32.mrf.mxu0  ;;  %2394 = vrcp.f32 %v747_v2 }
 0x198   :  { %v2383_v9 = vpop.eup %2382  ;;  %v2011_v10 = vmul.f32 -1.442695, %v568_v5  ;;  %v848_v11 = vpack.c.bf16 %v2381_v6, %v2379_v4 }
 0x199   :  { %v748_v12 = vadd.f32 1.0, %v2383_v9  ;;  %v572_v13 = vpop.f32.mrf.mxu0 }
 0x19a   :  { %2396 = vpow2.f32 %v2011_v10  ;;  %v573_v14 = vadd.f32 %v2912_v8, %v572_v13 }
 0x19b   :  { %v2385_v15 = vpop.eup %2384  ;;  %2398 = vrcp.f32 %v748_v12  ;;  %1089 = vmatmul.mubr.bf16.gmra.mxu1 %v848_v11  ;;  %v574_v16 = vpop.f32.mrf.mxu0 }
 0x19c   :  { %v2012_v17 = vmul.f32 -1.442695, %v573_v14  ;;  %1098 = vmatprep.mubr.bf16.mxu1 %v2845_v0  ;;  %v749_v18 = vadd.f32 1.0, %v2385_v15  ;;  %v2387_v20 = vpop.eup %2386 }
 0x19d   :  { %v575_v19 = vpop.f32.mrf.mxu0 }
 0x19e   :  { %v576_v21 = vadd.f32 %v2912_v8, %v575_v19  ;;  %2400 = vpow2.f32 %v2012_v17 }
 0x19f   :  { %v2389_v22 = vpop.eup %2388  ;;  %v577_v23 = vpop.f32.mrf.mxu0  ;;  %2402 = vrcp.f32 %v749_v18 }
 0x1a0   :  { %v2391_v24 = vpop.eup %2390  ;;  %v750_v25 = vadd.f32 1.0, %v2389_v22  ;;  %v2013_v26 = vmul.f32 -1.442695, %v576_v21 }
 0x1a1   :  { %v580_v27 = vpop.f32.mrf.mxu0  ;;  %v849_v28 = vpack.c.bf16 %v2391_v24, %v2387_v20 }
 0x1a2   :  { %2404 = vrcp.f32 %v750_v25  ;;  %v581_v29 = vadd.f32 %v2912_v8, %v580_v27 }
 0x1a3   :  { %v2393_v30 = vpop.eup %2392  ;;  %2406 = vpow2.f32 %v2013_v26  ;;  %1099 = vmatmul.mubr.bf16.gmra.mxu1 %v849_v28  ;;  %v582_v31 = vpop.f32.mrf.mxu0 }
 0x1a4   :  { %v2014_v32 = vmul.f32 -1.442695, %v581_v29  ;;  %1108 = vmatprep.mubr.bf16.mxu1 %v2845_v0  ;;  %v751_v33 = vadd.f32 1.0, %v2393_v30  ;;  %v2395_v35 = vpop.eup %2394 }
 0x1a5   :  { %v583_v34 = vpop.f32.mrf.mxu0 }
 0x1a6   :  { %v584_v36 = vadd.f32 %v2912_v8, %v583_v34  ;;  %2408 = vpow2.f32 %v2014_v32 }
 0x1a7   :  { %v2397_v37 = vpop.eup %2396  ;;  %v585_v38 = vpop.f32.mrf.mxu0  ;;  %2410 = vrcp.f32 %v751_v33 }
 0x1a8   :  { %v2399_v39 = vpop.eup %2398  ;;  %v752_v40 = vadd.f32 1.0, %v2397_v37  ;;  %v2015_v41 = vmul.f32 -1.442695, %v584_v36 }
 0x1a9   :  { %v588_v42 = vpop.f32.mrf.mxu0  ;;  %v850_v43 = vpack.c.bf16 %v2399_v39, %v2395_v35 }
 0x1aa   :  { %2412 = vrcp.f32 %v752_v40  ;;  %v589_v44 = vadd.f32 %v2912_v8, %v588_v42 }
 0x1ab   :  { %2414 = vpow2.f32 %v2015_v41  ;;  %1109 = vmatmul.mubr.bf16.gmra.mxu1 %v850_v43  ;;  %v590_v45 = vpop.f32.mrf.mxu0  ;;  %v2401_v46 = vpop.eup %2400 }
 0x1ac   :  { %v2016_v47 = vmul.f32 -1.442695, %v589_v44  ;;  %1118 = vmatprep.mubr.bf16.mxu1 %v2845_v0  ;;  %v753_v48 = vadd.f32 1.0, %v2401_v46  ;;  %v2403_v50 = vpop.eup %2402  ;;  %v876_v45 = vlaneseq }
 0x1ad   :  { %v591_v49 = vpop.f32.mrf.mxu0 }
 0x1ae   :  { %2416 = vpow2.f32 %v2016_v47  ;;  %v592_v51 = vadd.f32 %v2912_v8, %v591_v49  ;;  %v877_v46 = vshrl.u32 %v876_v45, 7 }
 0x1af   :  { %v2405_v52 = vpop.eup %2404  ;;  %v593_v53 = vpop.f32.mrf.mxu0  ;;  %2418 = vrcp.f32 %v753_v48  ;;  %v874_v48 = vld [vmem:[%s3063_s4] sm:$0x3]  ;;  %s2846_s4 = smov [#allocation8]  }
 0x1b0   :  { %v2407_v54 = vpop.eup %2406  ;;  %v2017_v55 = vmul.f32 -1.442695, %v592_v51  ;;  %v851_v56 = vpack.c.bf16 %v2405_v52, %v2403_v50  ;;  %v878_v47 = vsub.s32 0, %v877_v46  ;;  %v882_v49 = vsub.s32 1, %v877_v46  ;;  %s1916_s12 = sshll.u32 %s2846_s4, 4  ;;  %s1917_s12 = int_to_ptr.vmem [resolvable:$true] %s1916_s12 }
 0x1b1   :  { %v754_v57 = vadd.f32 1.0, %v2407_v54  ;;  %v596_v58 = vpop.f32.mrf.mxu0  ;;  %s2812_s13 = scalar_lea.vmem %s1917_s12, 4864  ;;  %p2817_p2 = scmp.lt.s32.totalorder %s1917_s12, %s1917_s12 }
 0x1b2   :  { %2420 = vpow2.f32 %v2017_v55  ;;  %v597_v59 = vadd.f32 %v2912_v8, %v596_v58  ;;  %v2973_v50 = vrot.slane %v874_v48, %v878_v47  ;;  %v2975_v51 = vrot.slane %v874_v48, %v882_v49  ;;  %p2813_p1 = scmp.ne.s32.totalorder %s1917_s12, %s2812_s13  ;;  %p2818_p3 = scmp.lt.s32.totalorder %s2812_s13, %s2812_s13 }
 0x1b3   :  { %2422 = vrcp.f32 %v754_v57  ;;  %1119 = vmatmul.mubr.bf16.gmra.mxu1 %v851_v56  ;;  %v598_v60 = vpop.f32.mrf.mxu0  ;;  %v2409_v61 = vpop.eup %2408 }
 0x1b4   :  { %v2018_v62 = vmul.f32 -1.442695, %v597_v59  ;;  %1128 = vmatprep.mubr.bf16.mxu1 %v2845_v0  ;;  %v755_v63 = vadd.f32 1.0, %v2409_v61  ;;  %v2411_v2 = vpop.eup %2410  ;;  %p2819_p4 = por %p2818_p3, %p2817_p2 }
 0x1b5   :  { %v599_v1 = vpop.f32.mrf.mxu0 }
 0x1b6   :  { %2424 = vpow2.f32 %v2018_v62  ;;  %v600_v3 = vadd.f32 %v2912_v8, %v599_v1  ;;  %p2820_p5 = pnand %p2819_p4, %p2813_p1 }
 0x1b7   :  { %v2413_v4 = vpop.eup %2412  ;;  %v601_v5 = vpop.f32.mrf.mxu0  ;;  %2426 = vrcp.f32 %v755_v63 }
 0x1b8   :  { %v2415_v6 = vpop.eup %2414  ;;  %v2019_v7 = vmul.f32 -1.442695, %v600_v3  ;;  %v852_v9 = vpack.c.bf16 %v2413_v4, %v2411_v2 }
 0x1b9   :  { %v756_v10 = vadd.f32 1.0, %v2415_v6  ;;  %v604_v11 = vpop.f32.mrf.mxu0 }
 0x1ba   :  { %2428 = vpow2.f32 %v2019_v7  ;;  %v605_v12 = vadd.f32 %v2912_v8, %v604_v11 }
 0x1bb   :  { %v2417_v13 = vpop.eup %2416  ;;  %2430 = vrcp.f32 %v756_v10  ;;  %1129 = vmatmul.mubr.bf16.gmra.mxu1 %v852_v9  ;;  %v606_v14 = vpop.f32.mrf.mxu0 }
 0x1bc   :  { %v2020_v15 = vmul.f32 -1.442695, %v605_v12  ;;  %1138 = vmatprep.mubr.bf16.mxu1 %v2845_v0  ;;  %v757_v16 = vadd.f32 1.0, %v2417_v13  ;;  %v2419_v18 = vpop.eup %2418 }
 0x1bd   :  { %v607_v17 = vpop.f32.mrf.mxu0 }
 0x1be   :  { %v608_v19 = vadd.f32 %v2912_v8, %v607_v17  ;;  %2432 = vpow2.f32 %v2020_v15 }
 0x1bf   :  { %v2421_v20 = vpop.eup %2420  ;;  %v609_v21 = vpop.f32.mrf.mxu0  ;;  %2434 = vrcp.f32 %v757_v16 }
 0x1c0   :  { %v2423_v22 = vpop.eup %2422  ;;  %v758_v23 = vadd.f32 1.0, %v2421_v20  ;;  %v2021_v24 = vmul.f32 -1.442695, %v608_v19 }
 0x1c1   :  { %v853_v25 = vpack.c.bf16 %v2423_v22, %v2419_v18 }
 0x1c2   :  { %2436 = vrcp.f32 %v758_v23 }
 0x1c3   :  { %v2425_v26 = vpop.eup %2424  ;;  %2438 = vpow2.f32 %v2021_v24  ;;  %1139 = vmatmul.mubr.bf16.gmra.mxu1 %v853_v25 }
 0x1c4   :  { %1148 = vmatprep.mubr.bf16.mxu1 %v2845_v0  ;;  %v759_v27 = vadd.f32 1.0, %v2425_v26  ;;  %v2427_v28 = vpop.eup %2426 }
 0x1c6   :  { %2440 = vrcp.f32 %v759_v27 }
 0x1c7   :  { %v2429_v29 = vpop.eup %2428 }
 0x1c8   :  { %v2431_v30 = vpop.eup %2430  ;;  %v760_v31 = vadd.f32 1.0, %v2429_v29 }
 0x1c9   :  { %v854_v8 = vpack.c.bf16 %v2431_v30, %v2427_v28 }
 0x1ca   :  { %2442 = vrcp.f32 %v760_v31 }
 0x1cb   :  { %1149 = vmatmul.mubr.bf16.gmra.mxu1 %v854_v8  ;;  %v2433_v32 = vpop.eup %2432 }
 0x1cc   :  { %1158 = vmatprep.mubr.bf16.mxu1 %v2845_v0  ;;  %v2435_v33 = vpop.eup %2434  ;;  %v761_v34 = vadd.f32 1.0, %v2433_v32 }
 0x1ce   :  { %2444 = vrcp.f32 %v761_v34 }
 0x1cf   :  { %v2437_v35 = vpop.eup %2436 }
 0x1d0   :  { %v2439_v36 = vpop.eup %2438  ;;  %v855_v37 = vpack.c.bf16 %v2437_v35, %v2435_v33 }
 0x1d1   :  { %v762_v38 = vadd.f32 1.0, %v2439_v36 }
 0x1d3   :  { %2446 = vrcp.f32 %v762_v38  ;;  %1159 = vmatmul.mubr.bf16.gmra.mxu1 %v855_v37  ;;  %v2441_v39 = vpop.eup %2440 }
 0x1d4   :  { %1168 = vmatprep.mubr.bf16.mxu1 %v2845_v0 }
 0x1d7   :  { %v2443_v40 = vpop.eup %2442 }
 0x1d8   :  { %v856_v41 = vpack.c.bf16 %v2443_v40, %v2441_v39 }
 0x1db   :  { %1169 = vmatmul.mubr.bf16.gmra.mxu1 %v856_v41  ;;  %v2445_v42 = vpop.eup %2444 }
 0x1dc   :  { %1178 = vmatprep.mubr.bf16.mxu1 %v2845_v0 }
 0x1e0   :  { %v2447_v43 = vpop.eup %2446 }
 0x1e1   :  { %v857_v44 = vpack.c.bf16 %v2447_v43, %v2445_v42 }
 0x1e3   :  { %1179 = vmatmul.mubr.bf16.gmra.mxu1 %v857_v44 }
 0x212   :  { %v1000_v52 = vpop.f32.mrf.mxu1 }
 0x213   :  { %v1001_v53 = vadd.f32 %v1000_v52, %v2973_v50 }
 0x214   :  { %v1002_v0 = vpop.f32.mrf.mxu1 }
 0x215   :  { %v2038_v54 = vmul.f32 -1.442695, %v1001_v53  ;;  %v1003_v55 = vadd.f32 %v1002_v0, %v2975_v51 }
 0x216   :  { %v1004_v56 = vpop.f32.mrf.mxu1 }
 0x217   :  { %2448 = vpow2.f32 %v2038_v54  ;;  %v2039_v57 = vmul.f32 -1.442695, %v1003_v55  ;;  %v1005_v58 = vadd.f32 %v1004_v56, %v2973_v50 }
 0x218   :  { %v1006_v59 = vpop.f32.mrf.mxu1 }
 0x219   :  { %2450 = vpow2.f32 %v2039_v57  ;;  %v2040_v60 = vmul.f32 -1.442695, %v1005_v58  ;;  %v1007_v61 = vadd.f32 %v1006_v59, %v2975_v51 }
 0x21a   :  { %v1010_v62 = vpop.f32.mrf.mxu1 }
 0x21b   :  { %2452 = vpow2.f32 %v2040_v60  ;;  %v2041_v63 = vmul.f32 -1.442695, %v1007_v61  ;;  %v1011_v1 = vadd.f32 %v1010_v62, %v2973_v50 }
 0x21c   :  { %v1012_v2 = vpop.f32.mrf.mxu1 }
 0x21d   :  { %2454 = vpow2.f32 %v2041_v63  ;;  %v2042_v3 = vmul.f32 -1.442695, %v1011_v1  ;;  %v1013_v4 = vadd.f32 %v1012_v2, %v2975_v51 }
 0x21e   :  { %v1014_v5 = vpop.f32.mrf.mxu1 }
 0x21f   :  { %2456 = vpow2.f32 %v2042_v3  ;;  %v2043_v6 = vmul.f32 -1.442695, %v1013_v4  ;;  %v1015_v7 = vadd.f32 %v1014_v5, %v2973_v50 }
 0x220   :  { %v1016_v9 = vpop.f32.mrf.mxu1 }
 0x221   :  { %2458 = vpow2.f32 %v2043_v6  ;;  %v2044_v10 = vmul.f32 -1.442695, %v1015_v7  ;;  %v1017_v11 = vadd.f32 %v1016_v9, %v2975_v51 }
 0x223   :  { %2460 = vpow2.f32 %v2044_v10  ;;  %v2045_v12 = vmul.f32 -1.442695, %v1017_v11  ;;  %v1020_v13 = vpop.f32.mrf.mxu1 }
 0x224   :  { %v2449_v14 = vpop.eup %2448  ;;  %v1021_v15 = vadd.f32 %v1020_v13, %v2973_v50 }
 0x225   :  { %v1417_v16 = vadd.f32 1.0, %v2449_v14  ;;  %2462 = vpow2.f32 %v2045_v12  ;;  %v1022_v17 = vpop.f32.mrf.mxu1 }
 0x226   :  { %v2451_v18 = vpop.eup %2450  ;;  %v2046_v19 = vmul.f32 -1.442695, %v1021_v15  ;;  %v1023_v20 = vadd.f32 %v1022_v17, %v2975_v51 }
 0x227   :  { %2464 = vrcp.f32 %v1417_v16  ;;  %v1418_v21 = vadd.f32 1.0, %v2451_v18  ;;  %v1024_v22 = vpop.f32.mrf.mxu1 }
 0x228   :  { %v2453_v23 = vpop.eup %2452  ;;  %2466 = vpow2.f32 %v2046_v19  ;;  %v2047_v24 = vmul.f32 -1.442695, %v1023_v20  ;;  %v1025_v25 = vadd.f32 %v1024_v22, %v2973_v50 }
 0x229   :  { %2468 = vrcp.f32 %v1418_v21  ;;  %v1419_v26 = vadd.f32 1.0, %v2453_v23  ;;  %v1026_v27 = vpop.f32.mrf.mxu1 }
 0x22a   :  { %v2455_v28 = vpop.eup %2454  ;;  %2470 = vpow2.f32 %v2047_v24  ;;  %v2048_v29 = vmul.f32 -1.442695, %v1025_v25  ;;  %v1027_v30 = vadd.f32 %v1026_v27, %v2975_v51 }
 0x22b   :  { %2472 = vrcp.f32 %v1419_v26  ;;  %v1420_v31 = vadd.f32 1.0, %v2455_v28  ;;  %v1030_v8 = vpop.f32.mrf.mxu1 }
 0x22c   :  { %v2457_v32 = vpop.eup %2456  ;;  %2474 = vpow2.f32 %v2048_v29  ;;  %v2049_v33 = vmul.f32 -1.442695, %v1027_v30  ;;  %v1031_v34 = vadd.f32 %v1030_v8, %v2973_v50 }
 0x22d   :  { %2476 = vrcp.f32 %v1420_v31  ;;  %v1421_v35 = vadd.f32 1.0, %v2457_v32  ;;  %v1032_v36 = vpop.f32.mrf.mxu1 }
 0x22e   :  { %v2459_v37 = vpop.eup %2458  ;;  %2478 = vpow2.f32 %v2049_v33  ;;  %v2050_v38 = vmul.f32 -1.442695, %v1031_v34  ;;  %v1033_v39 = vadd.f32 %v1032_v36, %v2975_v51 }
 0x22f   :  { %2480 = vrcp.f32 %v1421_v35  ;;  %v1422_v40 = vadd.f32 1.0, %v2459_v37  ;;  %v1034_v41 = vpop.f32.mrf.mxu1 }
 0x230   :  { %v2461_v42 = vpop.eup %2460  ;;  %2482 = vpow2.f32 %v2050_v38  ;;  %v2051_v43 = vmul.f32 -1.442695, %v1033_v39  ;;  %v1035_v44 = vadd.f32 %v1034_v41, %v2973_v50 }
 0x231   :  { %2484 = vrcp.f32 %v1422_v40  ;;  %v1423_v45 = vadd.f32 1.0, %v2461_v42  ;;  %v1036_v46 = vpop.f32.mrf.mxu1 }
 0x232   :  { %v2463_v47 = vpop.eup %2462  ;;  %2486 = vpow2.f32 %v2051_v43  ;;  %v2052_v48 = vmul.f32 -1.442695, %v1035_v44  ;;  %v1037_v49 = vadd.f32 %v1036_v46, %v2975_v51 }
 0x233   :  { %2488 = vrcp.f32 %v1423_v45  ;;  %v1424_v52 = vadd.f32 1.0, %v2463_v47  ;;  %v1040_v53 = vpop.f32.mrf.mxu1 }
 0x234   :  { %v2465_v0 = vpop.eup %2464  ;;  %2490 = vpow2.f32 %v2052_v48  ;;  %v2053_v54 = vmul.f32 -1.442695, %v1037_v49  ;;  %v1041_v55 = vadd.f32 %v1040_v53, %v2973_v50 }
 0x235   :  { %v2467_v56 = vpop.eup %2466  ;;  %2492 = vrcp.f32 %v1424_v52  ;;  %v1042_v57 = vpop.f32.mrf.mxu1 }
 0x236   :  { %v2469_v58 = vpop.eup %2468  ;;  %v1425_v59 = vadd.f32 1.0, %v2467_v56  ;;  %2494 = vpow2.f32 %v2053_v54  ;;  %v2054_v60 = vmul.f32 -1.442695, %v1041_v55  ;;  %v1043_v61 = vadd.f32 %v1042_v57, %v2975_v51 }
 0x237   :  { %v2471_v62 = vpop.eup %2470  ;;  %v2152_v63 = vpack.c.bf16 %v2469_v58, %v2465_v0  ;;  %v1044_v1 = vpop.f32.mrf.mxu1 }
 0x238   :  { %v2473_v2 = vpop.eup %2472  ;;  %2496 = vrcp.f32 %v1425_v59  ;;  %v1426_v3 = vadd.f32 1.0, %v2471_v62  ;;  %v2055_v4 = vmul.f32 -1.442695, %v1043_v61  ;;  %v1045_v5 = vadd.f32 %v1044_v1, %v2973_v50 }
 0x239   :  { %v2475_v6 = vpop.eup %2474  ;;  %1873 = vst [vmem:[#allocation8] sm:$0xff] %v2152_v63  ;;  %2498 = vpow2.f32 %v2054_v60  ;;  %v1046_v7 = vpop.f32.mrf.mxu1 }
 0x23a   :  { %v2477_v9 = vpop.eup %2476  ;;  %2500 = vrcp.f32 %v1426_v3  ;;  %v1427_v10 = vadd.f32 1.0, %v2475_v6  ;;  %v2056_v11 = vmul.f32 -1.442695, %v1045_v5  ;;  %v1047_v12 = vadd.f32 %v1046_v7, %v2975_v51 }
 0x23b   :  { %v2479_v13 = vpop.eup %2478  ;;  %v2153_v14 = vpack.c.bf16 %v2477_v9, %v2473_v2  ;;  %2502 = vpow2.f32 %v2055_v4  ;;  %v1050_v15 = vpop.f32.mrf.mxu1 }
 0x23c   :  { %v2481_v16 = vpop.eup %2480  ;;  %2504 = vrcp.f32 %v1427_v10  ;;  %v1428_v17 = vadd.f32 1.0, %v2479_v13  ;;  %v2057_v18 = vmul.f32 -1.442695, %v1047_v12  ;;  %v1051_v19 = vadd.f32 %v1050_v15, %v2973_v50 }
 0x23d   :  { %v2483_v20 = vpop.eup %2482  ;;  %1874 = vst [vmem:[#allocation8 + $0x8] sm:$0xff] %v2153_v14  ;;  %2506 = vpow2.f32 %v2056_v11  ;;  %v1052_v21 = vpop.f32.mrf.mxu1 }
 0x23e   :  { %v2485_v22 = vpop.eup %2484  ;;  %2508 = vrcp.f32 %v1428_v17  ;;  %v1429_v23 = vadd.f32 1.0, %v2483_v20  ;;  %v2058_v24 = vmul.f32 -1.442695, %v1051_v19  ;;  %v1053_v25 = vadd.f32 %v1052_v21, %v2975_v51 }
 0x23f   :  { %v2487_v26 = vpop.eup %2486  ;;  %v2154_v27 = vpack.c.bf16 %v2485_v22, %v2481_v16  ;;  %2510 = vpow2.f32 %v2057_v18  ;;  %v1054_v28 = vpop.f32.mrf.mxu1 }
 0x240   :  { %v2489_v29 = vpop.eup %2488  ;;  %2512 = vrcp.f32 %v1429_v23  ;;  %v1430_v30 = vadd.f32 1.0, %v2487_v26  ;;  %v2059_v31 = vmul.f32 -1.442695, %v1053_v25  ;;  %v1055_v8 = vadd.f32 %v1054_v28, %v2973_v50 }
 0x241   :  { %v2491_v32 = vpop.eup %2490  ;;  %1875 = vst [vmem:[#allocation8 + $0x10] sm:$0xff] %v2154_v27  ;;  %2514 = vpow2.f32 %v2058_v24  ;;  %v1056_v33 = vpop.f32.mrf.mxu1 }
 0x242   :  { %v2493_v34 = vpop.eup %2492  ;;  %2516 = vrcp.f32 %v1430_v30  ;;  %v1431_v35 = vadd.f32 1.0, %v2491_v32  ;;  %v2060_v36 = vmul.f32 -1.442695, %v1055_v8  ;;  %v1057_v37 = vadd.f32 %v1056_v33, %v2975_v51 }
 0x243   :  { %v2495_v38 = vpop.eup %2494  ;;  %v2155_v39 = vpack.c.bf16 %v2493_v34, %v2489_v29  ;;  %2518 = vpow2.f32 %v2059_v31  ;;  %v1060_v40 = vpop.f32.mrf.mxu1 }
 0x244   :  { %2520 = vrcp.f32 %v1431_v35  ;;  %v1432_v41 = vadd.f32 1.0, %v2495_v38  ;;  %v2061_v42 = vmul.f32 -1.442695, %v1057_v37  ;;  %v1061_v43 = vadd.f32 %v1060_v40, %v2973_v50 }
 0x245   :  { %v2497_v44 = vpop.eup %2496  ;;  %1876 = vst [vmem:[#allocation8 + $0x18] sm:$0xff] %v2155_v39  ;;  %2522 = vpow2.f32 %v2060_v36  ;;  %v1062_v45 = vpop.f32.mrf.mxu1 }
 0x246   :  { %v2499_v46 = vpop.eup %2498  ;;  %2524 = vrcp.f32 %v1432_v41  ;;  %v2062_v47 = vmul.f32 -1.442695, %v1061_v43  ;;  %v1063_v48 = vadd.f32 %v1062_v45, %v2975_v51 }
 0x247   :  { %v2501_v49 = vpop.eup %2500  ;;  %v1433_v52 = vadd.f32 1.0, %v2499_v46  ;;  %2526 = vpow2.f32 %v2061_v42  ;;  %v1064_v53 = vpop.f32.mrf.mxu1 }
 0x248   :  { %v2503_v0 = vpop.eup %2502  ;;  %v2156_v54 = vpack.c.bf16 %v2501_v49, %v2497_v44  ;;  %2528 = vpow2.f32 %v2062_v47  ;;  %v2063_v55 = vmul.f32 -1.442695, %v1063_v48  ;;  %v1065_v56 = vadd.f32 %v1064_v53, %v2973_v50 }
 0x249   :  { %v2505_v57 = vpop.eup %2504  ;;  %2530 = vrcp.f32 %v1433_v52  ;;  %v1434_v58 = vadd.f32 1.0, %v2503_v0  ;;  %v1066_v59 = vpop.f32.mrf.mxu1 }
 0x24a   :  { %v2507_v60 = vpop.eup %2506  ;;  %1877 = vst [vmem:[#allocation8 + $0x20] sm:$0xff] %v2156_v54  ;;  %2532 = vpow2.f32 %v2063_v55  ;;  %v2064_v61 = vmul.f32 -1.442695, %v1065_v56  ;;  %v1067_v62 = vadd.f32 %v1066_v59, %v2975_v51 }
 0x24b   :  { %v2509_v63 = vpop.eup %2508  ;;  %2534 = vrcp.f32 %v1434_v58  ;;  %v1435_v1 = vadd.f32 1.0, %v2507_v60  ;;  %v1070_v2 = vpop.f32.mrf.mxu1 }
 0x24c   :  { %v2511_v3 = vpop.eup %2510  ;;  %v2157_v4 = vpack.c.bf16 %v2509_v63, %v2505_v57  ;;  %2536 = vpow2.f32 %v2064_v61  ;;  %v2065_v5 = vmul.f32 -1.442695, %v1067_v62  ;;  %v1071_v6 = vadd.f32 %v1070_v2, %v2973_v50 }
 0x24d   :  { %v2513_v7 = vpop.eup %2512  ;;  %2538 = vrcp.f32 %v1435_v1  ;;  %v1436_v9 = vadd.f32 1.0, %v2511_v3  ;;  %v1072_v10 = vpop.f32.mrf.mxu1 }
 0x24e   :  { %v2515_v11 = vpop.eup %2514  ;;  %1878 = vst [vmem:[#allocation8 + $0x28] sm:$0xff] %v2157_v4  ;;  %2540 = vpow2.f32 %v2065_v5  ;;  %v2066_v12 = vmul.f32 -1.442695, %v1071_v6  ;;  %v1073_v13 = vadd.f32 %v1072_v10, %v2975_v51 }
 0x24f   :  { %v2517_v14 = vpop.eup %2516  ;;  %2542 = vrcp.f32 %v1436_v9  ;;  %v1437_v15 = vadd.f32 1.0, %v2515_v11  ;;  %v1074_v16 = vpop.f32.mrf.mxu1 }
 0x250   :  { %v2519_v17 = vpop.eup %2518  ;;  %v2158_v18 = vpack.c.bf16 %v2517_v14, %v2513_v7  ;;  %2544 = vpow2.f32 %v2066_v12  ;;  %v2067_v19 = vmul.f32 -1.442695, %v1073_v13  ;;  %v1075_v20 = vadd.f32 %v1074_v16, %v2973_v50 }
 0x251   :  { %v2521_v21 = vpop.eup %2520  ;;  %2546 = vrcp.f32 %v1437_v15  ;;  %v1438_v22 = vadd.f32 1.0, %v2519_v17  ;;  %v1076_v23 = vpop.f32.mrf.mxu1 }
 0x252   :  { %v2523_v24 = vpop.eup %2522  ;;  %1879 = vst [vmem:[#allocation8 + $0x30] sm:$0xff] %v2158_v18  ;;  %2548 = vpow2.f32 %v2067_v19  ;;  %v2068_v25 = vmul.f32 -1.442695, %v1075_v20  ;;  %v1077_v26 = vadd.f32 %v1076_v23, %v2975_v51 }
 0x253   :  { %v2525_v27 = vpop.eup %2524  ;;  %2550 = vrcp.f32 %v1438_v22  ;;  %v1439_v28 = vadd.f32 1.0, %v2523_v24  ;;  %v1080_v29 = vpop.f32.mrf.mxu1 }
 0x254   :  { %v2527_v30 = vpop.eup %2526  ;;  %v2159_v31 = vpack.c.bf16 %v2525_v27, %v2521_v21  ;;  %2552 = vpow2.f32 %v2068_v25  ;;  %v2069_v8 = vmul.f32 -1.442695, %v1077_v26  ;;  %v1081_v32 = vadd.f32 %v1080_v29, %v2973_v50 }
 0x255   :  { %v2529_v33 = vpop.eup %2528  ;;  %2554 = vrcp.f32 %v1439_v28  ;;  %v1440_v34 = vadd.f32 1.0, %v2527_v30  ;;  %v1082_v35 = vpop.f32.mrf.mxu1 }
 0x256   :  { %v2531_v36 = vpop.eup %2530  ;;  %1880 = vst [vmem:[#allocation8 + $0x38] sm:$0xff] %v2159_v31  ;;  %v1441_v37 = vadd.f32 1.0, %v2529_v33  ;;  %2556 = vpow2.f32 %v2069_v8  ;;  %v2070_v38 = vmul.f32 -1.442695, %v1081_v32  ;;  %v1083_v39 = vadd.f32 %v1082_v35, %v2975_v51 }
 0x257   :  { %v2533_v40 = vpop.eup %2532  ;;  %2558 = vrcp.f32 %v1440_v34  ;;  %v1084_v41 = vpop.f32.mrf.mxu1 }
 0x258   :  { %v2535_v42 = vpop.eup %2534  ;;  %2560 = vrcp.f32 %v1441_v37  ;;  %v1442_v43 = vadd.f32 1.0, %v2533_v40  ;;  %v2071_v44 = vmul.f32 -1.442695, %v1083_v39  ;;  %v1085_v45 = vadd.f32 %v1084_v41, %v2973_v50 }
 0x259   :  { %v2537_v46 = vpop.eup %2536  ;;  %v2160_v47 = vpack.c.bf16 %v2535_v42, %v2531_v36  ;;  %2562 = vpow2.f32 %v2070_v38  ;;  %v1086_v48 = vpop.f32.mrf.mxu1 }
 0x25a   :  { %v2539_v49 = vpop.eup %2538  ;;  %2564 = vrcp.f32 %v1442_v43  ;;  %v1443_v52 = vadd.f32 1.0, %v2537_v46  ;;  %v2072_v53 = vmul.f32 -1.442695, %v1085_v45  ;;  %v1087_v0 = vadd.f32 %v1086_v48, %v2975_v51 }
 0x25b   :  { %v2541_v54 = vpop.eup %2540  ;;  %1881 = vst [vmem:[#allocation8 + $0x40] sm:$0xff] %v2160_v47  ;;  %2566 = vpow2.f32 %v2071_v44  ;;  %v1090_v55 = vpop.f32.mrf.mxu1 }
 0x25c   :  { %v2543_v56 = vpop.eup %2542  ;;  %2568 = vrcp.f32 %v1443_v52  ;;  %v1444_v57 = vadd.f32 1.0, %v2541_v54  ;;  %v2073_v58 = vmul.f32 -1.442695, %v1087_v0  ;;  %v1091_v59 = vadd.f32 %v1090_v55, %v2973_v50 }
 0x25d   :  { %v2545_v60 = vpop.eup %2544  ;;  %v2161_v61 = vpack.c.bf16 %v2543_v56, %v2539_v49  ;;  %2570 = vpow2.f32 %v2072_v53  ;;  %v1092_v62 = vpop.f32.mrf.mxu1 }
 0x25e   :  { %v2547_v63 = vpop.eup %2546  ;;  %2572 = vrcp.f32 %v1444_v57  ;;  %v1445_v1 = vadd.f32 1.0, %v2545_v60  ;;  %v2074_v2 = vmul.f32 -1.442695, %v1091_v59  ;;  %v1093_v3 = vadd.f32 %v1092_v62, %v2975_v51 }
 0x25f   :  { %v2549_v4 = vpop.eup %2548  ;;  %1882 = vst [vmem:[#allocation8 + $0x48] sm:$0xff] %v2161_v61  ;;  %2574 = vpow2.f32 %v2073_v58  ;;  %v1094_v5 = vpop.f32.mrf.mxu1 }
 0x260   :  { %v2551_v6 = vpop.eup %2550  ;;  %2576 = vrcp.f32 %v1445_v1  ;;  %v1446_v7 = vadd.f32 1.0, %v2549_v4  ;;  %v2075_v9 = vmul.f32 -1.442695, %v1093_v3  ;;  %v1095_v10 = vadd.f32 %v1094_v5, %v2973_v50 }
 0x261   :  { %v2553_v11 = vpop.eup %2552  ;;  %v2162_v12 = vpack.c.bf16 %v2551_v6, %v2547_v63  ;;  %2578 = vpow2.f32 %v2074_v2  ;;  %v1096_v13 = vpop.f32.mrf.mxu1 }
 0x262   :  { %v2555_v14 = vpop.eup %2554  ;;  %2580 = vrcp.f32 %v1446_v7  ;;  %v1447_v15 = vadd.f32 1.0, %v2553_v11  ;;  %v2076_v16 = vmul.f32 -1.442695, %v1095_v10  ;;  %v1097_v17 = vadd.f32 %v1096_v13, %v2975_v51 }
 0x263   :  { %v2557_v18 = vpop.eup %2556  ;;  %1883 = vst [vmem:[#allocation8 + $0x50] sm:$0xff] %v2162_v12  ;;  %2582 = vpow2.f32 %v2075_v9  ;;  %v1100_v19 = vpop.f32.mrf.mxu1 }
 0x264   :  { %v2559_v20 = vpop.eup %2558  ;;  %2584 = vrcp.f32 %v1447_v15  ;;  %v1448_v21 = vadd.f32 1.0, %v2557_v18  ;;  %v2077_v22 = vmul.f32 -1.442695, %v1097_v17  ;;  %v1101_v23 = vadd.f32 %v1100_v19, %v2973_v50 }
 0x265   :  { %v2561_v24 = vpop.eup %2560  ;;  %v2163_v25 = vpack.c.bf16 %v2559_v20, %v2555_v14  ;;  %2586 = vpow2.f32 %v2076_v16  ;;  %v1102_v26 = vpop.f32.mrf.mxu1 }
 0x266   :  { %v2563_v27 = vpop.eup %2562  ;;  %2588 = vrcp.f32 %v1448_v21  ;;  %v2078_v28 = vmul.f32 -1.442695, %v1101_v23  ;;  %v1103_v29 = vadd.f32 %v1102_v26, %v2975_v51 }
 0x267   :  { %v2565_v30 = vpop.eup %2564  ;;  %1884 = vst [vmem:[#allocation8 + $0x58] sm:$0xff] %v2163_v25  ;;  %v1449_v31 = vadd.f32 1.0, %v2563_v27  ;;  %2590 = vpow2.f32 %v2077_v22  ;;  %v1104_v8 = vpop.f32.mrf.mxu1 }
 0x268   :  { %v2567_v32 = vpop.eup %2566  ;;  %v2164_v33 = vpack.c.bf16 %v2565_v30, %v2561_v24  ;;  %2592 = vpow2.f32 %v2078_v28  ;;  %v2079_v34 = vmul.f32 -1.442695, %v1103_v29  ;;  %v1105_v35 = vadd.f32 %v1104_v8, %v2973_v50 }
 0x269   :  { %v2569_v36 = vpop.eup %2568  ;;  %2594 = vrcp.f32 %v1449_v31  ;;  %v1450_v37 = vadd.f32 1.0, %v2567_v32  ;;  %v1106_v38 = vpop.f32.mrf.mxu1 }
 0x26a   :  { %v2571_v39 = vpop.eup %2570  ;;  %1885 = vst [vmem:[#allocation8 + $0x60] sm:$0xff] %v2164_v33  ;;  %2596 = vpow2.f32 %v2079_v34  ;;  %v2080_v40 = vmul.f32 -1.442695, %v1105_v35  ;;  %v1107_v41 = vadd.f32 %v1106_v38, %v2975_v51 }
 0x26b   :  { %v2573_v42 = vpop.eup %2572  ;;  %2598 = vrcp.f32 %v1450_v37  ;;  %v1451_v43 = vadd.f32 1.0, %v2571_v39  ;;  %v1110_v44 = vpop.f32.mrf.mxu1 }
 0x26c   :  { %v2575_v45 = vpop.eup %2574  ;;  %v2165_v46 = vpack.c.bf16 %v2573_v42, %v2569_v36  ;;  %2600 = vpow2.f32 %v2080_v40  ;;  %v2081_v47 = vmul.f32 -1.442695, %v1107_v41  ;;  %v1111_v48 = vadd.f32 %v1110_v44, %v2973_v50 }
 0x26d   :  { %v2577_v49 = vpop.eup %2576  ;;  %2602 = vrcp.f32 %v1451_v43  ;;  %v1452_v52 = vadd.f32 1.0, %v2575_v45  ;;  %v1112_v53 = vpop.f32.mrf.mxu1 }
 0x26e   :  { %v2579_v0 = vpop.eup %2578  ;;  %1886 = vst [vmem:[#allocation8 + $0x68] sm:$0xff] %v2165_v46  ;;  %2604 = vpow2.f32 %v2081_v47  ;;  %v2082_v54 = vmul.f32 -1.442695, %v1111_v48  ;;  %v1113_v55 = vadd.f32 %v1112_v53, %v2975_v51 }
 0x26f   :  { %v2581_v56 = vpop.eup %2580  ;;  %2606 = vrcp.f32 %v1452_v52  ;;  %v1453_v57 = vadd.f32 1.0, %v2579_v0  ;;  %v1114_v58 = vpop.f32.mrf.mxu1 }
 0x270   :  { %v2583_v59 = vpop.eup %2582  ;;  %v2166_v60 = vpack.c.bf16 %v2581_v56, %v2577_v49  ;;  %2608 = vpow2.f32 %v2082_v54  ;;  %v2083_v61 = vmul.f32 -1.442695, %v1113_v55  ;;  %v1115_v62 = vadd.f32 %v1114_v58, %v2973_v50 }
 0x271   :  { %v2585_v63 = vpop.eup %2584  ;;  %2610 = vrcp.f32 %v1453_v57  ;;  %v1454_v1 = vadd.f32 1.0, %v2583_v59  ;;  %v1116_v2 = vpop.f32.mrf.mxu1 }
 0x272   :  { %v2587_v3 = vpop.eup %2586  ;;  %1887 = vst [vmem:[#allocation8 + $0x70] sm:$0xff] %v2166_v60  ;;  %2612 = vpow2.f32 %v2083_v61  ;;  %v2084_v4 = vmul.f32 -1.442695, %v1115_v62  ;;  %v1117_v5 = vadd.f32 %v1116_v2, %v2975_v51 }
 0x273   :  { %v2589_v6 = vpop.eup %2588  ;;  %2614 = vrcp.f32 %v1454_v1  ;;  %v1455_v7 = vadd.f32 1.0, %v2587_v3  ;;  %v1120_v9 = vpop.f32.mrf.mxu1 }
 0x274   :  { %v2591_v10 = vpop.eup %2590  ;;  %v2167_v11 = vpack.c.bf16 %v2589_v6, %v2585_v63  ;;  %2616 = vpow2.f32 %v2084_v4  ;;  %v2085_v12 = vmul.f32 -1.442695, %v1117_v5  ;;  %v1121_v13 = vadd.f32 %v1120_v9, %v2973_v50 }
 0x275   :  { %v2593_v14 = vpop.eup %2592  ;;  %2618 = vrcp.f32 %v1455_v7  ;;  %v1456_v15 = vadd.f32 1.0, %v2591_v10  ;;  %v1122_v16 = vpop.f32.mrf.mxu1 }
 0x276   :  { %v2595_v17 = vpop.eup %2594  ;;  %1888 = vst [vmem:[#allocation8 + $0x78] sm:$0xff] %v2167_v11  ;;  %v1457_v18 = vadd.f32 1.0, %v2593_v14  ;;  %2620 = vpow2.f32 %v2085_v12  ;;  %v2086_v19 = vmul.f32 -1.442695, %v1121_v13  ;;  %v1123_v20 = vadd.f32 %v1122_v16, %v2975_v51 }
 0x277   :  { %v2597_v21 = vpop.eup %2596  ;;  %2622 = vrcp.f32 %v1456_v15  ;;  %v1124_v22 = vpop.f32.mrf.mxu1 }
 0x278   :  { %v2599_v23 = vpop.eup %2598  ;;  %2624 = vrcp.f32 %v1457_v18  ;;  %v1458_v24 = vadd.f32 1.0, %v2597_v21  ;;  %v2087_v25 = vmul.f32 -1.442695, %v1123_v20  ;;  %v1125_v26 = vadd.f32 %v1124_v22, %v2973_v50 }
 0x279   :  { %v2601_v27 = vpop.eup %2600  ;;  %v2168_v28 = vpack.c.bf16 %v2599_v23, %v2595_v17  ;;  %2626 = vpow2.f32 %v2086_v19  ;;  %v1126_v29 = vpop.f32.mrf.mxu1 }
 0x27a   :  { %v2603_v30 = vpop.eup %2602  ;;  %2628 = vrcp.f32 %v1458_v24  ;;  %v1459_v31 = vadd.f32 1.0, %v2601_v27  ;;  %v2088_v8 = vmul.f32 -1.442695, %v1125_v26  ;;  %v1127_v32 = vadd.f32 %v1126_v29, %v2975_v51 }
 0x27b   :  { %v2605_v33 = vpop.eup %2604  ;;  %1889 = vst [vmem:[#allocation8 + $0x80] sm:$0xff] %v2168_v28  ;;  %2630 = vpow2.f32 %v2087_v25  ;;  %v1130_v34 = vpop.f32.mrf.mxu1 }
 0x27c   :  { %v2607_v35 = vpop.eup %2606  ;;  %2632 = vrcp.f32 %v1459_v31  ;;  %v1460_v36 = vadd.f32 1.0, %v2605_v33  ;;  %v2089_v37 = vmul.f32 -1.442695, %v1127_v32  ;;  %v1131_v38 = vadd.f32 %v1130_v34, %v2973_v50 }
 0x27d   :  { %v2609_v39 = vpop.eup %2608  ;;  %v2169_v40 = vpack.c.bf16 %v2607_v35, %v2603_v30  ;;  %2634 = vpow2.f32 %v2088_v8  ;;  %v1132_v41 = vpop.f32.mrf.mxu1 }
 0x27e   :  { %v2611_v42 = vpop.eup %2610  ;;  %2636 = vrcp.f32 %v1460_v36  ;;  %v1461_v43 = vadd.f32 1.0, %v2609_v39  ;;  %v2090_v44 = vmul.f32 -1.442695, %v1131_v38  ;;  %v1133_v45 = vadd.f32 %v1132_v41, %v2975_v51 }
 0x27f   :  { %v2613_v46 = vpop.eup %2612  ;;  %1890 = vst [vmem:[#allocation8 + $0x88] sm:$0xff] %v2169_v40  ;;  %2638 = vpow2.f32 %v2089_v37  ;;  %v1134_v47 = vpop.f32.mrf.mxu1 }
 0x280   :  { %v2615_v48 = vpop.eup %2614  ;;  %2640 = vrcp.f32 %v1461_v43  ;;  %v1462_v49 = vadd.f32 1.0, %v2613_v46  ;;  %v2091_v52 = vmul.f32 -1.442695, %v1133_v45  ;;  %v1135_v53 = vadd.f32 %v1134_v47, %v2973_v50 }
 0x281   :  { %v2617_v0 = vpop.eup %2616  ;;  %v2170_v54 = vpack.c.bf16 %v2615_v48, %v2611_v42  ;;  %2642 = vpow2.f32 %v2090_v44  ;;  %v1136_v55 = vpop.f32.mrf.mxu1 }
 0x282   :  { %v2619_v56 = vpop.eup %2618  ;;  %2644 = vrcp.f32 %v1462_v49  ;;  %v1463_v57 = vadd.f32 1.0, %v2617_v0  ;;  %v2092_v58 = vmul.f32 -1.442695, %v1135_v53  ;;  %v1137_v59 = vadd.f32 %v1136_v55, %v2975_v51 }
 0x283   :  { %v2621_v60 = vpop.eup %2620  ;;  %1891 = vst [vmem:[#allocation8 + $0x90] sm:$0xff] %v2170_v54  ;;  %2646 = vpow2.f32 %v2091_v52  ;;  %v1140_v61 = vpop.f32.mrf.mxu1 }
 0x284   :  { %v2623_v62 = vpop.eup %2622  ;;  %2648 = vrcp.f32 %v1463_v57  ;;  %v1464_v63 = vadd.f32 1.0, %v2621_v60  ;;  %v2093_v1 = vmul.f32 -1.442695, %v1137_v59  ;;  %v1141_v2 = vadd.f32 %v1140_v61, %v2973_v50 }
 0x285   :  { %v2625_v3 = vpop.eup %2624  ;;  %v2171_v4 = vpack.c.bf16 %v2623_v62, %v2619_v56  ;;  %2650 = vpow2.f32 %v2092_v58  ;;  %v1142_v5 = vpop.f32.mrf.mxu1 }
 0x286   :  { %v2627_v6 = vpop.eup %2626  ;;  %2652 = vrcp.f32 %v1464_v63  ;;  %v2094_v7 = vmul.f32 -1.442695, %v1141_v2  ;;  %v1143_v9 = vadd.f32 %v1142_v5, %v2975_v51 }
 0x287   :  { %v2629_v10 = vpop.eup %2628  ;;  %1892 = vst [vmem:[#allocation8 + $0x98] sm:$0xff] %v2171_v4  ;;  %v1465_v11 = vadd.f32 1.0, %v2627_v6  ;;  %2654 = vpow2.f32 %v2093_v1  ;;  %v1144_v12 = vpop.f32.mrf.mxu1 }
 0x288   :  { %v2631_v13 = vpop.eup %2630  ;;  %v2172_v14 = vpack.c.bf16 %v2629_v10, %v2625_v3  ;;  %2656 = vpow2.f32 %v2094_v7  ;;  %v2095_v15 = vmul.f32 -1.442695, %v1143_v9  ;;  %v1145_v16 = vadd.f32 %v1144_v12, %v2973_v50 }
 0x289   :  { %v2633_v17 = vpop.eup %2632  ;;  %2658 = vrcp.f32 %v1465_v11  ;;  %v1466_v18 = vadd.f32 1.0, %v2631_v13  ;;  %v1146_v19 = vpop.f32.mrf.mxu1 }
 0x28a   :  { %v2635_v20 = vpop.eup %2634  ;;  %1893 = vst [vmem:[#allocation8 + $0xa0] sm:$0xff] %v2172_v14  ;;  %2660 = vpow2.f32 %v2095_v15  ;;  %v2096_v21 = vmul.f32 -1.442695, %v1145_v16  ;;  %v1147_v22 = vadd.f32 %v1146_v19, %v2975_v51 }
 0x28b   :  { %v2637_v23 = vpop.eup %2636  ;;  %2662 = vrcp.f32 %v1466_v18  ;;  %v1467_v24 = vadd.f32 1.0, %v2635_v20  ;;  %v1150_v25 = vpop.f32.mrf.mxu1 }
 0x28c   :  { %v2639_v26 = vpop.eup %2638  ;;  %v2173_v27 = vpack.c.bf16 %v2637_v23, %v2633_v17  ;;  %2664 = vpow2.f32 %v2096_v21  ;;  %v2097_v28 = vmul.f32 -1.442695, %v1147_v22  ;;  %v1151_v29 = vadd.f32 %v1150_v25, %v2973_v50 }
 0x28d   :  { %v2641_v30 = vpop.eup %2640  ;;  %2666 = vrcp.f32 %v1467_v24  ;;  %v1468_v31 = vadd.f32 1.0, %v2639_v26  ;;  %v1152_v8 = vpop.f32.mrf.mxu1 }
 0x28e   :  { %v2643_v32 = vpop.eup %2642  ;;  %1894 = vst [vmem:[#allocation8 + $0xa8] sm:$0xff] %v2173_v27  ;;  %2668 = vpow2.f32 %v2097_v28  ;;  %v2098_v33 = vmul.f32 -1.442695, %v1151_v29  ;;  %v1153_v34 = vadd.f32 %v1152_v8, %v2975_v51 }
 0x28f   :  { %v2645_v35 = vpop.eup %2644  ;;  %2670 = vrcp.f32 %v1468_v31  ;;  %v1469_v36 = vadd.f32 1.0, %v2643_v32  ;;  %v1154_v37 = vpop.f32.mrf.mxu1 }
 0x290   :  { %v2647_v38 = vpop.eup %2646  ;;  %v2174_v39 = vpack.c.bf16 %v2645_v35, %v2641_v30  ;;  %2672 = vpow2.f32 %v2098_v33  ;;  %v2099_v40 = vmul.f32 -1.442695, %v1153_v34  ;;  %v1155_v41 = vadd.f32 %v1154_v37, %v2973_v50 }
 0x291   :  { %v2649_v42 = vpop.eup %2648  ;;  %2674 = vrcp.f32 %v1469_v36  ;;  %v1470_v43 = vadd.f32 1.0, %v2647_v38  ;;  %v1156_v44 = vpop.f32.mrf.mxu1 }
 0x292   :  { %v2651_v45 = vpop.eup %2650  ;;  %1895 = vst [vmem:[#allocation8 + $0xb0] sm:$0xff] %v2174_v39  ;;  %2676 = vpow2.f32 %v2099_v40  ;;  %v2100_v46 = vmul.f32 -1.442695, %v1155_v41  ;;  %v1157_v47 = vadd.f32 %v1156_v44, %v2975_v51 }
 0x293   :  { %v2653_v48 = vpop.eup %2652  ;;  %2678 = vrcp.f32 %v1470_v43  ;;  %v1471_v49 = vadd.f32 1.0, %v2651_v45  ;;  %v1160_v52 = vpop.f32.mrf.mxu1 }
 0x294   :  { %v2655_v53 = vpop.eup %2654  ;;  %v2175_v0 = vpack.c.bf16 %v2653_v48, %v2649_v42  ;;  %2680 = vpow2.f32 %v2100_v46  ;;  %v2101_v54 = vmul.f32 -1.442695, %v1157_v47  ;;  %v1161_v55 = vadd.f32 %v1160_v52, %v2973_v50 }
 0x295   :  { %v2657_v56 = vpop.eup %2656  ;;  %2682 = vrcp.f32 %v1471_v49  ;;  %v1472_v57 = vadd.f32 1.0, %v2655_v53  ;;  %v1162_v58 = vpop.f32.mrf.mxu1 }
 0x296   :  { %v2659_v59 = vpop.eup %2658  ;;  %1896 = vst [vmem:[#allocation8 + $0xb8] sm:$0xff] %v2175_v0  ;;  %v1473_v60 = vadd.f32 1.0, %v2657_v56  ;;  %2684 = vpow2.f32 %v2101_v54  ;;  %v2102_v61 = vmul.f32 -1.442695, %v1161_v55  ;;  %v1163_v62 = vadd.f32 %v1162_v58, %v2975_v51 }
 0x297   :  { %v2661_v63 = vpop.eup %2660  ;;  %2686 = vrcp.f32 %v1472_v57  ;;  %v1164_v1 = vpop.f32.mrf.mxu1 }
 0x298   :  { %v2663_v2 = vpop.eup %2662  ;;  %2688 = vrcp.f32 %v1473_v60  ;;  %v1474_v3 = vadd.f32 1.0, %v2661_v63  ;;  %v2103_v4 = vmul.f32 -1.442695, %v1163_v62  ;;  %v1165_v5 = vadd.f32 %v1164_v1, %v2973_v50 }
 0x299   :  { %v2665_v6 = vpop.eup %2664  ;;  %v2176_v7 = vpack.c.bf16 %v2663_v2, %v2659_v59  ;;  %2690 = vpow2.f32 %v2102_v61  ;;  %v1166_v9 = vpop.f32.mrf.mxu1 }
 0x29a   :  { %v2667_v10 = vpop.eup %2666  ;;  %2692 = vrcp.f32 %v1474_v3  ;;  %v1475_v11 = vadd.f32 1.0, %v2665_v6  ;;  %v2104_v12 = vmul.f32 -1.442695, %v1165_v5  ;;  %v1167_v13 = vadd.f32 %v1166_v9, %v2975_v51 }
 0x29b   :  { %v2669_v14 = vpop.eup %2668  ;;  %1897 = vst [vmem:[#allocation8 + $0xc0] sm:$0xff] %v2176_v7  ;;  %2694 = vpow2.f32 %v2103_v4  ;;  %v1170_v15 = vpop.f32.mrf.mxu1 }
 0x29c   :  { %v2671_v16 = vpop.eup %2670  ;;  %2696 = vrcp.f32 %v1475_v11  ;;  %v1476_v17 = vadd.f32 1.0, %v2669_v14  ;;  %v2105_v18 = vmul.f32 -1.442695, %v1167_v13  ;;  %v1171_v19 = vadd.f32 %v1170_v15, %v2973_v50 }
 0x29d   :  { %v2673_v20 = vpop.eup %2672  ;;  %v2177_v21 = vpack.c.bf16 %v2671_v16, %v2667_v10  ;;  %2698 = vpow2.f32 %v2104_v12  ;;  %v1172_v22 = vpop.f32.mrf.mxu1 }
 0x29e   :  { %v2675_v23 = vpop.eup %2674  ;;  %2700 = vrcp.f32 %v1476_v17  ;;  %v1477_v24 = vadd.f32 1.0, %v2673_v20  ;;  %v2106_v25 = vmul.f32 -1.442695, %v1171_v19  ;;  %v1173_v26 = vadd.f32 %v1172_v22, %v2975_v51 }
 0x29f   :  { %v2677_v27 = vpop.eup %2676  ;;  %1898 = vst [vmem:[#allocation8 + $0xc8] sm:$0xff] %v2177_v21  ;;  %2702 = vpow2.f32 %v2105_v18  ;;  %v1174_v28 = vpop.f32.mrf.mxu1 }
 0x2a0   :  { %v2679_v29 = vpop.eup %2678  ;;  %2704 = vrcp.f32 %v1477_v24  ;;  %v1478_v30 = vadd.f32 1.0, %v2677_v27  ;;  %v2107_v31 = vmul.f32 -1.442695, %v1173_v26  ;;  %v1175_v8 = vadd.f32 %v1174_v28, %v2973_v50 }
 0x2a1   :  { %v2681_v32 = vpop.eup %2680  ;;  %v2178_v33 = vpack.c.bf16 %v2679_v29, %v2675_v23  ;;  %2706 = vpow2.f32 %v2106_v25  ;;  %v1176_v34 = vpop.f32.mrf.mxu1 }
 0x2a2   :  { %v2683_v35 = vpop.eup %2682  ;;  %2708 = vrcp.f32 %v1478_v30  ;;  %v1479_v36 = vadd.f32 1.0, %v2681_v32  ;;  %v2108_v37 = vmul.f32 -1.442695, %v1175_v8  ;;  %v1177_v38 = vadd.f32 %v1176_v34, %v2975_v51 }
 0x2a3   :  { %v2685_v39 = vpop.eup %2684  ;;  %1899 = vst [vmem:[#allocation8 + $0xd0] sm:$0xff] %v2178_v33  ;;  %2710 = vpow2.f32 %v2107_v31  ;;  %v1180_v40 = vpop.f32.mrf.mxu1 }
 0x2a4   :  { %v2687_v41 = vpop.eup %2686  ;;  %2712 = vrcp.f32 %v1479_v36  ;;  %v1480_v42 = vadd.f32 1.0, %v2685_v39  ;;  %v2109_v43 = vmul.f32 -1.442695, %v1177_v38  ;;  %v1181_v44 = vadd.f32 %v1180_v40, %v2973_v50 }
 0x2a5   :  { %v2689_v45 = vpop.eup %2688  ;;  %v2179_v46 = vpack.c.bf16 %v2687_v41, %v2683_v35  ;;  %2714 = vpow2.f32 %v2108_v37  ;;  %v1182_v47 = vpop.f32.mrf.mxu1 }
 0x2a6   :  { %v2691_v48 = vpop.eup %2690  ;;  %2716 = vrcp.f32 %v1480_v42  ;;  %v2110_v49 = vmul.f32 -1.442695, %v1181_v44  ;;  %v1183_v52 = vadd.f32 %v1182_v47, %v2975_v51 }
 0x2a7   :  { %v2693_v53 = vpop.eup %2692  ;;  %1900 = vst [vmem:[#allocation8 + $0xd8] sm:$0xff] %v2179_v46  ;;  %v1481_v0 = vadd.f32 1.0, %v2691_v48  ;;  %2718 = vpow2.f32 %v2109_v43  ;;  %v1184_v54 = vpop.f32.mrf.mxu1 }
 0x2a8   :  { %v2695_v55 = vpop.eup %2694  ;;  %v2180_v56 = vpack.c.bf16 %v2693_v53, %v2689_v45  ;;  %2720 = vpow2.f32 %v2110_v49  ;;  %v2111_v57 = vmul.f32 -1.442695, %v1183_v52  ;;  %v1185_v58 = vadd.f32 %v1184_v54, %v2973_v50 }
 0x2a9   :  { %v2697_v59 = vpop.eup %2696  ;;  %2722 = vrcp.f32 %v1481_v0  ;;  %v1482_v60 = vadd.f32 1.0, %v2695_v55  ;;  %v1186_v61 = vpop.f32.mrf.mxu1 }
 0x2aa   :  { %v2699_v62 = vpop.eup %2698  ;;  %1901 = vst [vmem:[#allocation8 + $0xe0] sm:$0xff] %v2180_v56  ;;  %2724 = vpow2.f32 %v2111_v57  ;;  %v2112_v63 = vmul.f32 -1.442695, %v1185_v58  ;;  %v1187_v1 = vadd.f32 %v1186_v61, %v2975_v51 }
 0x2ab   :  { %v2701_v2 = vpop.eup %2700  ;;  %2726 = vrcp.f32 %v1482_v60  ;;  %v1483_v3 = vadd.f32 1.0, %v2699_v62 }
 0x2ac   :  { %v2703_v4 = vpop.eup %2702  ;;  %v2181_v5 = vpack.c.bf16 %v2701_v2, %v2697_v59  ;;  %2728 = vpow2.f32 %v2112_v63  ;;  %v2113_v6 = vmul.f32 -1.442695, %v1187_v1 }
 0x2ad   :  { %v2705_v7 = vpop.eup %2704  ;;  %2730 = vrcp.f32 %v1483_v3  ;;  %v1484_v50 = vadd.f32 1.0, %v2703_v4 }
 0x2ae   :  { %v2707_v9 = vpop.eup %2706  ;;  %1902 = vst [vmem:[#allocation8 + $0xe8] sm:$0xff] %v2181_v5  ;;  %2732 = vpow2.f32 %v2113_v6 }
 0x2af   :  { %v2709_v10 = vpop.eup %2708  ;;  %2734 = vrcp.f32 %v1484_v50  ;;  %v1485_v11 = vadd.f32 1.0, %v2707_v9 }
 0x2b0   :  { %v2711_v12 = vpop.eup %2710  ;;  %v2182_v13 = vpack.c.bf16 %v2709_v10, %v2705_v7 }
 0x2b1   :  { %v2713_v14 = vpop.eup %2712  ;;  %v1486_v51 = vadd.f32 1.0, %v2711_v12  ;;  %2736 = vrcp.f32 %v1485_v11 }
 0x2b2   :  { %v2715_v15 = vpop.eup %2714  ;;  %1903 = vst [vmem:[#allocation8 + $0xf0] sm:$0xff] %v2182_v13 }
 0x2b3   :  { %v2717_v16 = vpop.eup %2716  ;;  %2738 = vrcp.f32 %v1486_v51  ;;  %v1487_v17 = vadd.f32 1.0, %v2715_v15 }
 0x2b4   :  { %v2719_v18 = vpop.eup %2718  ;;  %v2183_v19 = vpack.c.bf16 %v2717_v16, %v2713_v14 }
 0x2b5   :  { %v2721_v20 = vpop.eup %2720  ;;  %v1488_v21 = vadd.f32 1.0, %v2719_v18  ;;  %2740 = vrcp.f32 %v1487_v17 }
 0x2b6   :  { %v2723_v22 = vpop.eup %2722  ;;  %1904 = vst [vmem:[#allocation8 + $0xf8] sm:$0xff] %v2183_v19  ;;  %v1489_v23 = vadd.f32 1.0, %v2721_v20 }
 0x2b7   :  { %v2725_v24 = vpop.eup %2724  ;;  %2742 = vrcp.f32 %v1488_v21 }
 0x2b8   :  { %v2727_v25 = vpop.eup %2726  ;;  %v1490_v26 = vadd.f32 1.0, %v2725_v24  ;;  %2744 = vrcp.f32 %v1489_v23 }
 0x2b9   :  { %v2729_v27 = vpop.eup %2728  ;;  %v2184_v28 = vpack.c.bf16 %v2727_v25, %v2723_v22 }
 0x2ba   :  { %v2731_v29 = vpop.eup %2730  ;;  %2746 = vrcp.f32 %v1490_v26  ;;  %v1491_v30 = vadd.f32 1.0, %v2729_v27 }
 0x2bb   :  { %v2733_v31 = vpop.eup %2732  ;;  %1905 = vst [vmem:[#allocation8 + $0x100] sm:$0xff] %v2184_v28 }
 0x2bc   :  { %v2735_v8 = vpop.eup %2734  ;;  %v1492_v32 = vadd.f32 1.0, %v2733_v31  ;;  %2748 = vrcp.f32 %v1491_v30 }
 0x2bd   :  { %v2185_v33 = vpack.c.bf16 %v2735_v8, %v2731_v29 }
 0x2be   :  { %2750 = vrcp.f32 %v1492_v32  ;;  %v2737_v34 = vpop.eup %2736 }
 0x2bf   :  { %1906 = vst [vmem:[#allocation8 + $0x108] sm:$0xff] %v2185_v33 }
 0x2c0   :  { %v2739_v35 = vpop.eup %2738 }
 0x2c1   :  { %v2186_v36 = vpack.c.bf16 %v2739_v35, %v2737_v34 }
 0x2c2   :  { %v2741_v37 = vpop.eup %2740 }
 0x2c3   :  { %1907 = vst [vmem:[#allocation8 + $0x110] sm:$0xff] %v2186_v36 }
 0x2c4   :  { %v2743_v38 = vpop.eup %2742 }
 0x2c5   :  { %v2187_v39 = vpack.c.bf16 %v2743_v38, %v2741_v37  ;;  %v2745_v40 = vpop.eup %2744 }
 0x2c7   :  { %v2747_v41 = vpop.eup %2746  ;;  %1908 = vst [vmem:[#allocation8 + $0x118] sm:$0xff] %v2187_v39 }
 0x2c8   :  { %v2188_v42 = vpack.c.bf16 %v2747_v41, %v2745_v40 }
 0x2c9   :  { %v2749_v43 = vpop.eup %2748 }
 0x2ca   :  { %1909 = vst [vmem:[#allocation8 + $0x120] sm:$0xff] %v2188_v42 }
 0x2cb   :  { %v2751_v44 = vpop.eup %2750 }
 0x2cc   :  { %v2189_v45 = vpack.c.bf16 %v2751_v44, %v2749_v43 }
 0x2ce   :  { %1910 = vst [vmem:[#allocation8 + $0x128] sm:$0xff] %v2189_v45 }
 0x2cf   :  { %2823 = shalt.err (!%p2820_p5)
}
 0x2d0   :  { %1922 = dma.vmem_to_hbm [thread:$0]  %s1917_s12, 4864, %s3064_s5, [#allocation4], %s2842_s28, %s2842_s28, %s2843_s29  }
 0x2d1   :  { %2836 = dma.done.wait [#allocation4], 4864  }
 0x2d2   :  { %2837 = vsyncadd [#allocation4], 4294962432 }
 0x2d3   :  { %1926 = vsyncpa [#allocation3], 1 }
 0x2d4   :  { %1927 = vsyncpa [#allocation6], 1 }
 0x2d5   :  { %1928 = vsyncpa [#allocation4], 1 }

// kernel: tpu_custom_call.1
= control target key start
LH: loop header
LB: loop body
LE: loop exit
PB: predicated region body
PF: predicated region fallthrough
CT: control target
= control target key end

     0   :  { %10 = vsyncpa [#allocation3], 0  ;;  %s3059_s0 = inlined_call_operand.hbm [shape: bf16[300,256], index: 0, kind: input, shape index: {}]   ;;  %s3060_s1 = inlined_call_operand.hbm [shape: bf16[256,128], index: 1, kind: input, shape index: {}]   ;;  %s3061_s2 = inlined_call_operand.vmem [shape: f32[1,128], index: 2, kind: input, shape index: {}]   ;;  %s3062_s3 = inlined_call_operand.hbm [shape: bf16[128,256], index: 3, kind: input, shape index: {}]   ;;  %s3063_s4 = inlined_call_operand.vmem [shape: f32[1,256], index: 4, kind: input, shape index: {}]   ;;  %s3064_s5 = inlined_call_operand.hbm [shape: bf16[300,256], index: 5, kind: output, shape index: {}]  }
   0x1   :  { %11 = vsyncpa [#allocation6], 0 }
   0x2   :  { %12 = vsyncpa [#allocation4], 0  ;;  %s2838_s18 = smov [#allocation5]  }
   0x3   :  { %s30_s19 = sshll.u32 %s2838_s18, 4  ;;  %s31_s19 = int_to_ptr.vmem [resolvable:$true] %s30_s19 }
   0x4   :  { %s2760_s20 = scalar_lea.vmem %s31_s19, 2048  ;;  %p2765_p1 = scmp.lt.s32.totalorder %s31_s19, %s31_s19 }
   0x5   :  { %p2761_p0 = scmp.ne.s32.totalorder %s31_s19, %s2760_s20  ;;  %p2766_p2 = scmp.lt.s32.totalorder %s2760_s20, %s2760_s20 }
   0x7   :  { %p2767_p3 = por %p2766_p2, %p2765_p1 }
   0x9   :  { %p2768_p4 = pnand %p2767_p3, %p2761_p0 }
   0xb   :  { %2771 = shalt.err (!%p2768_p4)
}
   0xc   :  { %s2839_s21 = smov 64   ;;  %s2840_s22 = smov 4  }
   0xd   :  { %36 = dma.hbm_to_vmem [thread:$0]  %s3060_s1, 2048, %s31_s19, [#allocation6], %s2839_s21, %s2839_s21, %s2840_s22  }
   0xe   :  { %s2841_s25 = smov [#allocation2]  }
   0xf   :  { %s18_s26 = sshll.u32 %s2841_s25, 4  ;;  %s19_s26 = int_to_ptr.vmem [resolvable:$true] %s18_s26 }
  0x10   :  { %s2780_s27 = scalar_lea.vmem %s19_s26, 4864  ;;  %p2785_p6 = scmp.lt.s32.totalorder %s19_s26, %s19_s26 }
  0x11   :  { %p2781_p5 = scmp.ne.s32.totalorder %s19_s26, %s2780_s27  ;;  %p2786_p7 = scmp.lt.s32.totalorder %s2780_s27, %s2780_s27 }
  0x13   :  { %p2787_p8 = por %p2786_p7, %p2785_p6 }
  0x15   :  { %p2788_p9 = pnand %p2787_p8, %p2781_p5 }
  0x17   :  { %2791 = shalt.err (!%p2788_p9)
}
  0x18   :  { %s2842_s28 = smov 128   ;;  %s2843_s29 = smov 8  }
  0x19   :  { %24 = dma.hbm_to_vmem [thread:$0]  %s3059_s0, 4864, %s19_s26, [#allocation3], %s2842_s28, %s2842_s28, %s2843_s29  }
  0x1a   :  { %s2844_s1 = smov [#allocation7]  }
  0x1b   :  { %s44_s7 = sshll.u32 %s2844_s1, 4  ;;  %s45_s7 = int_to_ptr.vmem [resolvable:$true] %s44_s7 }
  0x1c   :  { %s2800_s8 = scalar_lea.vmem %s45_s7, 2048  ;;  %p2805_p11 = scmp.lt.s32.totalorder %s45_s7, %s45_s7 }
  0x1d   :  { %p2801_p10 = scmp.ne.s32.totalorder %s45_s7, %s2800_s8  ;;  %p2806_p12 = scmp.lt.s32.totalorder %s2800_s8, %s2800_s8 }
  0x1f   :  { %p2807_p13 = por %p2806_p12, %p2805_p11 }
  0x21   :  { %p2808_p0 = pnand %p2807_p13, %p2801_p10 }
  0x23   :  { %2811 = shalt.err (!%p2808_p0)
}
  0x24   :  { %50 = dma.hbm_to_vmem [thread:$0]  %s3062_s3, 2048, %s45_s7, [#allocation6], %s2842_s28, %s2842_s28, %s2843_s29  }
  0x25   :  { %2832 = dma.done.wait [#allocation3], 4864  }
  0x26   :  { %2833 = vsyncadd [#allocation3], 4294962432 }
  0x27   :  { %2834 = dma.done.wait [#allocation6], 4096  }
  0x28   :  { %2835 = vsyncadd [#allocation6], 4294963200  ;;  %v2845_v0 = vmov 0   ;;  %v2199_v1 = vld [vmem:[#allocation5 + $0x38] sm:$0xff]   ;;  %v2200_v2 = vld [vmem:[#allocation5 + $0x30] sm:$0xff]  }
  0x29   :  { %426 = vmatprep.subr.bf16.mxu0 %v2845_v0  ;;  %998 = vmatprep.mubr.bf16.mxu1 %v2845_v0  ;;  %v2201_v3 = vld [vmem:[#allocation5 + $0x28] sm:$0xff]   ;;  %v2202_v4 = vld [vmem:[#allocation5 + $0x20] sm:$0xff]   ;;  %v2203_v5 = vld [vmem:[#allocation5 + $0x18] sm:$0xff]  }
  0x2a   :  { %427 = vmatpush1.bf16.msra.mxu0 %v2199_v1  ;;  %v2217_v6 = vld [vmem:[#allocation2 + $0x4] ss:$8 sps:$4 sm:$0xff]   ;;  %v2205_v8 = vld [vmem:[#allocation5 + $0x8] sm:$0xff]   ;;  %v2206_v9 = vld [vmem:[#allocation5] sm:$0xff]  }
  0x2b   :  { %428 = vmatprep.subr.bf16.mxu0 %v2845_v0  ;;  %v2204_v7 = vld [vmem:[#allocation5 + $0x10] sm:$0xff]   ;;  %458 = vmatprep.mubr.bf16.mxu0 %v2217_v6  ;;  %v2207_v10 = vld [vmem:[#allocation5 + $0x78] sm:$0xff]   ;;  %v2209_v12 = vld [vmem:[#allocation5 + $0x68] sm:$0xff]  }
  0x2c   :  { %v2208_v11 = vld [vmem:[#allocation5 + $0x70] sm:$0xff]   ;;  %v2210_v13 = vld [vmem:[#allocation5 + $0x60] sm:$0xff]   ;;  %v2211_v14 = vld [vmem:[#allocation5 + $0x58] sm:$0xff]  }
  0x2d   :  { %v2212_v15 = vld [vmem:[#allocation5 + $0x50] sm:$0xff]   ;;  %v2213_v16 = vld [vmem:[#allocation5 + $0x48] sm:$0xff]   ;;  %v2214_v17 = vld [vmem:[#allocation5 + $0x40] sm:$0xff]  }
  0x2e   :  { %429 = vmatpush1.bf16.msra.mxu0 %v2200_v2  ;;  %v2215_v18 = vld [vmem:[#allocation2] ss:$8 sps:$4 sm:$0xff]   ;;  %v2218_v19 = vld [vmem:[#allocation2 + $0x14] ss:$8 sps:$4 sm:$0xff]   ;;  %v2220_v20 = vld [vmem:[#allocation2 + $0x10] ss:$8 sps:$4 sm:$0xff]  }
  0x2f   :  { %430 = vmatprep.subr.bf16.mxu0 %v2845_v0  ;;  %v2221_v21 = vld [vmem:[#allocation2 + $0x24] ss:$8 sps:$4 sm:$0xff]   ;;  %v2223_v22 = vld [vmem:[#allocation2 + $0x20] ss:$8 sps:$4 sm:$0xff]   ;;  %v2224_v23 = vld [vmem:[#allocation2 + $0x34] ss:$8 sps:$4 sm:$0xff]  }
  0x30   :  { %v2226_v24 = vld [vmem:[#allocation2 + $0x30] ss:$8 sps:$4 sm:$0xff]   ;;  %v2227_v25 = vld [vmem:[#allocation2 + $0x44] ss:$8 sps:$4 sm:$0xff]   ;;  %v2229_v26 = vld [vmem:[#allocation2 + $0x40] ss:$8 sps:$4 sm:$0xff]  }
  0x31   :  { %v2230_v27 = vld [vmem:[#allocation2 + $0x54] ss:$8 sps:$4 sm:$0xff]   ;;  %v2232_v28 = vld [vmem:[#allocation2 + $0x50] ss:$8 sps:$4 sm:$0xff]   ;;  %v2233_v29 = vld [vmem:[#allocation2 + $0x64] ss:$8 sps:$4 sm:$0xff]  }
  0x32   :  { %431 = vmatpush1.bf16.msra.mxu0 %v2201_v3  ;;  %v2235_v30 = vld [vmem:[#allocation2 + $0x60] ss:$8 sps:$4 sm:$0xff]   ;;  %v2236_v31 = vld [vmem:[#allocation2 + $0x74] ss:$8 sps:$4 sm:$0xff]   ;;  %v2238_v32 = vld [vmem:[#allocation2 + $0x70] ss:$8 sps:$4 sm:$0xff]  }
  0x33   :  { %432 = vmatprep.subr.bf16.mxu0 %v2845_v0  ;;  %v2239_v33 = vld [vmem:[#allocation2 + $0x84] ss:$8 sps:$4 sm:$0xff]   ;;  %v2241_v34 = vld [vmem:[#allocation2 + $0x80] ss:$8 sps:$4 sm:$0xff]   ;;  %v2242_v35 = vld [vmem:[#allocation2 + $0x94] ss:$8 sps:$4 sm:$0xff]  }
  0x34   :  { %v2244_v36 = vld [vmem:[#allocation2 + $0x90] ss:$8 sps:$4 sm:$0xff]   ;;  %v2245_v37 = vld [vmem:[#allocation2 + $0xa4] ss:$8 sps:$4 sm:$0xff]   ;;  %v2274_v39 = vld [vmem:[#allocation7 + $0x70] ss:$8 sps:$4 sm:$0xff]  }
  0x35   :  { %v2272_v38 = vld [vmem:[#allocation7 + $0x74] ss:$8 sps:$4 sm:$0xff]   ;;  %v2275_v40 = vld [vmem:[#allocation7 + $0x64] ss:$8 sps:$4 sm:$0xff]   ;;  %v2247_v41 = vld [vmem:[#allocation2 + $0xa0] ss:$8 sps:$4 sm:$0xff]  }
  0x36   :  { %433 = vmatpush1.bf16.msra.mxu0 %v2202_v4  ;;  %966 = vmatprep.subr.bf16.mxu1 %v2272_v38  ;;  %v2277_v42 = vld [vmem:[#allocation7 + $0x60] ss:$8 sps:$4 sm:$0xff]   ;;  %v2248_v43 = vld [vmem:[#allocation2 + $0xb4] ss:$8 sps:$4 sm:$0xff]   ;;  %v2278_v44 = vld [vmem:[#allocation7 + $0x54] ss:$8 sps:$4 sm:$0xff]  }
  0x37   :  { %434 = vmatprep.subr.bf16.mxu0 %v2845_v0  ;;  %967 = vmatpush1.bf16.msra.mxu1 %v2274_v39  ;;  %v2280_v45 = vld [vmem:[#allocation7 + $0x50] ss:$8 sps:$4 sm:$0xff]   ;;  %v2250_v46 = vld [vmem:[#allocation2 + $0xb0] ss:$8 sps:$4 sm:$0xff]   ;;  %v2281_v47 = vld [vmem:[#allocation7 + $0x44] ss:$8 sps:$4 sm:$0xff]  }
  0x38   :  { %968 = vmatprep.subr.bf16.mxu1 %v2275_v40  ;;  %v2251_v48 = vld [vmem:[#allocation2 + $0xc4] ss:$8 sps:$4 sm:$0xff]   ;;  %v2283_v49 = vld [vmem:[#allocation7 + $0x40] ss:$8 sps:$4 sm:$0xff]   ;;  %v2286_v51 = vld [vmem:[#allocation7 + $0x30] ss:$8 sps:$4 sm:$0xff]  }
  0x39   :  { %v2284_v50 = vld [vmem:[#allocation7 + $0x34] ss:$8 sps:$4 sm:$0xff]   ;;  %v2253_v52 = vld [vmem:[#allocation2 + $0xc0] ss:$8 sps:$4 sm:$0xff]   ;;  %v2287_v53 = vld [vmem:[#allocation7 + $0x24] ss:$8 sps:$4 sm:$0xff]  }
  0x3a   :  { %435 = vmatpush1.bf16.msra.mxu0 %v2203_v5  ;;  %v2254_v54 = vld [vmem:[#allocation2 + $0xd4] ss:$8 sps:$4 sm:$0xff]   ;;  %v2289_v55 = vld [vmem:[#allocation7 + $0x20] ss:$8 sps:$4 sm:$0xff]   ;;  %v2290_v56 = vld [vmem:[#allocation7 + $0x14] ss:$8 sps:$4 sm:$0xff]  }
  0x3b   :  { %436 = vmatprep.subr.bf16.mxu0 %v2845_v0  ;;  %969 = vmatpush1.bf16.msra.mxu1 %v2277_v42  ;;  %v2292_v57 = vld [vmem:[#allocation7 + $0x10] ss:$8 sps:$4 sm:$0xff]   ;;  %v2256_v58 = vld [vmem:[#allocation2 + $0xd0] ss:$8 sps:$4 sm:$0xff]   ;;  %v2293_v59 = vld [vmem:[#allocation7 + $0x4] ss:$8 sps:$4 sm:$0xff]  }
  0x3c   :  { %970 = vmatprep.subr.bf16.mxu1 %v2278_v44  ;;  %v2257_v60 = vld [vmem:[#allocation2 + $0xe4] ss:$8 sps:$4 sm:$0xff]   ;;  %v2295_v61 = vld [vmem:[#allocation7] ss:$8 sps:$4 sm:$0xff]   ;;  %v2259_v62 = vld [vmem:[#allocation2 + $0xe0] ss:$8 sps:$4 sm:$0xff]  }
  0x3d   :  { %v2260_v63 = vld [vmem:[#allocation2 + $0xf4] ss:$8 sps:$4 sm:$0xff]   ;;  %v2262_v1 = vld [vmem:[#allocation2 + $0xf0] ss:$8 sps:$4 sm:$0xff]   ;;  %v2263_v2 = vld [vmem:[#allocation2 + $0x104] ss:$8 sps:$4 sm:$0xff]  }
  0x3e   :  { %437 = vmatpush1.bf16.msra.mxu0 %v2204_v7  ;;  %v2265_v3 = vld [vmem:[#allocation2 + $0x100] ss:$8 sps:$4 sm:$0xff]   ;;  %v2266_v4 = vld [vmem:[#allocation2 + $0x114] ss:$8 sps:$4 sm:$0xff]   ;;  %v2268_v5 = vld [vmem:[#allocation2 + $0x110] ss:$8 sps:$4 sm:$0xff]  }
  0x3f   :  { %438 = vmatprep.subr.bf16.mxu0 %v2845_v0  ;;  %971 = vmatpush1.bf16.msra.mxu1 %v2280_v45  ;;  %v2269_v6 = vld [vmem:[#allocation2 + $0x124] ss:$8 sps:$4 sm:$0xff]   ;;  %v2271_v7 = vld [vmem:[#allocation2 + $0x120] ss:$8 sps:$4 sm:$0xff]  }
  0x40   :  { %972 = vmatprep.subr.bf16.mxu1 %v2281_v47 }
  0x42   :  { %439 = vmatpush1.bf16.msra.mxu0 %v2205_v8  ;;  %v2912_v8 = vld [vmem:[%s3061_s2] ss:$0 sm:$0xff] }
  0x43   :  { %440 = vmatprep.subr.bf16.mxu0 %v2845_v0  ;;  %973 = vmatpush1.bf16.msra.mxu1 %v2283_v49 }
  0x44   :  { %974 = vmatprep.subr.bf16.mxu1 %v2284_v50 }
  0x46   :  { %441 = vmatpush1.bf16.msra.mxu0 %v2206_v9 }
  0x47   :  { %442 = vmatprep.subr.bf16.mxu0 %v2845_v0  ;;  %975 = vmatpush1.bf16.msra.mxu1 %v2286_v51 }
  0x48   :  { %976 = vmatprep.subr.bf16.mxu1 %v2287_v53 }
  0x4a   :  { %443 = vmatpush2.bf16.msra.mxu0 %v2207_v10 }
  0x4b   :  { %444 = vmatprep.subr.bf16.mxu0 %v2845_v0  ;;  %977 = vmatpush1.bf16.msra.mxu1 %v2289_v55 }
  0x4c   :  { %978 = vmatprep.subr.bf16.mxu1 %v2290_v56 }
  0x4e   :  { %445 = vmatpush2.bf16.msra.mxu0 %v2208_v11 }
  0x4f   :  { %446 = vmatprep.subr.bf16.mxu0 %v2845_v0  ;;  %979 = vmatpush1.bf16.msra.mxu1 %v2292_v57 }
  0x50   :  { %980 = vmatprep.subr.bf16.mxu1 %v2293_v59 }
  0x52   :  { %447 = vmatpush2.bf16.msra.mxu0 %v2209_v12 }
  0x53   :  { %448 = vmatprep.subr.bf16.mxu0 %v2845_v0  ;;  %981 = vmatpush1.bf16.msra.mxu1 %v2295_v61 }
  0x56   :  { %449 = vmatpush2.bf16.msra.mxu0 %v2210_v13 }
  0x57   :  { %450 = vmatprep.subr.bf16.mxu0 %v2845_v0 }
  0x5a   :  { %451 = vmatpush2.bf16.msra.mxu0 %v2211_v14 }
  0x5b   :  { %452 = vmatprep.subr.bf16.mxu0 %v2845_v0 }
  0x5e   :  { %453 = vmatpush2.bf16.msra.mxu0 %v2212_v15 }
  0x5f   :  { %454 = vmatprep.subr.bf16.mxu0 %v2845_v0 }
  0x62   :  { %455 = vmatpush2.bf16.msra.mxu0 %v2213_v16 }
  0x63   :  { %456 = vmatprep.subr.bf16.mxu0 %v2845_v0 }
  0x66   :  { %457 = vmatpush2.bf16.msra.mxu0 %v2214_v17 }
  0x69   :  { %459 = vmatmul.mubr.bf16.vlgmr.msra.gmra.mxu0 %v2215_v18 }
  0x6a   :  { %466 = vmatprep.mubr.bf16.mxu0 %v2218_v19 }
  0x71   :  { %467 = vmatmul.mubr.bf16.gmra.mxu0 %v2220_v20 }
  0x72   :  { %474 = vmatprep.mubr.bf16.mxu0 %v2221_v21 }
  0x79   :  { %475 = vmatmul.mubr.bf16.gmra.mxu0 %v2223_v22 }
  0x7a   :  { %482 = vmatprep.mubr.bf16.mxu0 %v2224_v23 }
  0x81   :  { %483 = vmatmul.mubr.bf16.gmra.mxu0 %v2226_v24 }
  0x82   :  { %490 = vmatprep.mubr.bf16.mxu0 %v2227_v25 }
  0x89   :  { %491 = vmatmul.mubr.bf16.gmra.mxu0 %v2229_v26 }
  0x8a   :  { %498 = vmatprep.mubr.bf16.mxu0 %v2230_v27 }
  0x91   :  { %499 = vmatmul.mubr.bf16.gmra.mxu0 %v2232_v28 }
  0x92   :  { %506 = vmatprep.mubr.bf16.mxu0 %v2233_v29 }
  0x99   :  { %507 = vmatmul.mubr.bf16.gmra.mxu0 %v2235_v30 }
  0x9a   :  { %514 = vmatprep.mubr.bf16.mxu0 %v2236_v31 }
  0xa1   :  { %515 = vmatmul.mubr.bf16.gmra.mxu0 %v2238_v32 }
  0xa2   :  { %522 = vmatprep.mubr.bf16.mxu0 %v2239_v33 }
  0xa9   :  { %523 = vmatmul.mubr.bf16.gmra.mxu0 %v2241_v34 }
  0xaa   :  { %530 = vmatprep.mubr.bf16.mxu0 %v2242_v35 }
  0xb1   :  { %531 = vmatmul.mubr.bf16.gmra.mxu0 %v2244_v36 }
  0xb2   :  { %538 = vmatprep.mubr.bf16.mxu0 %v2245_v37 }
  0xb9   :  { %539 = vmatmul.mubr.bf16.gmra.mxu0 %v2247_v41 }
  0xba   :  { %546 = vmatprep.mubr.bf16.mxu0 %v2248_v43 }
  0xc1   :  { %547 = vmatmul.mubr.bf16.gmra.mxu0 %v2250_v46 }
  0xc2   :  { %554 = vmatprep.mubr.bf16.mxu0 %v2251_v48 }
  0xc9   :  { %555 = vmatmul.mubr.bf16.gmra.mxu0 %v2253_v52 }
  0xca   :  { %562 = vmatprep.mubr.bf16.mxu0 %v2254_v54 }
  0xd1   :  { %563 = vmatmul.mubr.bf16.gmra.mxu0 %v2256_v58 }
  0xd2   :  { %570 = vmatprep.mubr.bf16.mxu0 %v2257_v60 }
  0xd9   :  { %571 = vmatmul.mubr.bf16.gmra.mxu0 %v2259_v62 }
  0xda   :  { %578 = vmatprep.mubr.bf16.mxu0 %v2260_v63 }
  0xe1   :  { %579 = vmatmul.mubr.bf16.gmra.mxu0 %v2262_v1 }
  0xe2   :  { %586 = vmatprep.mubr.bf16.mxu0 %v2263_v2 }
  0xe9   :  { %587 = vmatmul.mubr.bf16.gmra.mxu0 %v2265_v3 }
  0xea   :  { %594 = vmatprep.mubr.bf16.mxu0 %v2266_v4 }
  0xf1   :  { %595 = vmatmul.mubr.bf16.gmra.mxu0 %v2268_v5 }
  0xf2   :  { %602 = vmatprep.mubr.bf16.mxu0 %v2269_v6 }
  0xf9   :  { %603 = vmatmul.mubr.bf16.gmra.mxu0 %v2271_v7 }
 0x129   :  { %v460_v9 = vpop.f32.mrf.mxu0 }
 0x12a   :  { %v461_v10 = vadd.f32 %v2912_v8, %v460_v9 }
 0x12b   :  { %v462_v11 = vpop.f32.mrf.mxu0 }
 0x12c   :  { %v1984_v12 = vmul.f32 -1.442695, %v461_v10 }
 0x12d   :  { %v463_v13 = vpop.f32.mrf.mxu0 }
 0x12e   :  { %2296 = vpow2.f32 %v1984_v12  ;;  %v464_v14 = vadd.f32 %v2912_v8, %v463_v13 }
 0x12f   :  { %v465_v15 = vpop.f32.mrf.mxu0 }
 0x130   :  { %v1985_v16 = vmul.f32 -1.442695, %v464_v14 }
 0x131   :  { %v468_v17 = vpop.f32.mrf.mxu0 }
 0x132   :  { %2298 = vpow2.f32 %v1985_v16  ;;  %v469_v18 = vadd.f32 %v2912_v8, %v468_v17 }
 0x133   :  { %v470_v19 = vpop.f32.mrf.mxu0 }
 0x134   :  { %v1986_v20 = vmul.f32 -1.442695, %v469_v18 }
 0x135   :  { %v471_v21 = vpop.f32.mrf.mxu0 }
 0x136   :  { %2300 = vpow2.f32 %v1986_v20  ;;  %v472_v22 = vadd.f32 %v2912_v8, %v471_v21 }
 0x137   :  { %v473_v23 = vpop.f32.mrf.mxu0 }
 0x138   :  { %v1987_v24 = vmul.f32 -1.442695, %v472_v22 }
 0x139   :  { %v476_v25 = vpop.f32.mrf.mxu0 }
 0x13a   :  { %2302 = vpow2.f32 %v1987_v24  ;;  %v477_v26 = vadd.f32 %v2912_v8, %v476_v25 }
 0x13b   :  { %v2297_v27 = vpop.eup %2296  ;;  %v478_v28 = vpop.f32.mrf.mxu0 }
 0x13c   :  { %v1988_v29 = vmul.f32 -1.442695, %v477_v26  ;;  %v725_v30 = vadd.f32 1.0, %v2297_v27 }
 0x13d   :  { %v479_v31 = vpop.f32.mrf.mxu0 }
 0x13e   :  { %v480_v32 = vadd.f32 %v2912_v8, %v479_v31  ;;  %2304 = vpow2.f32 %v1988_v29 }
 0x13f   :  { %v2299_v33 = vpop.eup %2298  ;;  %v481_v34 = vpop.f32.mrf.mxu0  ;;  %2306 = vrcp.f32 %v725_v30 }
 0x140   :  { %v726_v35 = vadd.f32 1.0, %v2299_v33  ;;  %v1989_v36 = vmul.f32 -1.442695, %v480_v32 }
 0x141   :  { %v484_v37 = vpop.f32.mrf.mxu0 }
 0x142   :  { %2308 = vrcp.f32 %v726_v35  ;;  %v485_v38 = vadd.f32 %v2912_v8, %v484_v37 }
 0x143   :  { %v2301_v39 = vpop.eup %2300  ;;  %2310 = vpow2.f32 %v1989_v36  ;;  %v486_v40 = vpop.f32.mrf.mxu0 }
 0x144   :  { %v1990_v41 = vmul.f32 -1.442695, %v485_v38  ;;  %v727_v42 = vadd.f32 1.0, %v2301_v39 }
 0x145   :  { %v487_v43 = vpop.f32.mrf.mxu0 }
 0x146   :  { %v488_v44 = vadd.f32 %v2912_v8, %v487_v43  ;;  %2312 = vpow2.f32 %v1990_v41 }
 0x147   :  { %v2303_v45 = vpop.eup %2302  ;;  %v489_v46 = vpop.f32.mrf.mxu0  ;;  %2314 = vrcp.f32 %v727_v42 }
 0x148   :  { %v728_v47 = vadd.f32 1.0, %v2303_v45  ;;  %v1991_v48 = vmul.f32 -1.442695, %v488_v44 }
 0x149   :  { %v492_v49 = vpop.f32.mrf.mxu0 }
 0x14a   :  { %2316 = vrcp.f32 %v728_v47  ;;  %v493_v50 = vadd.f32 %v2912_v8, %v492_v49 }
 0x14b   :  { %2318 = vpow2.f32 %v1991_v48  ;;  %v494_v51 = vpop.f32.mrf.mxu0  ;;  %v2305_v52 = vpop.eup %2304 }
 0x14c   :  { %v1992_v53 = vmul.f32 -1.442695, %v493_v50  ;;  %v729_v54 = vadd.f32 1.0, %v2305_v52  ;;  %v2307_v56 = vpop.eup %2306 }
 0x14d   :  { %v495_v55 = vpop.f32.mrf.mxu0 }
 0x14e   :  { %2320 = vpow2.f32 %v1992_v53  ;;  %v496_v57 = vadd.f32 %v2912_v8, %v495_v55 }
 0x14f   :  { %v2309_v58 = vpop.eup %2308  ;;  %v497_v59 = vpop.f32.mrf.mxu0  ;;  %2322 = vrcp.f32 %v729_v54 }
 0x150   :  { %v2311_v60 = vpop.eup %2310  ;;  %v1993_v61 = vmul.f32 -1.442695, %v496_v57  ;;  %v839_v62 = vpack.c.bf16 %v2309_v58, %v2307_v56 }
 0x151   :  { %v730_v63 = vadd.f32 1.0, %v2311_v60  ;;  %v500_v1 = vpop.f32.mrf.mxu0 }
 0x152   :  { %2324 = vpow2.f32 %v1993_v61  ;;  %v501_v2 = vadd.f32 %v2912_v8, %v500_v1  ;;  %999 = vmatmul.mubr.bf16.vlgmr.msra.gmra.mxu1 %v839_v62 }
 0x153   :  { %2326 = vrcp.f32 %v730_v63  ;;  %v502_v3 = vpop.f32.mrf.mxu0  ;;  %1008 = vmatprep.mubr.bf16.mxu1 %v2845_v0  ;;  %v2313_v4 = vpop.eup %2312 }
 0x154   :  { %v1994_v5 = vmul.f32 -1.442695, %v501_v2  ;;  %v731_v6 = vadd.f32 1.0, %v2313_v4  ;;  %v2315_v9 = vpop.eup %2314 }
 0x155   :  { %v503_v7 = vpop.f32.mrf.mxu0 }
 0x156   :  { %2328 = vpow2.f32 %v1994_v5  ;;  %v504_v10 = vadd.f32 %v2912_v8, %v503_v7 }
 0x157   :  { %v2317_v11 = vpop.eup %2316  ;;  %v505_v12 = vpop.f32.mrf.mxu0  ;;  %2330 = vrcp.f32 %v731_v6 }
 0x158   :  { %v2319_v13 = vpop.eup %2318  ;;  %v1995_v14 = vmul.f32 -1.442695, %v504_v10  ;;  %v840_v15 = vpack.c.bf16 %v2317_v11, %v2315_v9 }
 0x159   :  { %v732_v16 = vadd.f32 1.0, %v2319_v13  ;;  %v508_v17 = vpop.f32.mrf.mxu0 }
 0x15a   :  { %2332 = vpow2.f32 %v1995_v14  ;;  %v509_v18 = vadd.f32 %v2912_v8, %v508_v17  ;;  %1009 = vmatmul.mubr.bf16.gmra.mxu1 %v840_v15 }
 0x15b   :  { %v2321_v19 = vpop.eup %2320  ;;  %2334 = vrcp.f32 %v732_v16  ;;  %v510_v20 = vpop.f32.mrf.mxu0  ;;  %1018 = vmatprep.mubr.bf16.mxu1 %v2845_v0 }
 0x15c   :  { %v1996_v21 = vmul.f32 -1.442695, %v509_v18  ;;  %v733_v22 = vadd.f32 1.0, %v2321_v19  ;;  %v2323_v24 = vpop.eup %2322 }
 0x15d   :  { %v511_v23 = vpop.f32.mrf.mxu0 }
 0x15e   :  { %v512_v25 = vadd.f32 %v2912_v8, %v511_v23  ;;  %2336 = vpow2.f32 %v1996_v21 }
 0x15f   :  { %v2325_v26 = vpop.eup %2324  ;;  %v513_v27 = vpop.f32.mrf.mxu0  ;;  %2338 = vrcp.f32 %v733_v22 }
 0x160   :  { %v2327_v28 = vpop.eup %2326  ;;  %v734_v29 = vadd.f32 1.0, %v2325_v26  ;;  %v1997_v30 = vmul.f32 -1.442695, %v512_v25 }
 0x161   :  { %v516_v31 = vpop.f32.mrf.mxu0  ;;  %v841_v32 = vpack.c.bf16 %v2327_v28, %v2323_v24 }
 0x162   :  { %2340 = vrcp.f32 %v734_v29  ;;  %v517_v33 = vadd.f32 %v2912_v8, %v516_v31 }
 0x163   :  { %v2329_v34 = vpop.eup %2328  ;;  %2342 = vpow2.f32 %v1997_v30  ;;  %1019 = vmatmul.mubr.bf16.gmra.mxu1 %v841_v32  ;;  %v518_v35 = vpop.f32.mrf.mxu0 }
 0x164   :  { %v1998_v36 = vmul.f32 -1.442695, %v517_v33  ;;  %1028 = vmatprep.mubr.bf16.mxu1 %v2845_v0  ;;  %v735_v37 = vadd.f32 1.0, %v2329_v34  ;;  %v2331_v39 = vpop.eup %2330 }
 0x165   :  { %v519_v38 = vpop.f32.mrf.mxu0 }
 0x166   :  { %v520_v40 = vadd.f32 %v2912_v8, %v519_v38  ;;  %2344 = vpow2.f32 %v1998_v36 }
 0x167   :  { %v2333_v41 = vpop.eup %2332  ;;  %v521_v42 = vpop.f32.mrf.mxu0  ;;  %2346 = vrcp.f32 %v735_v37 }
 0x168   :  { %v2335_v43 = vpop.eup %2334  ;;  %v736_v44 = vadd.f32 1.0, %v2333_v41  ;;  %v1999_v45 = vmul.f32 -1.442695, %v520_v40 }
 0x169   :  { %v524_v46 = vpop.f32.mrf.mxu0  ;;  %v842_v47 = vpack.c.bf16 %v2335_v43, %v2331_v39 }
 0x16a   :  { %2348 = vrcp.f32 %v736_v44  ;;  %v525_v48 = vadd.f32 %v2912_v8, %v524_v46 }
 0x16b   :  { %2350 = vpow2.f32 %v1999_v45  ;;  %1029 = vmatmul.mubr.bf16.gmra.mxu1 %v842_v47  ;;  %v526_v49 = vpop.f32.mrf.mxu0  ;;  %v2337_v50 = vpop.eup %2336 }
 0x16c   :  { %v2000_v51 = vmul.f32 -1.442695, %v525_v48  ;;  %1038 = vmatprep.mubr.bf16.mxu1 %v2845_v0  ;;  %v737_v52 = vadd.f32 1.0, %v2337_v50  ;;  %v2339_v54 = vpop.eup %2338 }
 0x16d   :  { %v527_v53 = vpop.f32.mrf.mxu0 }
 0x16e   :  { %2352 = vpow2.f32 %v2000_v51  ;;  %v528_v55 = vadd.f32 %v2912_v8, %v527_v53 }
 0x16f   :  { %v2341_v56 = vpop.eup %2340  ;;  %v529_v57 = vpop.f32.mrf.mxu0  ;;  %2354 = vrcp.f32 %v737_v52 }
 0x170   :  { %v2343_v58 = vpop.eup %2342  ;;  %v2001_v59 = vmul.f32 -1.442695, %v528_v55  ;;  %v843_v60 = vpack.c.bf16 %v2341_v56, %v2339_v54 }
 0x171   :  { %v738_v61 = vadd.f32 1.0, %v2343_v58  ;;  %v532_v62 = vpop.f32.mrf.mxu0 }
 0x172   :  { %2356 = vpow2.f32 %v2001_v59  ;;  %v533_v63 = vadd.f32 %v2912_v8, %v532_v62 }
 0x173   :  { %2358 = vrcp.f32 %v738_v61  ;;  %1039 = vmatmul.mubr.bf16.gmra.mxu1 %v843_v60  ;;  %v534_v1 = vpop.f32.mrf.mxu0  ;;  %v2345_v2 = vpop.eup %2344 }
 0x174   :  { %v2002_v3 = vmul.f32 -1.442695, %v533_v63  ;;  %1048 = vmatprep.mubr.bf16.mxu1 %v2845_v0  ;;  %v739_v4 = vadd.f32 1.0, %v2345_v2  ;;  %v2347_v6 = vpop.eup %2346 }
 0x175   :  { %v535_v5 = vpop.f32.mrf.mxu0 }
 0x176   :  { %2360 = vpow2.f32 %v2002_v3  ;;  %v536_v7 = vadd.f32 %v2912_v8, %v535_v5 }
 0x177   :  { %v2349_v9 = vpop.eup %2348  ;;  %v537_v10 = vpop.f32.mrf.mxu0  ;;  %2362 = vrcp.f32 %v739_v4 }
 0x178   :  { %v2351_v11 = vpop.eup %2350  ;;  %v2003_v12 = vmul.f32 -1.442695, %v536_v7  ;;  %v844_v13 = vpack.c.bf16 %v2349_v9, %v2347_v6 }
 0x179   :  { %v740_v14 = vadd.f32 1.0, %v2351_v11  ;;  %v540_v15 = vpop.f32.mrf.mxu0 }
 0x17a   :  { %2364 = vpow2.f32 %v2003_v12  ;;  %v541_v16 = vadd.f32 %v2912_v8, %v540_v15 }
 0x17b   :  { %v2353_v17 = vpop.eup %2352  ;;  %2366 = vrcp.f32 %v740_v14  ;;  %1049 = vmatmul.mubr.bf16.gmra.mxu1 %v844_v13  ;;  %v542_v18 = vpop.f32.mrf.mxu0 }
 0x17c   :  { %v2004_v19 = vmul.f32 -1.442695, %v541_v16  ;;  %1058 = vmatprep.mubr.bf16.mxu1 %v2845_v0  ;;  %v741_v20 = vadd.f32 1.0, %v2353_v17  ;;  %v2355_v22 = vpop.eup %2354 }
 0x17d   :  { %v543_v21 = vpop.f32.mrf.mxu0 }
 0x17e   :  { %v544_v23 = vadd.f32 %v2912_v8, %v543_v21  ;;  %2368 = vpow2.f32 %v2004_v19 }
 0x17f   :  { %v2357_v24 = vpop.eup %2356  ;;  %v545_v25 = vpop.f32.mrf.mxu0  ;;  %2370 = vrcp.f32 %v741_v20 }
 0x180   :  { %v2359_v26 = vpop.eup %2358  ;;  %v742_v27 = vadd.f32 1.0, %v2357_v24  ;;  %v2005_v28 = vmul.f32 -1.442695, %v544_v23 }
 0x181   :  { %v548_v29 = vpop.f32.mrf.mxu0  ;;  %v845_v30 = vpack.c.bf16 %v2359_v26, %v2355_v22 }
 0x182   :  { %2372 = vrcp.f32 %v742_v27  ;;  %v549_v31 = vadd.f32 %v2912_v8, %v548_v29 }
 0x183   :  { %v2361_v32 = vpop.eup %2360  ;;  %2374 = vpow2.f32 %v2005_v28  ;;  %1059 = vmatmul.mubr.bf16.gmra.mxu1 %v845_v30  ;;  %v550_v33 = vpop.f32.mrf.mxu0 }
 0x184   :  { %v2006_v34 = vmul.f32 -1.442695, %v549_v31  ;;  %1068 = vmatprep.mubr.bf16.mxu1 %v2845_v0  ;;  %v743_v35 = vadd.f32 1.0, %v2361_v32  ;;  %v2363_v37 = vpop.eup %2362 }
 0x185   :  { %v551_v36 = vpop.f32.mrf.mxu0 }
 0x186   :  { %v552_v38 = vadd.f32 %v2912_v8, %v551_v36  ;;  %2376 = vpow2.f32 %v2006_v34 }
 0x187   :  { %v2365_v39 = vpop.eup %2364  ;;  %v553_v40 = vpop.f32.mrf.mxu0  ;;  %2378 = vrcp.f32 %v743_v35 }
 0x188   :  { %v2367_v41 = vpop.eup %2366  ;;  %v744_v42 = vadd.f32 1.0, %v2365_v39  ;;  %v2007_v43 = vmul.f32 -1.442695, %v552_v38 }
 0x189   :  { %v556_v44 = vpop.f32.mrf.mxu0  ;;  %v846_v45 = vpack.c.bf16 %v2367_v41, %v2363_v37 }
 0x18a   :  { %2380 = vrcp.f32 %v744_v42  ;;  %v557_v46 = vadd.f32 %v2912_v8, %v556_v44 }
 0x18b   :  { %2382 = vpow2.f32 %v2007_v43  ;;  %1069 = vmatmul.mubr.bf16.gmra.mxu1 %v846_v45  ;;  %v558_v47 = vpop.f32.mrf.mxu0  ;;  %v2369_v48 = vpop.eup %2368 }
 0x18c   :  { %v2008_v49 = vmul.f32 -1.442695, %v557_v46  ;;  %1078 = vmatprep.mubr.bf16.mxu1 %v2845_v0  ;;  %v745_v50 = vadd.f32 1.0, %v2369_v48  ;;  %v2371_v52 = vpop.eup %2370 }
 0x18d   :  { %v559_v51 = vpop.f32.mrf.mxu0 }
 0x18e   :  { %2384 = vpow2.f32 %v2008_v49  ;;  %v560_v53 = vadd.f32 %v2912_v8, %v559_v51 }
 0x18f   :  { %v2373_v54 = vpop.eup %2372  ;;  %v561_v55 = vpop.f32.mrf.mxu0  ;;  %2386 = vrcp.f32 %v745_v50 }
 0x190   :  { %v2375_v56 = vpop.eup %2374  ;;  %v2009_v57 = vmul.f32 -1.442695, %v560_v53  ;;  %v847_v58 = vpack.c.bf16 %v2373_v54, %v2371_v52 }
 0x191   :  { %v746_v59 = vadd.f32 1.0, %v2375_v56  ;;  %v564_v60 = vpop.f32.mrf.mxu0 }
 0x192   :  { %2388 = vpow2.f32 %v2009_v57  ;;  %v565_v61 = vadd.f32 %v2912_v8, %v564_v60 }
 0x193   :  { %2390 = vrcp.f32 %v746_v59  ;;  %1079 = vmatmul.mubr.bf16.gmra.mxu1 %v847_v58  ;;  %v566_v62 = vpop.f32.mrf.mxu0  ;;  %v2377_v63 = vpop.eup %2376 }
 0x194   :  { %v2010_v1 = vmul.f32 -1.442695, %v565_v61  ;;  %1088 = vmatprep.mubr.bf16.mxu1 %v2845_v0  ;;  %v747_v2 = vadd.f32 1.0, %v2377_v63  ;;  %v2379_v4 = vpop.eup %2378 }
 0x195   :  { %v567_v3 = vpop.f32.mrf.mxu0 }
 0x196   :  { %2392 = vpow2.f32 %v2010_v1  ;;  %v568_v5 = vadd.f32 %v2912_v8, %v567_v3 }
 0x197   :  { %v2381_v6 = vpop.eup %2380  ;;  %v569_v7 = vpop.f32.mrf.mxu0  ;;  %2394 = vrcp.f32 %v747_v2 }
 0x198   :  { %v2383_v9 = vpop.eup %2382  ;;  %v2011_v10 = vmul.f32 -1.442695, %v568_v5  ;;  %v848_v11 = vpack.c.bf16 %v2381_v6, %v2379_v4 }
 0x199   :  { %v748_v12 = vadd.f32 1.0, %v2383_v9  ;;  %v572_v13 = vpop.f32.mrf.mxu0 }
 0x19a   :  { %2396 = vpow2.f32 %v2011_v10  ;;  %v573_v14 = vadd.f32 %v2912_v8, %v572_v13 }
 0x19b   :  { %v2385_v15 = vpop.eup %2384  ;;  %2398 = vrcp.f32 %v748_v12  ;;  %1089 = vmatmul.mubr.bf16.gmra.mxu1 %v848_v11  ;;  %v574_v16 = vpop.f32.mrf.mxu0 }
 0x19c   :  { %v2012_v17 = vmul.f32 -1.442695, %v573_v14  ;;  %1098 = vmatprep.mubr.bf16.mxu1 %v2845_v0  ;;  %v749_v18 = vadd.f32 1.0, %v2385_v15  ;;  %v2387_v20 = vpop.eup %2386 }
 0x19d   :  { %v575_v19 = vpop.f32.mrf.mxu0 }
 0x19e   :  { %v576_v21 = vadd.f32 %v2912_v8, %v575_v19  ;;  %2400 = vpow2.f32 %v2012_v17 }
 0x19f   :  { %v2389_v22 = vpop.eup %2388  ;;  %v577_v23 = vpop.f32.mrf.mxu0  ;;  %2402 = vrcp.f32 %v749_v18 }
 0x1a0   :  { %v2391_v24 = vpop.eup %2390  ;;  %v750_v25 = vadd.f32 1.0, %v2389_v22  ;;  %v2013_v26 = vmul.f32 -1.442695, %v576_v21 }
 0x1a1   :  { %v580_v27 = vpop.f32.mrf.mxu0  ;;  %v849_v28 = vpack.c.bf16 %v2391_v24, %v2387_v20 }
 0x1a2   :  { %2404 = vrcp.f32 %v750_v25  ;;  %v581_v29 = vadd.f32 %v2912_v8, %v580_v27 }
 0x1a3   :  { %v2393_v30 = vpop.eup %2392  ;;  %2406 = vpow2.f32 %v2013_v26  ;;  %1099 = vmatmul.mubr.bf16.gmra.mxu1 %v849_v28  ;;  %v582_v31 = vpop.f32.mrf.mxu0 }
 0x1a4   :  { %v2014_v32 = vmul.f32 -1.442695, %v581_v29  ;;  %1108 = vmatprep.mubr.bf16.mxu1 %v2845_v0  ;;  %v751_v33 = vadd.f32 1.0, %v2393_v30  ;;  %v2395_v35 = vpop.eup %2394 }
 0x1a5   :  { %v583_v34 = vpop.f32.mrf.mxu0 }
 0x1a6   :  { %v584_v36 = vadd.f32 %v2912_v8, %v583_v34  ;;  %2408 = vpow2.f32 %v2014_v32 }
 0x1a7   :  { %v2397_v37 = vpop.eup %2396  ;;  %v585_v38 = vpop.f32.mrf.mxu0  ;;  %2410 = vrcp.f32 %v751_v33 }
 0x1a8   :  { %v2399_v39 = vpop.eup %2398  ;;  %v752_v40 = vadd.f32 1.0, %v2397_v37  ;;  %v2015_v41 = vmul.f32 -1.442695, %v584_v36 }
 0x1a9   :  { %v588_v42 = vpop.f32.mrf.mxu0  ;;  %v850_v43 = vpack.c.bf16 %v2399_v39, %v2395_v35 }
 0x1aa   :  { %2412 = vrcp.f32 %v752_v40  ;;  %v589_v44 = vadd.f32 %v2912_v8, %v588_v42 }
 0x1ab   :  { %2414 = vpow2.f32 %v2015_v41  ;;  %1109 = vmatmul.mubr.bf16.gmra.mxu1 %v850_v43  ;;  %v590_v45 = vpop.f32.mrf.mxu0  ;;  %v2401_v46 = vpop.eup %2400 }
 0x1ac   :  { %v2016_v47 = vmul.f32 -1.442695, %v589_v44  ;;  %1118 = vmatprep.mubr.bf16.mxu1 %v2845_v0  ;;  %v753_v48 = vadd.f32 1.0, %v2401_v46  ;;  %v2403_v50 = vpop.eup %2402  ;;  %v876_v45 = vlaneseq }
 0x1ad   :  { %v591_v49 = vpop.f32.mrf.mxu0 }
 0x1ae   :  { %2416 = vpow2.f32 %v2016_v47  ;;  %v592_v51 = vadd.f32 %v2912_v8, %v591_v49  ;;  %v877_v46 = vshrl.u32 %v876_v45, 7 }
 0x1af   :  { %v2405_v52 = vpop.eup %2404  ;;  %v593_v53 = vpop.f32.mrf.mxu0  ;;  %2418 = vrcp.f32 %v753_v48  ;;  %v874_v48 = vld [vmem:[%s3063_s4] sm:$0x3]  ;;  %s2846_s4 = smov [#allocation8]  }
 0x1b0   :  { %v2407_v54 = vpop.eup %2406  ;;  %v2017_v55 = vmul.f32 -1.442695, %v592_v51  ;;  %v851_v56 = vpack.c.bf16 %v2405_v52, %v2403_v50  ;;  %v878_v47 = vsub.s32 0, %v877_v46  ;;  %v882_v49 = vsub.s32 1, %v877_v46  ;;  %s1916_s12 = sshll.u32 %s2846_s4, 4  ;;  %s1917_s12 = int_to_ptr.vmem [resolvable:$true] %s1916_s12 }
 0x1b1   :  { %v754_v57 = vadd.f32 1.0, %v2407_v54  ;;  %v596_v58 = vpop.f32.mrf.mxu0  ;;  %s2812_s13 = scalar_lea.vmem %s1917_s12, 4864  ;;  %p2817_p2 = scmp.lt.s32.totalorder %s1917_s12, %s1917_s12 }
 0x1b2   :  { %2420 = vpow2.f32 %v2017_v55  ;;  %v597_v59 = vadd.f32 %v2912_v8, %v596_v58  ;;  %v2973_v50 = vrot.slane %v874_v48, %v878_v47  ;;  %v2975_v51 = vrot.slane %v874_v48, %v882_v49  ;;  %p2813_p1 = scmp.ne.s32.totalorder %s1917_s12, %s2812_s13  ;;  %p2818_p3 = scmp.lt.s32.totalorder %s2812_s13, %s2812_s13 }
 0x1b3   :  { %2422 = vrcp.f32 %v754_v57  ;;  %1119 = vmatmul.mubr.bf16.gmra.mxu1 %v851_v56  ;;  %v598_v60 = vpop.f32.mrf.mxu0  ;;  %v2409_v61 = vpop.eup %2408 }
 0x1b4   :  { %v2018_v62 = vmul.f32 -1.442695, %v597_v59  ;;  %1128 = vmatprep.mubr.bf16.mxu1 %v2845_v0  ;;  %v755_v63 = vadd.f32 1.0, %v2409_v61  ;;  %v2411_v2 = vpop.eup %2410  ;;  %p2819_p4 = por %p2818_p3, %p2817_p2 }
 0x1b5   :  { %v599_v1 = vpop.f32.mrf.mxu0 }
 0x1b6   :  { %2424 = vpow2.f32 %v2018_v62  ;;  %v600_v3 = vadd.f32 %v2912_v8, %v599_v1  ;;  %p2820_p5 = pnand %p2819_p4, %p2813_p1 }
 0x1b7   :  { %v2413_v4 = vpop.eup %2412  ;;  %v601_v5 = vpop.f32.mrf.mxu0  ;;  %2426 = vrcp.f32 %v755_v63 }
 0x1b8   :  { %v2415_v6 = vpop.eup %2414  ;;  %v2019_v7 = vmul.f32 -1.442695, %v600_v3  ;;  %v852_v9 = vpack.c.bf16 %v2413_v4, %v2411_v2 }
 0x1b9   :  { %v756_v10 = vadd.f32 1.0, %v2415_v6  ;;  %v604_v11 = vpop.f32.mrf.mxu0 }
 0x1ba   :  { %2428 = vpow2.f32 %v2019_v7  ;;  %v605_v12 = vadd.f32 %v2912_v8, %v604_v11 }
 0x1bb   :  { %v2417_v13 = vpop.eup %2416  ;;  %2430 = vrcp.f32 %v756_v10  ;;  %1129 = vmatmul.mubr.bf16.gmra.mxu1 %v852_v9  ;;  %v606_v14 = vpop.f32.mrf.mxu0 }
 0x1bc   :  { %v2020_v15 = vmul.f32 -1.442695, %v605_v12  ;;  %1138 = vmatprep.mubr.bf16.mxu1 %v2845_v0  ;;  %v757_v16 = vadd.f32 1.0, %v2417_v13  ;;  %v2419_v18 = vpop.eup %2418 }
 0x1bd   :  { %v607_v17 = vpop.f32.mrf.mxu0 }
 0x1be   :  { %v608_v19 = vadd.f32 %v2912_v8, %v607_v17  ;;  %2432 = vpow2.f32 %v2020_v15 }
 0x1bf   :  { %v2421_v20 = vpop.eup %2420  ;;  %v609_v21 = vpop.f32.mrf.mxu0  ;;  %2434 = vrcp.f32 %v757_v16 }
 0x1c0   :  { %v2423_v22 = vpop.eup %2422  ;;  %v758_v23 = vadd.f32 1.0, %v2421_v20  ;;  %v2021_v24 = vmul.f32 -1.442695, %v608_v19 }
 0x1c1   :  { %v853_v25 = vpack.c.bf16 %v2423_v22, %v2419_v18 }
 0x1c2   :  { %2436 = vrcp.f32 %v758_v23 }
 0x1c3   :  { %v2425_v26 = vpop.eup %2424  ;;  %2438 = vpow2.f32 %v2021_v24  ;;  %1139 = vmatmul.mubr.bf16.gmra.mxu1 %v853_v25 }
 0x1c4   :  { %1148 = vmatprep.mubr.bf16.mxu1 %v2845_v0  ;;  %v759_v27 = vadd.f32 1.0, %v2425_v26  ;;  %v2427_v28 = vpop.eup %2426 }
 0x1c6   :  { %2440 = vrcp.f32 %v759_v27 }
 0x1c7   :  { %v2429_v29 = vpop.eup %2428 }
 0x1c8   :  { %v2431_v30 = vpop.eup %2430  ;;  %v760_v31 = vadd.f32 1.0, %v2429_v29 }
 0x1c9   :  { %v854_v8 = vpack.c.bf16 %v2431_v30, %v2427_v28 }
 0x1ca   :  { %2442 = vrcp.f32 %v760_v31 }
 0x1cb   :  { %1149 = vmatmul.mubr.bf16.gmra.mxu1 %v854_v8  ;;  %v2433_v32 = vpop.eup %2432 }
 0x1cc   :  { %1158 = vmatprep.mubr.bf16.mxu1 %v2845_v0  ;;  %v2435_v33 = vpop.eup %2434  ;;  %v761_v34 = vadd.f32 1.0, %v2433_v32 }
 0x1ce   :  { %2444 = vrcp.f32 %v761_v34 }
 0x1cf   :  { %v2437_v35 = vpop.eup %2436 }
 0x1d0   :  { %v2439_v36 = vpop.eup %2438  ;;  %v855_v37 = vpack.c.bf16 %v2437_v35, %v2435_v33 }
 0x1d1   :  { %v762_v38 = vadd.f32 1.0, %v2439_v36 }
 0x1d3   :  { %2446 = vrcp.f32 %v762_v38  ;;  %1159 = vmatmul.mubr.bf16.gmra.mxu1 %v855_v37  ;;  %v2441_v39 = vpop.eup %2440 }
 0x1d4   :  { %1168 = vmatprep.mubr.bf16.mxu1 %v2845_v0 }
 0x1d7   :  { %v2443_v40 = vpop.eup %2442 }
 0x1d8   :  { %v856_v41 = vpack.c.bf16 %v2443_v40, %v2441_v39 }
 0x1db   :  { %1169 = vmatmul.mubr.bf16.gmra.mxu1 %v856_v41  ;;  %v2445_v42 = vpop.eup %2444 }
 0x1dc   :  { %1178 = vmatprep.mubr.bf16.mxu1 %v2845_v0 }
 0x1e0   :  { %v2447_v43 = vpop.eup %2446 }
 0x1e1   :  { %v857_v44 = vpack.c.bf16 %v2447_v43, %v2445_v42 }
 0x1e3   :  { %1179 = vmatmul.mubr.bf16.gmra.mxu1 %v857_v44 }
 0x212   :  { %v1000_v52 = vpop.f32.mrf.mxu1 }
 0x213   :  { %v1001_v53 = vadd.f32 %v1000_v52, %v2973_v50 }
 0x214   :  { %v1002_v0 = vpop.f32.mrf.mxu1 }
 0x215   :  { %v2038_v54 = vmul.f32 -1.442695, %v1001_v53  ;;  %v1003_v55 = vadd.f32 %v1002_v0, %v2975_v51 }
 0x216   :  { %v1004_v56 = vpop.f32.mrf.mxu1 }
 0x217   :  { %2448 = vpow2.f32 %v2038_v54  ;;  %v2039_v57 = vmul.f32 -1.442695, %v1003_v55  ;;  %v1005_v58 = vadd.f32 %v1004_v56, %v2973_v50 }
 0x218   :  { %v1006_v59 = vpop.f32.mrf.mxu1 }
 0x219   :  { %2450 = vpow2.f32 %v2039_v57  ;;  %v2040_v60 = vmul.f32 -1.442695, %v1005_v58  ;;  %v1007_v61 = vadd.f32 %v1006_v59, %v2975_v51 }
 0x21a   :  { %v1010_v62 = vpop.f32.mrf.mxu1 }
 0x21b   :  { %2452 = vpow2.f32 %v2040_v60  ;;  %v2041_v63 = vmul.f32 -1.442695, %v1007_v61  ;;  %v1011_v1 = vadd.f32 %v1010_v62, %v2973_v50 }
 0x21c   :  { %v1012_v2 = vpop.f32.mrf.mxu1 }
 0x21d   :  { %2454 = vpow2.f32 %v2041_v63  ;;  %v2042_v3 = vmul.f32 -1.442695, %v1011_v1  ;;  %v1013_v4 = vadd.f32 %v1012_v2, %v2975_v51 }
 0x21e   :  { %v1014_v5 = vpop.f32.mrf.mxu1 }
 0x21f   :  { %2456 = vpow2.f32 %v2042_v3  ;;  %v2043_v6 = vmul.f32 -1.442695, %v1013_v4  ;;  %v1015_v7 = vadd.f32 %v1014_v5, %v2973_v50 }
 0x220   :  { %v1016_v9 = vpop.f32.mrf.mxu1 }
 0x221   :  { %2458 = vpow2.f32 %v2043_v6  ;;  %v2044_v10 = vmul.f32 -1.442695, %v1015_v7  ;;  %v1017_v11 = vadd.f32 %v1016_v9, %v2975_v51 }
 0x223   :  { %2460 = vpow2.f32 %v2044_v10  ;;  %v2045_v12 = vmul.f32 -1.442695, %v1017_v11  ;;  %v1020_v13 = vpop.f32.mrf.mxu1 }
 0x224   :  { %v2449_v14 = vpop.eup %2448  ;;  %v1021_v15 = vadd.f32 %v1020_v13, %v2973_v50 }
 0x225   :  { %v1417_v16 = vadd.f32 1.0, %v2449_v14  ;;  %2462 = vpow2.f32 %v2045_v12  ;;  %v1022_v17 = vpop.f32.mrf.mxu1 }
 0x226   :  { %v2451_v18 = vpop.eup %2450  ;;  %v2046_v19 = vmul.f32 -1.442695, %v1021_v15  ;;  %v1023_v20 = vadd.f32 %v1022_v17, %v2975_v51 }
 0x227   :  { %2464 = vrcp.f32 %v1417_v16  ;;  %v1418_v21 = vadd.f32 1.0, %v2451_v18  ;;  %v1024_v22 = vpop.f32.mrf.mxu1 }
 0x228   :  { %v2453_v23 = vpop.eup %2452  ;;  %2466 = vpow2.f32 %v2046_v19  ;;  %v2047_v24 = vmul.f32 -1.442695, %v1023_v20  ;;  %v1025_v25 = vadd.f32 %v1024_v22, %v2973_v50 }
 0x229   :  { %2468 = vrcp.f32 %v1418_v21  ;;  %v1419_v26 = vadd.f32 1.0, %v2453_v23  ;;  %v1026_v27 = vpop.f32.mrf.mxu1 }
 0x22a   :  { %v2455_v28 = vpop.eup %2454  ;;  %2470 = vpow2.f32 %v2047_v24  ;;  %v2048_v29 = vmul.f32 -1.442695, %v1025_v25  ;;  %v1027_v30 = vadd.f32 %v1026_v27, %v2975_v51 }
 0x22b   :  { %2472 = vrcp.f32 %v1419_v26  ;;  %v1420_v31 = vadd.f32 1.0, %v2455_v28  ;;  %v1030_v8 = vpop.f32.mrf.mxu1 }
 0x22c   :  { %v2457_v32 = vpop.eup %2456  ;;  %2474 = vpow2.f32 %v2048_v29  ;;  %v2049_v33 = vmul.f32 -1.442695, %v1027_v30  ;;  %v1031_v34 = vadd.f32 %v1030_v8, %v2973_v50 }
 0x22d   :  { %2476 = vrcp.f32 %v1420_v31  ;;  %v1421_v35 = vadd.f32 1.0, %v2457_v32  ;;  %v1032_v36 = vpop.f32.mrf.mxu1 }
 0x22e   :  { %v2459_v37 = vpop.eup %2458  ;;  %2478 = vpow2.f32 %v2049_v33  ;;  %v2050_v38 = vmul.f32 -1.442695, %v1031_v34  ;;  %v1033_v39 = vadd.f32 %v1032_v36, %v2975_v51 }
 0x22f   :  { %2480 = vrcp.f32 %v1421_v35  ;;  %v1422_v40 = vadd.f32 1.0, %v2459_v37  ;;  %v1034_v41 = vpop.f32.mrf.mxu1 }
 0x230   :  { %v2461_v42 = vpop.eup %2460  ;;  %2482 = vpow2.f32 %v2050_v38  ;;  %v2051_v43 = vmul.f32 -1.442695, %v1033_v39  ;;  %v1035_v44 = vadd.f32 %v1034_v41, %v2973_v50 }
 0x231   :  { %2484 = vrcp.f32 %v1422_v40  ;;  %v1423_v45 = vadd.f32 1.0, %v2461_v42  ;;  %v1036_v46 = vpop.f32.mrf.mxu1 }
 0x232   :  { %v2463_v47 = vpop.eup %2462  ;;  %2486 = vpow2.f32 %v2051_v43  ;;  %v2052_v48 = vmul.f32 -1.442695, %v1035_v44  ;;  %v1037_v49 = vadd.f32 %v1036_v46, %v2975_v51 }
 0x233   :  { %2488 = vrcp.f32 %v1423_v45  ;;  %v1424_v52 = vadd.f32 1.0, %v2463_v47  ;;  %v1040_v53 = vpop.f32.mrf.mxu1 }
 0x234   :  { %v2465_v0 = vpop.eup %2464  ;;  %2490 = vpow2.f32 %v2052_v48  ;;  %v2053_v54 = vmul.f32 -1.442695, %v1037_v49  ;;  %v1041_v55 = vadd.f32 %v1040_v53, %v2973_v50 }
 0x235   :  { %v2467_v56 = vpop.eup %2466  ;;  %2492 = vrcp.f32 %v1424_v52  ;;  %v1042_v57 = vpop.f32.mrf.mxu1 }
 0x236   :  { %v2469_v58 = vpop.eup %2468  ;;  %v1425_v59 = vadd.f32 1.0, %v2467_v56  ;;  %2494 = vpow2.f32 %v2053_v54  ;;  %v2054_v60 = vmul.f32 -1.442695, %v1041_v55  ;;  %v1043_v61 = vadd.f32 %v1042_v57, %v2975_v51 }
 0x237   :  { %v2471_v62 = vpop.eup %2470  ;;  %v2152_v63 = vpack.c.bf16 %v2469_v58, %v2465_v0  ;;  %v1044_v1 = vpop.f32.mrf.mxu1 }
 0x238   :  { %v2473_v2 = vpop.eup %2472  ;;  %2496 = vrcp.f32 %v1425_v59  ;;  %v1426_v3 = vadd.f32 1.0, %v2471_v62  ;;  %v2055_v4 = vmul.f32 -1.442695, %v1043_v61  ;;  %v1045_v5 = vadd.f32 %v1044_v1, %v2973_v50 }
 0x239   :  { %v2475_v6 = vpop.eup %2474  ;;  %1873 = vst [vmem:[#allocation8] sm:$0xff] %v2152_v63  ;;  %2498 = vpow2.f32 %v2054_v60  ;;  %v1046_v7 = vpop.f32.mrf.mxu1 }
 0x23a   :  { %v2477_v9 = vpop.eup %2476  ;;  %2500 = vrcp.f32 %v1426_v3  ;;  %v1427_v10 = vadd.f32 1.0, %v2475_v6  ;;  %v2056_v11 = vmul.f32 -1.442695, %v1045_v5  ;;  %v1047_v12 = vadd.f32 %v1046_v7, %v2975_v51 }
 0x23b   :  { %v2479_v13 = vpop.eup %2478  ;;  %v2153_v14 = vpack.c.bf16 %v2477_v9, %v2473_v2  ;;  %2502 = vpow2.f32 %v2055_v4  ;;  %v1050_v15 = vpop.f32.mrf.mxu1 }
 0x23c   :  { %v2481_v16 = vpop.eup %2480  ;;  %2504 = vrcp.f32 %v1427_v10  ;;  %v1428_v17 = vadd.f32 1.0, %v2479_v13  ;;  %v2057_v18 = vmul.f32 -1.442695, %v1047_v12  ;;  %v1051_v19 = vadd.f32 %v1050_v15, %v2973_v50 }
 0x23d   :  { %v2483_v20 = vpop.eup %2482  ;;  %1874 = vst [vmem:[#allocation8 + $0x8] sm:$0xff] %v2153_v14  ;;  %2506 = vpow2.f32 %v2056_v11  ;;  %v1052_v21 = vpop.f32.mrf.mxu1 }
 0x23e   :  { %v2485_v22 = vpop.eup %2484  ;;  %2508 = vrcp.f32 %v1428_v17  ;;  %v1429_v23 = vadd.f32 1.0, %v2483_v20  ;;  %v2058_v24 = vmul.f32 -1.442695, %v1051_v19  ;;  %v1053_v25 = vadd.f32 %v1052_v21, %v2975_v51 }
 0x23f   :  { %v2487_v26 = vpop.eup %2486  ;;  %v2154_v27 = vpack.c.bf16 %v2485_v22, %v2481_v16  ;;  %2510 = vpow2.f32 %v2057_v18  ;;  %v1054_v28 = vpop.f32.mrf.mxu1 }
 0x240   :  { %v2489_v29 = vpop.eup %2488  ;;  %2512 = vrcp.f32 %v1429_v23  ;;  %v1430_v30 = vadd.f32 1.0, %v2487_v26  ;;  %v2059_v31 = vmul.f32 -1.442695, %v1053_v25  ;;  %v1055_v8 = vadd.f32 %v1054_v28, %v2973_v50 }
 0x241   :  { %v2491_v32 = vpop.eup %2490  ;;  %1875 = vst [vmem:[#allocation8 + $0x10] sm:$0xff] %v2154_v27  ;;  %2514 = vpow2.f32 %v2058_v24  ;;  %v1056_v33 = vpop.f32.mrf.mxu1 }
 0x242   :  { %v2493_v34 = vpop.eup %2492  ;;  %2516 = vrcp.f32 %v1430_v30  ;;  %v1431_v35 = vadd.f32 1.0, %v2491_v32  ;;  %v2060_v36 = vmul.f32 -1.442695, %v1055_v8  ;;  %v1057_v37 = vadd.f32 %v1056_v33, %v2975_v51 }
 0x243   :  { %v2495_v38 = vpop.eup %2494  ;;  %v2155_v39 = vpack.c.bf16 %v2493_v34, %v2489_v29  ;;  %2518 = vpow2.f32 %v2059_v31  ;;  %v1060_v40 = vpop.f32.mrf.mxu1 }
 0x244   :  { %2520 = vrcp.f32 %v1431_v35  ;;  %v1432_v41 = vadd.f32 1.0, %v2495_v38  ;;  %v2061_v42 = vmul.f32 -1.442695, %v1057_v37  ;;  %v1061_v43 = vadd.f32 %v1060_v40, %v2973_v50 }
 0x245   :  { %v2497_v44 = vpop.eup %2496  ;;  %1876 = vst [vmem:[#allocation8 + $0x18] sm:$0xff] %v2155_v39  ;;  %2522 = vpow2.f32 %v2060_v36  ;;  %v1062_v45 = vpop.f32.mrf.mxu1 }
 0x246   :  { %v2499_v46 = vpop.eup %2498  ;;  %2524 = vrcp.f32 %v1432_v41  ;;  %v2062_v47 = vmul.f32 -1.442695, %v1061_v43  ;;  %v1063_v48 = vadd.f32 %v1062_v45, %v2975_v51 }
 0x247   :  { %v2501_v49 = vpop.eup %2500  ;;  %v1433_v52 = vadd.f32 1.0, %v2499_v46  ;;  %2526 = vpow2.f32 %v2061_v42  ;;  %v1064_v53 = vpop.f32.mrf.mxu1 }
 0x248   :  { %v2503_v0 = vpop.eup %2502  ;;  %v2156_v54 = vpack.c.bf16 %v2501_v49, %v2497_v44  ;;  %2528 = vpow2.f32 %v2062_v47  ;;  %v2063_v55 = vmul.f32 -1.442695, %v1063_v48  ;;  %v1065_v56 = vadd.f32 %v1064_v53, %v2973_v50 }
 0x249   :  { %v2505_v57 = vpop.eup %2504  ;;  %2530 = vrcp.f32 %v1433_v52  ;;  %v1434_v58 = vadd.f32 1.0, %v2503_v0  ;;  %v1066_v59 = vpop.f32.mrf.mxu1 }
 0x24a   :  { %v2507_v60 = vpop.eup %2506  ;;  %1877 = vst [vmem:[#allocation8 + $0x20] sm:$0xff] %v2156_v54  ;;  %2532 = vpow2.f32 %v2063_v55  ;;  %v2064_v61 = vmul.f32 -1.442695, %v1065_v56  ;;  %v1067_v62 = vadd.f32 %v1066_v59, %v2975_v51 }
 0x24b   :  { %v2509_v63 = vpop.eup %2508  ;;  %2534 = vrcp.f32 %v1434_v58  ;;  %v1435_v1 = vadd.f32 1.0, %v2507_v60  ;;  %v1070_v2 = vpop.f32.mrf.mxu1 }
 0x24c   :  { %v2511_v3 = vpop.eup %2510  ;;  %v2157_v4 = vpack.c.bf16 %v2509_v63, %v2505_v57  ;;  %2536 = vpow2.f32 %v2064_v61  ;;  %v2065_v5 = vmul.f32 -1.442695, %v1067_v62  ;;  %v1071_v6 = vadd.f32 %v1070_v2, %v2973_v50 }
 0x24d   :  { %v2513_v7 = vpop.eup %2512  ;;  %2538 = vrcp.f32 %v1435_v1  ;;  %v1436_v9 = vadd.f32 1.0, %v2511_v3  ;;  %v1072_v10 = vpop.f32.mrf.mxu1 }
 0x24e   :  { %v2515_v11 = vpop.eup %2514  ;;  %1878 = vst [vmem:[#allocation8 + $0x28] sm:$0xff] %v2157_v4  ;;  %2540 = vpow2.f32 %v2065_v5  ;;  %v2066_v12 = vmul.f32 -1.442695, %v1071_v6  ;;  %v1073_v13 = vadd.f32 %v1072_v10, %v2975_v51 }
 0x24f   :  { %v2517_v14 = vpop.eup %2516  ;;  %2542 = vrcp.f32 %v1436_v9  ;;  %v1437_v15 = vadd.f32 1.0, %v2515_v11  ;;  %v1074_v16 = vpop.f32.mrf.mxu1 }
 0x250   :  { %v2519_v17 = vpop.eup %2518  ;;  %v2158_v18 = vpack.c.bf16 %v2517_v14, %v2513_v7  ;;  %2544 = vpow2.f32 %v2066_v12  ;;  %v2067_v19 = vmul.f32 -1.442695, %v1073_v13  ;;  %v1075_v20 = vadd.f32 %v1074_v16, %v2973_v50 }
 0x251   :  { %v2521_v21 = vpop.eup %2520  ;;  %2546 = vrcp.f32 %v1437_v15  ;;  %v1438_v22 = vadd.f32 1.0, %v2519_v17  ;;  %v1076_v23 = vpop.f32.mrf.mxu1 }
 0x252   :  { %v2523_v24 = vpop.eup %2522  ;;  %1879 = vst [vmem:[#allocation8 + $0x30] sm:$0xff] %v2158_v18  ;;  %2548 = vpow2.f32 %v2067_v19  ;;  %v2068_v25 = vmul.f32 -1.442695, %v1075_v20  ;;  %v1077_v26 = vadd.f32 %v1076_v23, %v2975_v51 }
 0x253   :  { %v2525_v27 = vpop.eup %2524  ;;  %2550 = vrcp.f32 %v1438_v22  ;;  %v1439_v28 = vadd.f32 1.0, %v2523_v24  ;;  %v1080_v29 = vpop.f32.mrf.mxu1 }
 0x254   :  { %v2527_v30 = vpop.eup %2526  ;;  %v2159_v31 = vpack.c.bf16 %v2525_v27, %v2521_v21  ;;  %2552 = vpow2.f32 %v2068_v25  ;;  %v2069_v8 = vmul.f32 -1.442695, %v1077_v26  ;;  %v1081_v32 = vadd.f32 %v1080_v29, %v2973_v50 }
 0x255   :  { %v2529_v33 = vpop.eup %2528  ;;  %2554 = vrcp.f32 %v1439_v28  ;;  %v1440_v34 = vadd.f32 1.0, %v2527_v30  ;;  %v1082_v35 = vpop.f32.mrf.mxu1 }
 0x256   :  { %v2531_v36 = vpop.eup %2530  ;;  %1880 = vst [vmem:[#allocation8 + $0x38] sm:$0xff] %v2159_v31  ;;  %v1441_v37 = vadd.f32 1.0, %v2529_v33  ;;  %2556 = vpow2.f32 %v2069_v8  ;;  %v2070_v38 = vmul.f32 -1.442695, %v1081_v32  ;;  %v1083_v39 = vadd.f32 %v1082_v35, %v2975_v51 }
 0x257   :  { %v2533_v40 = vpop.eup %2532  ;;  %2558 = vrcp.f32 %v1440_v34  ;;  %v1084_v41 = vpop.f32.mrf.mxu1 }
 0x258   :  { %v2535_v42 = vpop.eup %2534  ;;  %2560 = vrcp.f32 %v1441_v37  ;;  %v1442_v43 = vadd.f32 1.0, %v2533_v40  ;;  %v2071_v44 = vmul.f32 -1.442695, %v1083_v39  ;;  %v1085_v45 = vadd.f32 %v1084_v41, %v2973_v50 }
 0x259   :  { %v2537_v46 = vpop.eup %2536  ;;  %v2160_v47 = vpack.c.bf16 %v2535_v42, %v2531_v36  ;;  %2562 = vpow2.f32 %v2070_v38  ;;  %v1086_v48 = vpop.f32.mrf.mxu1 }
 0x25a   :  { %v2539_v49 = vpop.eup %2538  ;;  %2564 = vrcp.f32 %v1442_v43  ;;  %v1443_v52 = vadd.f32 1.0, %v2537_v46  ;;  %v2072_v53 = vmul.f32 -1.442695, %v1085_v45  ;;  %v1087_v0 = vadd.f32 %v1086_v48, %v2975_v51 }
 0x25b   :  { %v2541_v54 = vpop.eup %2540  ;;  %1881 = vst [vmem:[#allocation8 + $0x40] sm:$0xff] %v2160_v47  ;;  %2566 = vpow2.f32 %v2071_v44  ;;  %v1090_v55 = vpop.f32.mrf.mxu1 }
 0x25c   :  { %v2543_v56 = vpop.eup %2542  ;;  %2568 = vrcp.f32 %v1443_v52  ;;  %v1444_v57 = vadd.f32 1.0, %v2541_v54  ;;  %v2073_v58 = vmul.f32 -1.442695, %v1087_v0  ;;  %v1091_v59 = vadd.f32 %v1090_v55, %v2973_v50 }
 0x25d   :  { %v2545_v60 = vpop.eup %2544  ;;  %v2161_v61 = vpack.c.bf16 %v2543_v56, %v2539_v49  ;;  %2570 = vpow2.f32 %v2072_v53  ;;  %v1092_v62 = vpop.f32.mrf.mxu1 }
 0x25e   :  { %v2547_v63 = vpop.eup %2546  ;;  %2572 = vrcp.f32 %v1444_v57  ;;  %v1445_v1 = vadd.f32 1.0, %v2545_v60  ;;  %v2074_v2 = vmul.f32 -1.442695, %v1091_v59  ;;  %v1093_v3 = vadd.f32 %v1092_v62, %v2975_v51 }
 0x25f   :  { %v2549_v4 = vpop.eup %2548  ;;  %1882 = vst [vmem:[#allocation8 + $0x48] sm:$0xff] %v2161_v61  ;;  %2574 = vpow2.f32 %v2073_v58  ;;  %v1094_v5 = vpop.f32.mrf.mxu1 }
 0x260   :  { %v2551_v6 = vpop.eup %2550  ;;  %2576 = vrcp.f32 %v1445_v1  ;;  %v1446_v7 = vadd.f32 1.0, %v2549_v4  ;;  %v2075_v9 = vmul.f32 -1.442695, %v1093_v3  ;;  %v1095_v10 = vadd.f32 %v1094_v5, %v2973_v50 }
 0x261   :  { %v2553_v11 = vpop.eup %2552  ;;  %v2162_v12 = vpack.c.bf16 %v2551_v6, %v2547_v63  ;;  %2578 = vpow2.f32 %v2074_v2  ;;  %v1096_v13 = vpop.f32.mrf.mxu1 }
 0x262   :  { %v2555_v14 = vpop.eup %2554  ;;  %2580 = vrcp.f32 %v1446_v7  ;;  %v1447_v15 = vadd.f32 1.0, %v2553_v11  ;;  %v2076_v16 = vmul.f32 -1.442695, %v1095_v10  ;;  %v1097_v17 = vadd.f32 %v1096_v13, %v2975_v51 }
 0x263   :  { %v2557_v18 = vpop.eup %2556  ;;  %1883 = vst [vmem:[#allocation8 + $0x50] sm:$0xff] %v2162_v12  ;;  %2582 = vpow2.f32 %v2075_v9  ;;  %v1100_v19 = vpop.f32.mrf.mxu1 }
 0x264   :  { %v2559_v20 = vpop.eup %2558  ;;  %2584 = vrcp.f32 %v1447_v15  ;;  %v1448_v21 = vadd.f32 1.0, %v2557_v18  ;;  %v2077_v22 = vmul.f32 -1.442695, %v1097_v17  ;;  %v1101_v23 = vadd.f32 %v1100_v19, %v2973_v50 }
 0x265   :  { %v2561_v24 = vpop.eup %2560  ;;  %v2163_v25 = vpack.c.bf16 %v2559_v20, %v2555_v14  ;;  %2586 = vpow2.f32 %v2076_v16  ;;  %v1102_v26 = vpop.f32.mrf.mxu1 }
 0x266   :  { %v2563_v27 = vpop.eup %2562  ;;  %2588 = vrcp.f32 %v1448_v21  ;;  %v2078_v28 = vmul.f32 -1.442695, %v1101_v23  ;;  %v1103_v29 = vadd.f32 %v1102_v26, %v2975_v51 }
 0x267   :  { %v2565_v30 = vpop.eup %2564  ;;  %1884 = vst [vmem:[#allocation8 + $0x58] sm:$0xff] %v2163_v25  ;;  %v1449_v31 = vadd.f32 1.0, %v2563_v27  ;;  %2590 = vpow2.f32 %v2077_v22  ;;  %v1104_v8 = vpop.f32.mrf.mxu1 }
 0x268   :  { %v2567_v32 = vpop.eup %2566  ;;  %v2164_v33 = vpack.c.bf16 %v2565_v30, %v2561_v24  ;;  %2592 = vpow2.f32 %v2078_v28  ;;  %v2079_v34 = vmul.f32 -1.442695, %v1103_v29  ;;  %v1105_v35 = vadd.f32 %v1104_v8, %v2973_v50 }
 0x269   :  { %v2569_v36 = vpop.eup %2568  ;;  %2594 = vrcp.f32 %v1449_v31  ;;  %v1450_v37 = vadd.f32 1.0, %v2567_v32  ;;  %v1106_v38 = vpop.f32.mrf.mxu1 }
 0x26a   :  { %v2571_v39 = vpop.eup %2570  ;;  %1885 = vst [vmem:[#allocation8 + $0x60] sm:$0xff] %v2164_v33  ;;  %2596 = vpow2.f32 %v2079_v34  ;;  %v2080_v40 = vmul.f32 -1.442695, %v1105_v35  ;;  %v1107_v41 = vadd.f32 %v1106_v38, %v2975_v51 }
 0x26b   :  { %v2573_v42 = vpop.eup %2572  ;;  %2598 = vrcp.f32 %v1450_v37  ;;  %v1451_v43 = vadd.f32 1.0, %v2571_v39  ;;  %v1110_v44 = vpop.f32.mrf.mxu1 }
 0x26c   :  { %v2575_v45 = vpop.eup %2574  ;;  %v2165_v46 = vpack.c.bf16 %v2573_v42, %v2569_v36  ;;  %2600 = vpow2.f32 %v2080_v40  ;;  %v2081_v47 = vmul.f32 -1.442695, %v1107_v41  ;;  %v1111_v48 = vadd.f32 %v1110_v44, %v2973_v50 }
 0x26d   :  { %v2577_v49 = vpop.eup %2576  ;;  %2602 = vrcp.f32 %v1451_v43  ;;  %v1452_v52 = vadd.f32 1.0, %v2575_v45  ;;  %v1112_v53 = vpop.f32.mrf.mxu1 }
 0x26e   :  { %v2579_v0 = vpop.eup %2578  ;;  %1886 = vst [vmem:[#allocation8 + $0x68] sm:$0xff] %v2165_v46  ;;  %2604 = vpow2.f32 %v2081_v47  ;;  %v2082_v54 = vmul.f32 -1.442695, %v1111_v48  ;;  %v1113_v55 = vadd.f32 %v1112_v53, %v2975_v51 }
 0x26f   :  { %v2581_v56 = vpop.eup %2580  ;;  %2606 = vrcp.f32 %v1452_v52  ;;  %v1453_v57 = vadd.f32 1.0, %v2579_v0  ;;  %v1114_v58 = vpop.f32.mrf.mxu1 }
 0x270   :  { %v2583_v59 = vpop.eup %2582  ;;  %v2166_v60 = vpack.c.bf16 %v2581_v56, %v2577_v49  ;;  %2608 = vpow2.f32 %v2082_v54  ;;  %v2083_v61 = vmul.f32 -1.442695, %v1113_v55  ;;  %v1115_v62 = vadd.f32 %v1114_v58, %v2973_v50 }
 0x271   :  { %v2585_v63 = vpop.eup %2584  ;;  %2610 = vrcp.f32 %v1453_v57  ;;  %v1454_v1 = vadd.f32 1.0, %v2583_v59  ;;  %v1116_v2 = vpop.f32.mrf.mxu1 }
 0x272   :  { %v2587_v3 = vpop.eup %2586  ;;  %1887 = vst [vmem:[#allocation8 + $0x70] sm:$0xff] %v2166_v60  ;;  %2612 = vpow2.f32 %v2083_v61  ;;  %v2084_v4 = vmul.f32 -1.442695, %v1115_v62  ;;  %v1117_v5 = vadd.f32 %v1116_v2, %v2975_v51 }
 0x273   :  { %v2589_v6 = vpop.eup %2588  ;;  %2614 = vrcp.f32 %v1454_v1  ;;  %v1455_v7 = vadd.f32 1.0, %v2587_v3  ;;  %v1120_v9 = vpop.f32.mrf.mxu1 }
 0x274   :  { %v2591_v10 = vpop.eup %2590  ;;  %v2167_v11 = vpack.c.bf16 %v2589_v6, %v2585_v63  ;;  %2616 = vpow2.f32 %v2084_v4  ;;  %v2085_v12 = vmul.f32 -1.442695, %v1117_v5  ;;  %v1121_v13 = vadd.f32 %v1120_v9, %v2973_v50 }
 0x275   :  { %v2593_v14 = vpop.eup %2592  ;;  %2618 = vrcp.f32 %v1455_v7  ;;  %v1456_v15 = vadd.f32 1.0, %v2591_v10  ;;  %v1122_v16 = vpop.f32.mrf.mxu1 }
 0x276   :  { %v2595_v17 = vpop.eup %2594  ;;  %1888 = vst [vmem:[#allocation8 + $0x78] sm:$0xff] %v2167_v11  ;;  %v1457_v18 = vadd.f32 1.0, %v2593_v14  ;;  %2620 = vpow2.f32 %v2085_v12  ;;  %v2086_v19 = vmul.f32 -1.442695, %v1121_v13  ;;  %v1123_v20 = vadd.f32 %v1122_v16, %v2975_v51 }
 0x277   :  { %v2597_v21 = vpop.eup %2596  ;;  %2622 = vrcp.f32 %v1456_v15  ;;  %v1124_v22 = vpop.f32.mrf.mxu1 }
 0x278   :  { %v2599_v23 = vpop.eup %2598  ;;  %2624 = vrcp.f32 %v1457_v18  ;;  %v1458_v24 = vadd.f32 1.0, %v2597_v21  ;;  %v2087_v25 = vmul.f32 -1.442695, %v1123_v20  ;;  %v1125_v26 = vadd.f32 %v1124_v22, %v2973_v50 }
 0x279   :  { %v2601_v27 = vpop.eup %2600  ;;  %v2168_v28 = vpack.c.bf16 %v2599_v23, %v2595_v17  ;;  %2626 = vpow2.f32 %v2086_v19  ;;  %v1126_v29 = vpop.f32.mrf.mxu1 }
 0x27a   :  { %v2603_v30 = vpop.eup %2602  ;;  %2628 = vrcp.f32 %v1458_v24  ;;  %v1459_v31 = vadd.f32 1.0, %v2601_v27  ;;  %v2088_v8 = vmul.f32 -1.442695, %v1125_v26  ;;  %v1127_v32 = vadd.f32 %v1126_v29, %v2975_v51 }
 0x27b   :  { %v2605_v33 = vpop.eup %2604  ;;  %1889 = vst [vmem:[#allocation8 + $0x80] sm:$0xff] %v2168_v28  ;;  %2630 = vpow2.f32 %v2087_v25  ;;  %v1130_v34 = vpop.f32.mrf.mxu1 }
 0x27c   :  { %v2607_v35 = vpop.eup %2606  ;;  %2632 = vrcp.f32 %v1459_v31  ;;  %v1460_v36 = vadd.f32 1.0, %v2605_v33  ;;  %v2089_v37 = vmul.f32 -1.442695, %v1127_v32  ;;  %v1131_v38 = vadd.f32 %v1130_v34, %v2973_v50 }
 0x27d   :  { %v2609_v39 = vpop.eup %2608  ;;  %v2169_v40 = vpack.c.bf16 %v2607_v35, %v2603_v30  ;;  %2634 = vpow2.f32 %v2088_v8  ;;  %v1132_v41 = vpop.f32.mrf.mxu1 }
 0x27e   :  { %v2611_v42 = vpop.eup %2610  ;;  %2636 = vrcp.f32 %v1460_v36  ;;  %v1461_v43 = vadd.f32 1.0, %v2609_v39  ;;  %v2090_v44 = vmul.f32 -1.442695, %v1131_v38  ;;  %v1133_v45 = vadd.f32 %v1132_v41, %v2975_v51 }
 0x27f   :  { %v2613_v46 = vpop.eup %2612  ;;  %1890 = vst [vmem:[#allocation8 + $0x88] sm:$0xff] %v2169_v40  ;;  %2638 = vpow2.f32 %v2089_v37  ;;  %v1134_v47 = vpop.f32.mrf.mxu1 }
 0x280   :  { %v2615_v48 = vpop.eup %2614  ;;  %2640 = vrcp.f32 %v1461_v43  ;;  %v1462_v49 = vadd.f32 1.0, %v2613_v46  ;;  %v2091_v52 = vmul.f32 -1.442695, %v1133_v45  ;;  %v1135_v53 = vadd.f32 %v1134_v47, %v2973_v50 }
 0x281   :  { %v2617_v0 = vpop.eup %2616  ;;  %v2170_v54 = vpack.c.bf16 %v2615_v48, %v2611_v42  ;;  %2642 = vpow2.f32 %v2090_v44  ;;  %v1136_v55 = vpop.f32.mrf.mxu1 }
 0x282   :  { %v2619_v56 = vpop.eup %2618  ;;  %2644 = vrcp.f32 %v1462_v49  ;;  %v1463_v57 = vadd.f32 1.0, %v2617_v0  ;;  %v2092_v58 = vmul.f32 -1.442695, %v1135_v53  ;;  %v1137_v59 = vadd.f32 %v1136_v55, %v2975_v51 }
 0x283   :  { %v2621_v60 = vpop.eup %2620  ;;  %1891 = vst [vmem:[#allocation8 + $0x90] sm:$0xff] %v2170_v54  ;;  %2646 = vpow2.f32 %v2091_v52  ;;  %v1140_v61 = vpop.f32.mrf.mxu1 }
 0x284   :  { %v2623_v62 = vpop.eup %2622  ;;  %2648 = vrcp.f32 %v1463_v57  ;;  %v1464_v63 = vadd.f32 1.0, %v2621_v60  ;;  %v2093_v1 = vmul.f32 -1.442695, %v1137_v59  ;;  %v1141_v2 = vadd.f32 %v1140_v61, %v2973_v50 }
 0x285   :  { %v2625_v3 = vpop.eup %2624  ;;  %v2171_v4 = vpack.c.bf16 %v2623_v62, %v2619_v56  ;;  %2650 = vpow2.f32 %v2092_v58  ;;  %v1142_v5 = vpop.f32.mrf.mxu1 }
 0x286   :  { %v2627_v6 = vpop.eup %2626  ;;  %2652 = vrcp.f32 %v1464_v63  ;;  %v2094_v7 = vmul.f32 -1.442695, %v1141_v2  ;;  %v1143_v9 = vadd.f32 %v1142_v5, %v2975_v51 }
 0x287   :  { %v2629_v10 = vpop.eup %2628  ;;  %1892 = vst [vmem:[#allocation8 + $0x98] sm:$0xff] %v2171_v4  ;;  %v1465_v11 = vadd.f32 1.0, %v2627_v6  ;;  %2654 = vpow2.f32 %v2093_v1  ;;  %v1144_v12 = vpop.f32.mrf.mxu1 }
 0x288   :  { %v2631_v13 = vpop.eup %2630  ;;  %v2172_v14 = vpack.c.bf16 %v2629_v10, %v2625_v3  ;;  %2656 = vpow2.f32 %v2094_v7  ;;  %v2095_v15 = vmul.f32 -1.442695, %v1143_v9  ;;  %v1145_v16 = vadd.f32 %v1144_v12, %v2973_v50 }
 0x289   :  { %v2633_v17 = vpop.eup %2632  ;;  %2658 = vrcp.f32 %v1465_v11  ;;  %v1466_v18 = vadd.f32 1.0, %v2631_v13  ;;  %v1146_v19 = vpop.f32.mrf.mxu1 }
 0x28a   :  { %v2635_v20 = vpop.eup %2634  ;;  %1893 = vst [vmem:[#allocation8 + $0xa0] sm:$0xff] %v2172_v14  ;;  %2660 = vpow2.f32 %v2095_v15  ;;  %v2096_v21 = vmul.f32 -1.442695, %v1145_v16  ;;  %v1147_v22 = vadd.f32 %v1146_v19, %v2975_v51 }
 0x28b   :  { %v2637_v23 = vpop.eup %2636  ;;  %2662 = vrcp.f32 %v1466_v18  ;;  %v1467_v24 = vadd.f32 1.0, %v2635_v20  ;;  %v1150_v25 = vpop.f32.mrf.mxu1 }
 0x28c   :  { %v2639_v26 = vpop.eup %2638  ;;  %v2173_v27 = vpack.c.bf16 %v2637_v23, %v2633_v17  ;;  %2664 = vpow2.f32 %v2096_v21  ;;  %v2097_v28 = vmul.f32 -1.442695, %v1147_v22  ;;  %v1151_v29 = vadd.f32 %v1150_v25, %v2973_v50 }
 0x28d   :  { %v2641_v30 = vpop.eup %2640  ;;  %2666 = vrcp.f32 %v1467_v24  ;;  %v1468_v31 = vadd.f32 1.0, %v2639_v26  ;;  %v1152_v8 = vpop.f32.mrf.mxu1 }
 0x28e   :  { %v2643_v32 = vpop.eup %2642  ;;  %1894 = vst [vmem:[#allocation8 + $0xa8] sm:$0xff] %v2173_v27  ;;  %2668 = vpow2.f32 %v2097_v28  ;;  %v2098_v33 = vmul.f32 -1.442695, %v1151_v29  ;;  %v1153_v34 = vadd.f32 %v1152_v8, %v2975_v51 }
 0x28f   :  { %v2645_v35 = vpop.eup %2644  ;;  %2670 = vrcp.f32 %v1468_v31  ;;  %v1469_v36 = vadd.f32 1.0, %v2643_v32  ;;  %v1154_v37 = vpop.f32.mrf.mxu1 }
 0x290   :  { %v2647_v38 = vpop.eup %2646  ;;  %v2174_v39 = vpack.c.bf16 %v2645_v35, %v2641_v30  ;;  %2672 = vpow2.f32 %v2098_v33  ;;  %v2099_v40 = vmul.f32 -1.442695, %v1153_v34  ;;  %v1155_v41 = vadd.f32 %v1154_v37, %v2973_v50 }
 0x291   :  { %v2649_v42 = vpop.eup %2648  ;;  %2674 = vrcp.f32 %v1469_v36  ;;  %v1470_v43 = vadd.f32 1.0, %v2647_v38  ;;  %v1156_v44 = vpop.f32.mrf.mxu1 }
 0x292   :  { %v2651_v45 = vpop.eup %2650  ;;  %1895 = vst [vmem:[#allocation8 + $0xb0] sm:$0xff] %v2174_v39  ;;  %2676 = vpow2.f32 %v2099_v40  ;;  %v2100_v46 = vmul.f32 -1.442695, %v1155_v41  ;;  %v1157_v47 = vadd.f32 %v1156_v44, %v2975_v51 }
 0x293   :  { %v2653_v48 = vpop.eup %2652  ;;  %2678 = vrcp.f32 %v1470_v43  ;;  %v1471_v49 = vadd.f32 1.0, %v2651_v45  ;;  %v1160_v52 = vpop.f32.mrf.mxu1 }
 0x294   :  { %v2655_v53 = vpop.eup %2654  ;;  %v2175_v0 = vpack.c.bf16 %v2653_v48, %v2649_v42  ;;  %2680 = vpow2.f32 %v2100_v46  ;;  %v2101_v54 = vmul.f32 -1.442695, %v1157_v47  ;;  %v1161_v55 = vadd.f32 %v1160_v52, %v2973_v50 }
 0x295   :  { %v2657_v56 = vpop.eup %2656  ;;  %2682 = vrcp.f32 %v1471_v49  ;;  %v1472_v57 = vadd.f32 1.0, %v2655_v53  ;;  %v1162_v58 = vpop.f32.mrf.mxu1 }
 0x296   :  { %v2659_v59 = vpop.eup %2658  ;;  %1896 = vst [vmem:[#allocation8 + $0xb8] sm:$0xff] %v2175_v0  ;;  %v1473_v60 = vadd.f32 1.0, %v2657_v56  ;;  %2684 = vpow2.f32 %v2101_v54  ;;  %v2102_v61 = vmul.f32 -1.442695, %v1161_v55  ;;  %v1163_v62 = vadd.f32 %v1162_v58, %v2975_v51 }
 0x297   :  { %v2661_v63 = vpop.eup %2660  ;;  %2686 = vrcp.f32 %v1472_v57  ;;  %v1164_v1 = vpop.f32.mrf.mxu1 }
 0x298   :  { %v2663_v2 = vpop.eup %2662  ;;  %2688 = vrcp.f32 %v1473_v60  ;;  %v1474_v3 = vadd.f32 1.0, %v2661_v63  ;;  %v2103_v4 = vmul.f32 -1.442695, %v1163_v62  ;;  %v1165_v5 = vadd.f32 %v1164_v1, %v2973_v50 }
 0x299   :  { %v2665_v6 = vpop.eup %2664  ;;  %v2176_v7 = vpack.c.bf16 %v2663_v2, %v2659_v59  ;;  %2690 = vpow2.f32 %v2102_v61  ;;  %v1166_v9 = vpop.f32.mrf.mxu1 }
 0x29a   :  { %v2667_v10 = vpop.eup %2666  ;;  %2692 = vrcp.f32 %v1474_v3  ;;  %v1475_v11 = vadd.f32 1.0, %v2665_v6  ;;  %v2104_v12 = vmul.f32 -1.442695, %v1165_v5  ;;  %v1167_v13 = vadd.f32 %v1166_v9, %v2975_v51 }
 0x29b   :  { %v2669_v14 = vpop.eup %2668  ;;  %1897 = vst [vmem:[#allocation8 + $0xc0] sm:$0xff] %v2176_v7  ;;  %2694 = vpow2.f32 %v2103_v4  ;;  %v1170_v15 = vpop.f32.mrf.mxu1 }
 0x29c   :  { %v2671_v16 = vpop.eup %2670  ;;  %2696 = vrcp.f32 %v1475_v11  ;;  %v1476_v17 = vadd.f32 1.0, %v2669_v14  ;;  %v2105_v18 = vmul.f32 -1.442695, %v1167_v13  ;;  %v1171_v19 = vadd.f32 %v1170_v15, %v2973_v50 }
 0x29d   :  { %v2673_v20 = vpop.eup %2672  ;;  %v2177_v21 = vpack.c.bf16 %v2671_v16, %v2667_v10  ;;  %2698 = vpow2.f32 %v2104_v12  ;;  %v1172_v22 = vpop.f32.mrf.mxu1 }
 0x29e   :  { %v2675_v23 = vpop.eup %2674  ;;  %2700 = vrcp.f32 %v1476_v17  ;;  %v1477_v24 = vadd.f32 1.0, %v2673_v20  ;;  %v2106_v25 = vmul.f32 -1.442695, %v1171_v19  ;;  %v1173_v26 = vadd.f32 %v1172_v22, %v2975_v51 }
 0x29f   :  { %v2677_v27 = vpop.eup %2676  ;;  %1898 = vst [vmem:[#allocation8 + $0xc8] sm:$0xff] %v2177_v21  ;;  %2702 = vpow2.f32 %v2105_v18  ;;  %v1174_v28 = vpop.f32.mrf.mxu1 }
 0x2a0   :  { %v2679_v29 = vpop.eup %2678  ;;  %2704 = vrcp.f32 %v1477_v24  ;;  %v1478_v30 = vadd.f32 1.0, %v2677_v27  ;;  %v2107_v31 = vmul.f32 -1.442695, %v1173_v26  ;;  %v1175_v8 = vadd.f32 %v1174_v28, %v2973_v50 }
 0x2a1   :  { %v2681_v32 = vpop.eup %2680  ;;  %v2178_v33 = vpack.c.bf16 %v2679_v29, %v2675_v23  ;;  %2706 = vpow2.f32 %v2106_v25  ;;  %v1176_v34 = vpop.f32.mrf.mxu1 }
 0x2a2   :  { %v2683_v35 = vpop.eup %2682  ;;  %2708 = vrcp.f32 %v1478_v30  ;;  %v1479_v36 = vadd.f32 1.0, %v2681_v32  ;;  %v2108_v37 = vmul.f32 -1.442695, %v1175_v8  ;;  %v1177_v38 = vadd.f32 %v1176_v34, %v2975_v51 }
 0x2a3   :  { %v2685_v39 = vpop.eup %2684  ;;  %1899 = vst [vmem:[#allocation8 + $0xd0] sm:$0xff] %v2178_v33  ;;  %2710 = vpow2.f32 %v2107_v31  ;;  %v1180_v40 = vpop.f32.mrf.mxu1 }
 0x2a4   :  { %v2687_v41 = vpop.eup %2686  ;;  %2712 = vrcp.f32 %v1479_v36  ;;  %v1480_v42 = vadd.f32 1.0, %v2685_v39  ;;  %v2109_v43 = vmul.f32 -1.442695, %v1177_v38  ;;  %v1181_v44 = vadd.f32 %v1180_v40, %v2973_v50 }
 0x2a5   :  { %v2689_v45 = vpop.eup %2688  ;;  %v2179_v46 = vpack.c.bf16 %v2687_v41, %v2683_v35  ;;  %2714 = vpow2.f32 %v2108_v37  ;;  %v1182_v47 = vpop.f32.mrf.mxu1 }
 0x2a6   :  { %v2691_v48 = vpop.eup %2690  ;;  %2716 = vrcp.f32 %v1480_v42  ;;  %v2110_v49 = vmul.f32 -1.442695, %v1181_v44  ;;  %v1183_v52 = vadd.f32 %v1182_v47, %v2975_v51 }
 0x2a7   :  { %v2693_v53 = vpop.eup %2692  ;;  %1900 = vst [vmem:[#allocation8 + $0xd8] sm:$0xff] %v2179_v46  ;;  %v1481_v0 = vadd.f32 1.0, %v2691_v48  ;;  %2718 = vpow2.f32 %v2109_v43  ;;  %v1184_v54 = vpop.f32.mrf.mxu1 }
 0x2a8   :  { %v2695_v55 = vpop.eup %2694  ;;  %v2180_v56 = vpack.c.bf16 %v2693_v53, %v2689_v45  ;;  %2720 = vpow2.f32 %v2110_v49  ;;  %v2111_v57 = vmul.f32 -1.442695, %v1183_v52  ;;  %v1185_v58 = vadd.f32 %v1184_v54, %v2973_v50 }
 0x2a9   :  { %v2697_v59 = vpop.eup %2696  ;;  %2722 = vrcp.f32 %v1481_v0  ;;  %v1482_v60 = vadd.f32 1.0, %v2695_v55  ;;  %v1186_v61 = vpop.f32.mrf.mxu1 }
 0x2aa   :  { %v2699_v62 = vpop.eup %2698  ;;  %1901 = vst [vmem:[#allocation8 + $0xe0] sm:$0xff] %v2180_v56  ;;  %2724 = vpow2.f32 %v2111_v57  ;;  %v2112_v63 = vmul.f32 -1.442695, %v1185_v58  ;;  %v1187_v1 = vadd.f32 %v1186_v61, %v2975_v51 }
 0x2ab   :  { %v2701_v2 = vpop.eup %2700  ;;  %2726 = vrcp.f32 %v1482_v60  ;;  %v1483_v3 = vadd.f32 1.0, %v2699_v62 }
 0x2ac   :  { %v2703_v4 = vpop.eup %2702  ;;  %v2181_v5 = vpack.c.bf16 %v2701_v2, %v2697_v59  ;;  %2728 = vpow2.f32 %v2112_v63  ;;  %v2113_v6 = vmul.f32 -1.442695, %v1187_v1 }
 0x2ad   :  { %v2705_v7 = vpop.eup %2704  ;;  %2730 = vrcp.f32 %v1483_v3  ;;  %v1484_v50 = vadd.f32 1.0, %v2703_v4 }
 0x2ae   :  { %v2707_v9 = vpop.eup %2706  ;;  %1902 = vst [vmem:[#allocation8 + $0xe8] sm:$0xff] %v2181_v5  ;;  %2732 = vpow2.f32 %v2113_v6 }
 0x2af   :  { %v2709_v10 = vpop.eup %2708  ;;  %2734 = vrcp.f32 %v1484_v50  ;;  %v1485_v11 = vadd.f32 1.0, %v2707_v9 }
 0x2b0   :  { %v2711_v12 = vpop.eup %2710  ;;  %v2182_v13 = vpack.c.bf16 %v2709_v10, %v2705_v7 }
 0x2b1   :  { %v2713_v14 = vpop.eup %2712  ;;  %v1486_v51 = vadd.f32 1.0, %v2711_v12  ;;  %2736 = vrcp.f32 %v1485_v11 }
 0x2b2   :  { %v2715_v15 = vpop.eup %2714  ;;  %1903 = vst [vmem:[#allocation8 + $0xf0] sm:$0xff] %v2182_v13 }
 0x2b3   :  { %v2717_v16 = vpop.eup %2716  ;;  %2738 = vrcp.f32 %v1486_v51  ;;  %v1487_v17 = vadd.f32 1.0, %v2715_v15 }
 0x2b4   :  { %v2719_v18 = vpop.eup %2718  ;;  %v2183_v19 = vpack.c.bf16 %v2717_v16, %v2713_v14 }
 0x2b5   :  { %v2721_v20 = vpop.eup %2720  ;;  %v1488_v21 = vadd.f32 1.0, %v2719_v18  ;;  %2740 = vrcp.f32 %v1487_v17 }
 0x2b6   :  { %v2723_v22 = vpop.eup %2722  ;;  %1904 = vst [vmem:[#allocation8 + $0xf8] sm:$0xff] %v2183_v19  ;;  %v1489_v23 = vadd.f32 1.0, %v2721_v20 }
 0x2b7   :  { %v2725_v24 = vpop.eup %2724  ;;  %2742 = vrcp.f32 %v1488_v21 }
 0x2b8   :  { %v2727_v25 = vpop.eup %2726  ;;  %v1490_v26 = vadd.f32 1.0, %v2725_v24  ;;  %2744 = vrcp.f32 %v1489_v23 }
 0x2b9   :  { %v2729_v27 = vpop.eup %2728  ;;  %v2184_v28 = vpack.c.bf16 %v2727_v25, %v2723_v22 }
 0x2ba   :  { %v2731_v29 = vpop.eup %2730  ;;  %2746 = vrcp.f32 %v1490_v26  ;;  %v1491_v30 = vadd.f32 1.0, %v2729_v27 }
 0x2bb   :  { %v2733_v31 = vpop.eup %2732  ;;  %1905 = vst [vmem:[#allocation8 + $0x100] sm:$0xff] %v2184_v28 }
 0x2bc   :  { %v2735_v8 = vpop.eup %2734  ;;  %v1492_v32 = vadd.f32 1.0, %v2733_v31  ;;  %2748 = vrcp.f32 %v1491_v30 }
 0x2bd   :  { %v2185_v33 = vpack.c.bf16 %v2735_v8, %v2731_v29 }
 0x2be   :  { %2750 = vrcp.f32 %v1492_v32  ;;  %v2737_v34 = vpop.eup %2736 }
 0x2bf   :  { %1906 = vst [vmem:[#allocation8 + $0x108] sm:$0xff] %v2185_v33 }
 0x2c0   :  { %v2739_v35 = vpop.eup %2738 }
 0x2c1   :  { %v2186_v36 = vpack.c.bf16 %v2739_v35, %v2737_v34 }
 0x2c2   :  { %v2741_v37 = vpop.eup %2740 }
 0x2c3   :  { %1907 = vst [vmem:[#allocation8 + $0x110] sm:$0xff] %v2186_v36 }
 0x2c4   :  { %v2743_v38 = vpop.eup %2742 }
 0x2c5   :  { %v2187_v39 = vpack.c.bf16 %v2743_v38, %v2741_v37  ;;  %v2745_v40 = vpop.eup %2744 }
 0x2c7   :  { %v2747_v41 = vpop.eup %2746  ;;  %1908 = vst [vmem:[#allocation8 + $0x118] sm:$0xff] %v2187_v39 }
 0x2c8   :  { %v2188_v42 = vpack.c.bf16 %v2747_v41, %v2745_v40 }
 0x2c9   :  { %v2749_v43 = vpop.eup %2748 }
 0x2ca   :  { %1909 = vst [vmem:[#allocation8 + $0x120] sm:$0xff] %v2188_v42 }
 0x2cb   :  { %v2751_v44 = vpop.eup %2750 }
 0x2cc   :  { %v2189_v45 = vpack.c.bf16 %v2751_v44, %v2749_v43 }
 0x2ce   :  { %1910 = vst [vmem:[#allocation8 + $0x128] sm:$0xff] %v2189_v45 }
 0x2cf   :  { %2823 = shalt.err (!%p2820_p5)
}
 0x2d0   :  { %1922 = dma.vmem_to_hbm [thread:$0]  %s1917_s12, 4864, %s3064_s5, [#allocation4], %s2842_s28, %s2842_s28, %s2843_s29  }
 0x2d1   :  { %2836 = dma.done.wait [#allocation4], 4864  }
 0x2d2   :  { %2837 = vsyncadd [#allocation4], 4294962432 }
 0x2d3   :  { %1926 = vsyncpa [#allocation3], 1 }
 0x2d4   :  { %1927 = vsyncpa [#allocation6], 1 }
 0x2d5   :  { %1928 = vsyncpa [#allocation4], 1 }

</bundles_post_ra>
